<compile_context>
chip_gen: v7x
topology: tpu7x:2x2x1
jax: 0.10.0
libtpu: 0.0.40
codegen_flags: <defaults>
</compile_context>

<pallas_src>
import functools

import jax
import jax.numpy as jnp
from jax.experimental import pallas as pl
from jax.experimental.pallas import tpu as pltpu

EPS = 1e-5
_VMEM_LIMIT = 48 * 1024 * 1024   # safe on v5e/v6e (128 MiB) and v7x (64 MiB)


def _round_up(a, b):
    return (a + b - 1) // b * b


# --------------------------------------------------------------------------
# Kernel A (grid over N, "parallel"):
#   conv branch : z = sum_{kh,kw} xpad[.,h+kh,w+kw,:] @ w1[kh,kw] + b1
#                 (K*K accumulated bf16 MXU dots, f32 accumulator)
#   residual    : r = xds @ w2 + b2   (single bf16 dot)
#   plus per-image [sum, sum_sq] per channel for training-mode BatchNorm.
# --------------------------------------------------------------------------
def _make_kernel_a(H, W, Ho, Wo, K, Cin, Cpad):
    HW = H * W
    HWr = Ho * Wo

    def kernel(xp_ref, w1_ref, b1_ref, xd_ref, w2_ref, b2_ref,
               z_ref, zst_ref, r_ref, rst_ref):
        # ---- conv branch: K*K taps as contiguous VMEM slices (no im2col) ----
        acc = jnp.zeros((HW, Cpad), jnp.float32)
        for kh in range(K):
            for kw in range(K):
                tap = xp_ref[0, kh:kh + H, kw:kw + W, :].reshape(HW, Cin)
                acc = acc + jnp.dot(tap, w1_ref[kh * K + kw],
                                    preferred_element_type=jnp.float32)
        z = acc + b1_ref[...]                                   # (HW, Cpad) f32
        z_ref[...] = z.reshape(1, H, W, Cpad)
        zst_ref[...] = jnp.concatenate(
            [jnp.sum(z, axis=0, keepdims=True),
             jnp.sum(z * z, axis=0, keepdims=True)], axis=0)[None]

        # ---- residual branch: 1x1 stride-s conv as one dot ----
        xr = xd_ref[0]                                          # (HWr, Cin) bf16
        r = jnp.dot(xr, w2_ref[...],
                    preferred_element_type=jnp.float32) + b2_ref[...]
        r_ref[...] = r[None]
        rst_ref[...] = jnp.concatenate(
            [jnp.sum(r, axis=0, keepdims=True),
             jnp.sum(r * r, axis=0, keepdims=True)], axis=0)[None]

    return kernel


# --------------------------------------------------------------------------
# Kernel B (grid over N, "parallel"):
#   finish BN from the global [sum, sum_sq], normalize z, embed it in a
#   -inf halo (VMEM scratch), separable KxK/stride-s max-pool, then add the
#   BN-normalized residual.
# --------------------------------------------------------------------------
def _make_kernel_b(H, W, Ho, Wo, K, s, p, Cpad, m1, m2, eps):
    Hp2, Wp2 = H + 2 * p, W + 2 * p
    inv1 = 1.0 / float(m1)
    inv2 = 1.0 / float(m2)

    def kernel(z_ref, zs_ref, g1_ref, be1_ref, r_ref, rs_ref, g2_ref, be2_ref,
               out_ref, ypad_ref):
        # --- BN parameters (one-pass stats, f32) ---
        mu1 = zs_ref[0:1, :] * inv1
        var1 = jnp.maximum(zs_ref[1:2, :] * inv1 - mu1 * mu1, 0.0)
        sc1 = g1_ref[...] * jax.lax.rsqrt(var1 + eps)
        sh1 = be1_ref[...] - mu1 * sc1

        mu2 = rs_ref[0:1, :] * inv2
        var2 = jnp.maximum(rs_ref[1:2, :] * inv2 - mu2 * mu2, 0.0)
        sc2 = g2_ref[...] * jax.lax.rsqrt(var2 + eps)
        sh2 = be2_ref[...] - mu2 * sc2

        # --- normalize BEFORE padding, then fill the -inf pool halo ---
        ypad_ref[...] = jnp.full((Hp2, Wp2, Cpad), -jnp.inf, jnp.float32)
        ypad_ref[p:p + H, p:p + W, :] = z_ref[0] * sc1 + sh1

        # --- separable KxK / stride-s max-pool ---
        # horizontal: K strided column gathers (lane dim stays contiguous)
        hmax = ypad_ref[:, pl.ds(0, Wo, stride=s), :]
        for kw in range(1, K):
            hmax = jnp.maximum(hmax, ypad_ref[:, pl.ds(kw, Wo, stride=s), :])

        # residual branch: BN affine
        rn = r_ref[0] * sc2 + sh2                                # (Ho*Wo, Cpad)

        # vertical: contiguous K-row windows per output row, then add + store
        for i in range(Ho):
            row = hmax[s * i]
            for kh in range(1, K):
                row = jnp.maximum(row, hmax[s * i + kh])
            out_ref[0, i, :, :] = row + rn[i * Wo:(i + 1) * Wo]

    return kernel


# --------------------------------------------------------------------------
# Wrapper: layout plumbing only (NCHW<->NHWC, small zero-pad of x, stride-s
# subsample of x for the residual taps, channel padding to 128 lanes).
# --------------------------------------------------------------------------
@functools.partial(jax.jit, static_argnames=("kernel_size", "stride"))
def layer_block_pallas(x_nchw, params, *, kernel_size, stride):
    N, Cin, H, W = x_nchw.shape
    K, s = kernel_size, stride
    p = (K - 1) // 2
    Ho = (H + 2 * p - K) // s + 1
    Wo = (W + 2 * p - K) // s + 1
    Cout = params["b1"].shape[0]
    Cpad = _round_up(Cout, 128)
    Hp2, Wp2 = H + 2 * p, W + 2 * p
    HWr = Ho * Wo

    def padc(a):
        pad = [(0, 0)] * (a.ndim - 1) + [(0, Cpad - a.shape[-1])]
        return jnp.pad(a, pad)

    x = jnp.transpose(x_nchw, (0, 2, 3, 1)).astype(jnp.bfloat16)       # NHWC bf16
    xp = jnp.pad(x, ((0, 0), (p, p), (p, p), (0, 0)))                  # conv zero pad
    xds = x[:, ::s, ::s, :][:, :Ho, :Wo, :].reshape(N, HWr, Cin)       # residual taps

    w1 = padc(params["w1"].reshape(K * K, Cin, Cout)).astype(jnp.bfloat16)
    w2 = padc(params["w2"]).astype(jnp.bfloat16)
    b1 = padc(params["b1"]).reshape(1, Cpad).astype(jnp.float32)
    b2 = padc(params["b2"]).reshape(1, Cpad).astype(jnp.float32)
    g1 = padc(params["g1"]).reshape(1, Cpad).astype(jnp.float32)
    be1 = padc(params["be1"]).reshape(1, Cpad).astype(jnp.float32)
    g2 = padc(params["g2"]).reshape(1, Cpad).astype(jnp.float32)
    be2 = padc(params["be2"]).reshape(1, Cpad).astype(jnp.float32)

    # phase 1: conv + residual matmuls + per-image BN partial stats (Pallas)
    kernel_a = _make_kernel_a(H, W, Ho, Wo, K, Cin, Cpad)
    z, zst, r, rst = pl.pallas_call(
        kernel_a,
        out_shape=(jax.ShapeDtypeStruct((N, H, W, Cpad), jnp.float32),
                   jax.ShapeDtypeStruct((N, 2, Cpad), jnp.float32),
                   jax.ShapeDtypeStruct((N, HWr, Cpad), jnp.float32),
                   jax.ShapeDtypeStruct((N, 2, Cpad), jnp.float32)),
        grid=(N,),
        in_specs=[pl.BlockSpec((1, Hp2, Wp2, Cin), lambda n: (n, 0, 0, 0)),
                  pl.BlockSpec((K * K, Cin, Cpad), lambda n: (0, 0, 0)),
                  pl.BlockSpec((1, Cpad), lambda n: (0, 0)),
                  pl.BlockSpec((1, HWr, Cin), lambda n: (n, 0, 0)),
                  pl.BlockSpec((Cin, Cpad), lambda n: (0, 0)),
                  pl.BlockSpec((1, Cpad), lambda n: (0, 0))],
        out_specs=(pl.BlockSpec((1, H, W, Cpad), lambda n: (n, 0, 0, 0)),
                   pl.BlockSpec((1, 2, Cpad), lambda n: (n, 0, 0)),
                   pl.BlockSpec((1, HWr, Cpad), lambda n: (n, 0, 0)),
                   pl.BlockSpec((1, 2, Cpad), lambda n: (n, 0, 0))),
        compiler_params=pltpu.CompilerParams(
            dimension_semantics=("parallel",),
            vmem_limit_bytes=_VMEM_LIMIT),
    )(xp, w1, b1, xds, w2, b2)

    # tiny global-batch stat reduction (2*Cpad floats per branch)
    zsum = jnp.sum(zst, axis=0)
    rsum = jnp.sum(rst, axis=0)

    # phase 2: BN finalize + max-pool + residual BN + add (Pallas)
    kernel_b = _make_kernel_b(H, W, Ho, Wo, K, s, p, Cpad,
                              N * H * W, N * Ho * Wo, EPS)
    out = pl.pallas_call(
        kernel_b,
        out_shape=jax.ShapeDtypeStruct((N, Ho, Wo, Cpad), jnp.float32),
        grid=(N,),
        in_specs=[pl.BlockSpec((1, H, W, Cpad), lambda n: (n, 0, 0, 0)),
                  pl.BlockSpec((2, Cpad), lambda n: (0, 0)),
                  pl.BlockSpec((1, Cpad), lambda n: (0, 0)),
                  pl.BlockSpec((1, Cpad), lambda n: (0, 0)),
                  pl.BlockSpec((1, HWr, Cpad), lambda n: (n, 0, 0)),
                  pl.BlockSpec((2, Cpad), lambda n: (0, 0)),
                  pl.BlockSpec((1, Cpad), lambda n: (0, 0)),
                  pl.BlockSpec((1, Cpad), lambda n: (0, 0))],
        out_specs=pl.BlockSpec((1, Ho, Wo, Cpad), lambda n: (n, 0, 0, 0)),
        scratch_shapes=[pltpu.VMEM((Hp2, Wp2, Cpad), jnp.float32)],
        compiler_params=pltpu.CompilerParams(
            dimension_semantics=("parallel",),
            vmem_limit_bytes=_VMEM_LIMIT),
    )(z, zsum, g1, be1, r, rsum, g2, be2)

    return jnp.transpose(out[..., :Cout], (0, 3, 1, 2)).astype(jnp.float32)


# --------------------------------------------------------------------------
# Pure-JAX reference mirroring the PyTorch forward (training-mode BN).
# --------------------------------------------------------------------------
def reference_forward(x, params, kernel_size, stride, eps=EPS):
    K, s = kernel_size, stride
    p = (K - 1) // 2
    w1 = params["w1"]
    Cin, Cout = w1.shape[1], w1.shape[2]
    w1_oihw = jnp.transpose(w1.reshape(K, K, Cin, Cout), (3, 2, 0, 1))

    def bn(z, g, b):
        mu = z.mean(axis=(0, 2, 3), keepdims=True)
        var = ((z - mu) ** 2).mean(axis=(0, 2, 3), keepdims=True)
        return (z - mu) * jax.lax.rsqrt(var + eps) * g[None, :, None, None] \
               + b[None, :, None, None]

    y = jax.lax.conv_general_dilated(
        x, w1_oihw, (1, 1), [(p, p), (p, p)],
        dimension_numbers=("NCHW", "OIHW", "NCHW"))
    y = y + params["b1"][None, :, None, None]
    y = bn(y, params["g1"], params["be1"])
    y = jax.lax.reduce_window(
        y, -jnp.inf, jax.lax.max,
        (1, 1, K, K), (1, 1, s, s), [(0, 0), (0, 0), (p, p), (p, p)])

    w2_oihw = jnp.transpose(params["w2"], (1, 0))[..., None, None]
    r = jax.lax.conv_general_dilated(
        x, w2_oihw, (s, s), "VALID",
        dimension_numbers=("NCHW", "OIHW", "NCHW"))
    r = r + params["b2"][None, :, None, None]
    r = bn(r, params["g2"], params["be2"])
    return y + r


if __name__ == "__main__":
    N, Cin, Cout, H, W = 2, 4, 8, 16, 16
    kernel_size, stride = 3, 2

    key = jax.random.PRNGKey(0)
    ks = jax.random.split(key, 9)
    params = dict(
        w1=0.2 * jax.random.normal(ks[0], (kernel_size * kernel_size, Cin, Cout), jnp.float32),
        b1=0.1 * jax.random.normal(ks[1], (Cout,), jnp.float32),
        g1=1.0 + 0.1 * jax.random.normal(ks[2], (Cout,), jnp.float32),
        be1=0.1 * jax.random.normal(ks[3], (Cout,), jnp.float32),
        w2=0.2 * jax.random.normal(ks[4], (Cin, Cout), jnp.float32),
        b2=0.1 * jax.random.normal(ks[5], (Cout,), jnp.float32),
        g2=1.0 + 0.1 * jax.random.normal(ks[6], (Cout,), jnp.float32),
        be2=0.1 * jax.random.normal(ks[7], (Cout,), jnp.float32),
    )
    x = jax.random.normal(ks[8], (N, Cin, H, W), jnp.float32)

    out = layer_block_pallas(x, params, kernel_size=kernel_size, stride=stride)
    out = jax.block_until_ready(out)

    ref = reference_forward(x, params, kernel_size, stride)
    assert out.shape == ref.shape, (out.shape, ref.shape)
    err = float(jnp.max(jnp.abs(out - ref)))
    # bf16 MXU operands (f32 accumulation): tolerance accounts for input rounding.
    if err > 3e-2:
        raise AssertionError(f"Pallas kernel mismatch vs reference: max abs err {err}")

    print("KERNEL_OK")
</pallas_src>

<mosaic_0001>
module attributes {stable_mosaic.version = 11 : i64} {
  func.func @kernel(%arg0: i32, %arg1: memref<1x16x16x128xf32, #tpu.memory_space<vmem>>, %arg2: memref<2x128xf32, #tpu.memory_space<vmem>>, %arg3: memref<1x128xf32, #tpu.memory_space<vmem>>, %arg4: memref<1x128xf32, #tpu.memory_space<vmem>>, %arg5: memref<1x64x128xf32, #tpu.memory_space<vmem>>, %arg6: memref<2x128xf32, #tpu.memory_space<vmem>>, %arg7: memref<1x128xf32, #tpu.memory_space<vmem>>, %arg8: memref<1x128xf32, #tpu.memory_space<vmem>>, %arg9: memref<1x8x8x128xf32, #tpu.memory_space<vmem>>, %arg10: memref<18x18x128xf32, #tpu.memory_space<vmem>>) attributes {dimension_semantics = [#tpu.dimension_semantics<parallel>], iteration_bounds = array<i64: 2>, scalar_prefetch = 0 : i64, scratch_operands = 1 : i64, tpu.core_type = #tpu.core_type<tc>, window_params = [{transform_indices = @transform_0, window_bounds = array<i64: 1, 16, 16, 128>}, {pipeline_mode = #tpu.pipeline_mode<synchronous>, transform_indices = @transform_1, window_bounds = array<i64: 2, 128>}, {pipeline_mode = #tpu.pipeline_mode<synchronous>, transform_indices = @transform_2, window_bounds = array<i64: 1, 128>}, {pipeline_mode = #tpu.pipeline_mode<synchronous>, transform_indices = @transform_3, window_bounds = array<i64: 1, 128>}, {transform_indices = @transform_4, window_bounds = array<i64: 1, 64, 128>}, {pipeline_mode = #tpu.pipeline_mode<synchronous>, transform_indices = @transform_5, window_bounds = array<i64: 2, 128>}, {pipeline_mode = #tpu.pipeline_mode<synchronous>, transform_indices = @transform_6, window_bounds = array<i64: 1, 128>}, {pipeline_mode = #tpu.pipeline_mode<synchronous>, transform_indices = @transform_7, window_bounds = array<i64: 1, 128>}, {transform_indices = @transform_8, window_bounds = array<i64: 1, 8, 8, 128>}]} {
    %c0 = arith.constant 0 : index
    %c0_0 = arith.constant 0 : index
    %0 = vector.load %arg2[%c0, %c0_0] : memref<2x128xf32, #tpu.memory_space<vmem>>, vector<1x128xf32>
    %cst = arith.constant 0.001953125 : f32
    %1 = vector.broadcast %cst : f32 to vector<1x128xf32>
    %2 = arith.mulf %0, %1 : vector<1x128xf32>
    %c1 = arith.constant 1 : index
    %c0_1 = arith.constant 0 : index
    %3 = vector.load %arg2[%c1, %c0_1] : memref<2x128xf32, #tpu.memory_space<vmem>>, vector<1x128xf32>
    %cst_2 = arith.constant 0.001953125 : f32
    %4 = vector.broadcast %cst_2 : f32 to vector<1x128xf32>
    %5 = arith.mulf %3, %4 : vector<1x128xf32>
    %6 = arith.mulf %2, %2 : vector<1x128xf32>
    %7 = arith.subf %5, %6 : vector<1x128xf32>
    %cst_3 = arith.constant 0.000000e+00 : f32
    %8 = vector.broadcast %cst_3 : f32 to vector<1x128xf32>
    %9 = arith.maximumf %7, %8 : vector<1x128xf32>
    %c0_4 = arith.constant 0 : index
    %c0_5 = arith.constant 0 : index
    %10 = vector.load %arg3[%c0_4, %c0_5] : memref<1x128xf32, #tpu.memory_space<vmem>>, vector<1x128xf32>
    %cst_6 = arith.constant 9.99999974E-6 : f32
    %11 = vector.broadcast %cst_6 : f32 to vector<1x128xf32>
    %12 = arith.addf %9, %11 : vector<1x128xf32>
    %13 = math.rsqrt %12 : vector<1x128xf32>
    %14 = arith.mulf %10, %13 : vector<1x128xf32>
    %c0_7 = arith.constant 0 : index
    %c0_8 = arith.constant 0 : index
    %15 = vector.load %arg4[%c0_7, %c0_8] : memref<1x128xf32, #tpu.memory_space<vmem>>, vector<1x128xf32>
    %16 = arith.mulf %2, %14 : vector<1x128xf32>
    %17 = arith.subf %15, %16 : vector<1x128xf32>
    %c0_9 = arith.constant 0 : index
    %c0_10 = arith.constant 0 : index
    %18 = vector.load %arg6[%c0_9, %c0_10] : memref<2x128xf32, #tpu.memory_space<vmem>>, vector<1x128xf32>
    %cst_11 = arith.constant 7.812500e-03 : f32
    %19 = vector.broadcast %cst_11 : f32 to vector<1x128xf32>
    %20 = arith.mulf %18, %19 : vector<1x128xf32>
    %c1_12 = arith.constant 1 : index
    %c0_13 = arith.constant 0 : index
    %21 = vector.load %arg6[%c1_12, %c0_13] : memref<2x128xf32, #tpu.memory_space<vmem>>, vector<1x128xf32>
    %cst_14 = arith.constant 7.812500e-03 : f32
    %22 = vector.broadcast %cst_14 : f32 to vector<1x128xf32>
    %23 = arith.mulf %21, %22 : vector<1x128xf32>
    %24 = arith.mulf %20, %20 : vector<1x128xf32>
    %25 = arith.subf %23, %24 : vector<1x128xf32>
    %cst_15 = arith.constant 0.000000e+00 : f32
    %26 = vector.broadcast %cst_15 : f32 to vector<1x128xf32>
    %27 = arith.maximumf %25, %26 : vector<1x128xf32>
    %c0_16 = arith.constant 0 : index
    %c0_17 = arith.constant 0 : index
    %28 = vector.load %arg7[%c0_16, %c0_17] : memref<1x128xf32, #tpu.memory_space<vmem>>, vector<1x128xf32>
    %cst_18 = arith.constant 9.99999974E-6 : f32
    %29 = vector.broadcast %cst_18 : f32 to vector<1x128xf32>
    %30 = arith.addf %27, %29 : vector<1x128xf32>
    %31 = math.rsqrt %30 : vector<1x128xf32>
    %32 = arith.mulf %28, %31 : vector<1x128xf32>
    %c0_19 = arith.constant 0 : index
    %c0_20 = arith.constant 0 : index
    %33 = vector.load %arg8[%c0_19, %c0_20] : memref<1x128xf32, #tpu.memory_space<vmem>>, vector<1x128xf32>
    %34 = arith.mulf %20, %32 : vector<1x128xf32>
    %35 = arith.subf %33, %34 : vector<1x128xf32>
    %cst_21 = arith.constant 0xFF800000 : f32
    %36 = vector.broadcast %cst_21 : f32 to vector<18x18x128xf32>
    %c0_22 = arith.constant 0 : index
    %c0_23 = arith.constant 0 : index
    %c0_24 = arith.constant 0 : index
    %37 = vector.load %arg10[%c0_22, %c0_23, %c0_24] : memref<18x18x128xf32, #tpu.memory_space<vmem>>, vector<18x18x128xf32>
    tpu.vector_store %arg10[%c0_22, %c0_23, %c0_24], %36 {strides = array<i32>} : memref<18x18x128xf32, #tpu.memory_space<vmem>>, vector<18x18x128xf32>,
    %c0_25 = arith.constant 0 : index
    %c0_26 = arith.constant 0 : index
    %c0_27 = arith.constant 0 : index
    %c0_28 = arith.constant 0 : index
    %38 = vector.load %arg1[%c0_25, %c0_26, %c0_27, %c0_28] : memref<1x16x16x128xf32, #tpu.memory_space<vmem>>, vector<1x16x16x128xf32>
    %39 = vector.shape_cast %38 : vector<1x16x16x128xf32> to vector<16x16x128xf32>
    %40 = vector.shape_cast %14 : vector<1x128xf32> to vector<1x1x128xf32>
    %41 = vector.broadcast %40 : vector<1x1x128xf32> to vector<16x16x128xf32>
    %42 = arith.mulf %39, %41 : vector<16x16x128xf32>
    %43 = vector.shape_cast %17 : vector<1x128xf32> to vector<1x1x128xf32>
    %44 = vector.broadcast %43 : vector<1x1x128xf32> to vector<16x16x128xf32>
    %45 = arith.addf %42, %44 : vector<16x16x128xf32>
    %c1_29 = arith.constant 1 : index
    %c1_30 = arith.constant 1 : index
    %c0_31 = arith.constant 0 : index
    %46 = vector.load %arg10[%c1_29, %c1_30, %c0_31] : memref<18x18x128xf32, #tpu.memory_space<vmem>>, vector<16x16x128xf32>
    tpu.vector_store %arg10[%c1_29, %c1_30, %c0_31], %45 {strides = array<i32>} : memref<18x18x128xf32, #tpu.memory_space<vmem>>, vector<16x16x128xf32>,
    %c0_32 = arith.constant 0 : index
    %c0_33 = arith.constant 0 : index
    %c0_34 = arith.constant 0 : index
    %47 = tpu.strided_load %arg10[%c0_32, %c0_33, %c0_34] {strides = array<i32: 1, 2, 1>} : memref<18x18x128xf32, #tpu.memory_space<vmem>>, vector<18x8x128xf32>
    %c0_35 = arith.constant 0 : index
    %c1_36 = arith.constant 1 : index
    %c0_37 = arith.constant 0 : index
    %48 = tpu.strided_load %arg10[%c0_35, %c1_36, %c0_37] {strides = array<i32: 1, 2, 1>} : memref<18x18x128xf32, #tpu.memory_space<vmem>>, vector<18x8x128xf32>
    %49 = arith.maximumf %47, %48 : vector<18x8x128xf32>
    %c0_38 = arith.constant 0 : index
    %c2 = arith.constant 2 : index
    %c0_39 = arith.constant 0 : index
    %50 = tpu.strided_load %arg10[%c0_38, %c2, %c0_39] {strides = array<i32: 1, 2, 1>} : memref<18x18x128xf32, #tpu.memory_space<vmem>>, vector<18x8x128xf32>
    %51 = arith.maximumf %49, %50 : vector<18x8x128xf32>
    %c0_40 = arith.constant 0 : index
    %c0_41 = arith.constant 0 : index
    %c0_42 = arith.constant 0 : index
    %52 = vector.load %arg5[%c0_40, %c0_41, %c0_42] : memref<1x64x128xf32, #tpu.memory_space<vmem>>, vector<1x64x128xf32>
    %53 = vector.shape_cast %52 : vector<1x64x128xf32> to vector<64x128xf32>
    %54 = vector.broadcast %32 : vector<1x128xf32> to vector<64x128xf32>
    %55 = arith.mulf %53, %54 : vector<64x128xf32>
    %56 = vector.broadcast %35 : vector<1x128xf32> to vector<64x128xf32>
    %57 = arith.addf %55, %56 : vector<64x128xf32>
    %58 = vector.extract_strided_slice %51 {offsets = [0, 0, 0], sizes = [1, 8, 128], strides = [1, 1, 1]} : vector<18x8x128xf32> to vector<1x8x128xf32>
    %59 = vector.shape_cast %58 : vector<1x8x128xf32> to vector<8x128xf32>
    %60 = vector.extract_strided_slice %51 {offsets = [1, 0, 0], sizes = [1, 8, 128], strides = [1, 1, 1]} : vector<18x8x128xf32> to vector<1x8x128xf32>
    %61 = vector.shape_cast %60 : vector<1x8x128xf32> to vector<8x128xf32>
    %62 = arith.maximumf %59, %61 : vector<8x128xf32>
    %63 = vector.extract_strided_slice %51 {offsets = [2, 0, 0], sizes = [1, 8, 128], strides = [1, 1, 1]} : vector<18x8x128xf32> to vector<1x8x128xf32>
    %64 = vector.shape_cast %63 : vector<1x8x128xf32> to vector<8x128xf32>
    %65 = arith.maximumf %62, %64 : vector<8x128xf32>
    %66 = vector.extract_strided_slice %57 {offsets = [0, 0], sizes = [8, 128], strides = [1, 1]} : vector<64x128xf32> to vector<8x128xf32>
    %67 = arith.addf %65, %66 : vector<8x128xf32>
    %c0_43 = arith.constant 0 : index
    %c0_44 = arith.constant 0 : index
    %c0_45 = arith.constant 0 : index
    %c0_46 = arith.constant 0 : index
    %68 = vector.load %arg9[%c0_43, %c0_44, %c0_45, %c0_46] : memref<1x8x8x128xf32, #tpu.memory_space<vmem>>, vector<1x1x8x128xf32>
    %69 = vector.shape_cast %68 : vector<1x1x8x128xf32> to vector<8x128xf32>
    %70 = vector.shape_cast %67 : vector<8x128xf32> to vector<1x1x8x128xf32>
    tpu.vector_store %arg9[%c0_43, %c0_44, %c0_45, %c0_46], %70 {strides = array<i32>} : memref<1x8x8x128xf32, #tpu.memory_space<vmem>>, vector<1x1x8x128xf32>,
    %71 = vector.extract_strided_slice %51 {offsets = [2, 0, 0], sizes = [1, 8, 128], strides = [1, 1, 1]} : vector<18x8x128xf32> to vector<1x8x128xf32>
    %72 = vector.shape_cast %71 : vector<1x8x128xf32> to vector<8x128xf32>
    %73 = vector.extract_strided_slice %51 {offsets = [3, 0, 0], sizes = [1, 8, 128], strides = [1, 1, 1]} : vector<18x8x128xf32> to vector<1x8x128xf32>
    %74 = vector.shape_cast %73 : vector<1x8x128xf32> to vector<8x128xf32>
    %75 = arith.maximumf %72, %74 : vector<8x128xf32>
    %76 = vector.extract_strided_slice %51 {offsets = [4, 0, 0], sizes = [1, 8, 128], strides = [1, 1, 1]} : vector<18x8x128xf32> to vector<1x8x128xf32>
    %77 = vector.shape_cast %76 : vector<1x8x128xf32> to vector<8x128xf32>
    %78 = arith.maximumf %75, %77 : vector<8x128xf32>
    %79 = vector.extract_strided_slice %57 {offsets = [8, 0], sizes = [8, 128], strides = [1, 1]} : vector<64x128xf32> to vector<8x128xf32>
    %80 = arith.addf %78, %79 : vector<8x128xf32>
    %c0_47 = arith.constant 0 : index
    %c1_48 = arith.constant 1 : index
    %c0_49 = arith.constant 0 : index
    %c0_50 = arith.constant 0 : index
    %81 = vector.load %arg9[%c0_47, %c1_48, %c0_49, %c0_50] : memref<1x8x8x128xf32, #tpu.memory_space<vmem>>, vector<1x1x8x128xf32>
    %82 = vector.shape_cast %81 : vector<1x1x8x128xf32> to vector<8x128xf32>
    %83 = vector.shape_cast %80 : vector<8x128xf32> to vector<1x1x8x128xf32>
    tpu.vector_store %arg9[%c0_47, %c1_48, %c0_49, %c0_50], %83 {strides = array<i32>} : memref<1x8x8x128xf32, #tpu.memory_space<vmem>>, vector<1x1x8x128xf32>,
    %84 = vector.extract_strided_slice %51 {offsets = [4, 0, 0], sizes = [1, 8, 128], strides = [1, 1, 1]} : vector<18x8x128xf32> to vector<1x8x128xf32>
    %85 = vector.shape_cast %84 : vector<1x8x128xf32> to vector<8x128xf32>
    %86 = vector.extract_strided_slice %51 {offsets = [5, 0, 0], sizes = [1, 8, 128], strides = [1, 1, 1]} : vector<18x8x128xf32> to vector<1x8x128xf32>
    %87 = vector.shape_cast %86 : vector<1x8x128xf32> to vector<8x128xf32>
    %88 = arith.maximumf %85, %87 : vector<8x128xf32>
    %89 = vector.extract_strided_slice %51 {offsets = [6, 0, 0], sizes = [1, 8, 128], strides = [1, 1, 1]} : vector<18x8x128xf32> to vector<1x8x128xf32>
    %90 = vector.shape_cast %89 : vector<1x8x128xf32> to vector<8x128xf32>
    %91 = arith.maximumf %88, %90 : vector<8x128xf32>
    %92 = vector.extract_strided_slice %57 {offsets = [16, 0], sizes = [8, 128], strides = [1, 1]} : vector<64x128xf32> to vector<8x128xf32>
    %93 = arith.addf %91, %92 : vector<8x128xf32>
    %c0_51 = arith.constant 0 : index
    %c2_52 = arith.constant 2 : index
    %c0_53 = arith.constant 0 : index
    %c0_54 = arith.constant 0 : index
    %94 = vector.load %arg9[%c0_51, %c2_52, %c0_53, %c0_54] : memref<1x8x8x128xf32, #tpu.memory_space<vmem>>, vector<1x1x8x128xf32>
    %95 = vector.shape_cast %94 : vector<1x1x8x128xf32> to vector<8x128xf32>
    %96 = vector.shape_cast %93 : vector<8x128xf32> to vector<1x1x8x128xf32>
    tpu.vector_store %arg9[%c0_51, %c2_52, %c0_53, %c0_54], %96 {strides = array<i32>} : memref<1x8x8x128xf32, #tpu.memory_space<vmem>>, vector<1x1x8x128xf32>,
    %97 = vector.extract_strided_slice %51 {offsets = [6, 0, 0], sizes = [1, 8, 128], strides = [1, 1, 1]} : vector<18x8x128xf32> to vector<1x8x128xf32>
    %98 = vector.shape_cast %97 : vector<1x8x128xf32> to vector<8x128xf32>
    %99 = vector.extract_strided_slice %51 {offsets = [7, 0, 0], sizes = [1, 8, 128], strides = [1, 1, 1]} : vector<18x8x128xf32> to vector<1x8x128xf32>
    %100 = vector.shape_cast %99 : vector<1x8x128xf32> to vector<8x128xf32>
    %101 = arith.maximumf %98, %100 : vector<8x128xf32>
    %102 = vector.extract_strided_slice %51 {offsets = [8, 0, 0], sizes = [1, 8, 128], strides = [1, 1, 1]} : vector<18x8x128xf32> to vector<1x8x128xf32>
    %103 = vector.shape_cast %102 : vector<1x8x128xf32> to vector<8x128xf32>
    %104 = arith.maximumf %101, %103 : vector<8x128xf32>
    %105 = vector.extract_strided_slice %57 {offsets = [24, 0], sizes = [8, 128], strides = [1, 1]} : vector<64x128xf32> to vector<8x128xf32>
    %106 = arith.addf %104, %105 : vector<8x128xf32>
    %c0_55 = arith.constant 0 : index
    %c3 = arith.constant 3 : index
    %c0_56 = arith.constant 0 : index
    %c0_57 = arith.constant 0 : index
    %107 = vector.load %arg9[%c0_55, %c3, %c0_56, %c0_57] : memref<1x8x8x128xf32, #tpu.memory_space<vmem>>, vector<1x1x8x128xf32>
    %108 = vector.shape_cast %107 : vector<1x1x8x128xf32> to vector<8x128xf32>
    %109 = vector.shape_cast %106 : vector<8x128xf32> to vector<1x1x8x128xf32>
    tpu.vector_store %arg9[%c0_55, %c3, %c0_56, %c0_57], %109 {strides = array<i32>} : memref<1x8x8x128xf32, #tpu.memory_space<vmem>>, vector<1x1x8x128xf32>,
    %110 = vector.extract_strided_slice %51 {offsets = [8, 0, 0], sizes = [1, 8, 128], strides = [1, 1, 1]} : vector<18x8x128xf32> to vector<1x8x128xf32>
    %111 = vector.shape_cast %110 : vector<1x8x128xf32> to vector<8x128xf32>
    %112 = vector.extract_strided_slice %51 {offsets = [9, 0, 0], sizes = [1, 8, 128], strides = [1, 1, 1]} : vector<18x8x128xf32> to vector<1x8x128xf32>
    %113 = vector.shape_cast %112 : vector<1x8x128xf32> to vector<8x128xf32>
    %114 = arith.maximumf %111, %113 : vector<8x128xf32>
    %115 = vector.extract_strided_slice %51 {offsets = [10, 0, 0], sizes = [1, 8, 128], strides = [1, 1, 1]} : vector<18x8x128xf32> to vector<1x8x128xf32>
    %116 = vector.shape_cast %115 : vector<1x8x128xf32> to vector<8x128xf32>
    %117 = arith.maximumf %114, %116 : vector<8x128xf32>
    %118 = vector.extract_strided_slice %57 {offsets = [32, 0], sizes = [8, 128], strides = [1, 1]} : vector<64x128xf32> to vector<8x128xf32>
    %119 = arith.addf %117, %118 : vector<8x128xf32>
    %c0_58 = arith.constant 0 : index
    %c4 = arith.constant 4 : index
    %c0_59 = arith.constant 0 : index
    %c0_60 = arith.constant 0 : index
    %120 = vector.load %arg9[%c0_58, %c4, %c0_59, %c0_60] : memref<1x8x8x128xf32, #tpu.memory_space<vmem>>, vector<1x1x8x128xf32>
    %121 = vector.shape_cast %120 : vector<1x1x8x128xf32> to vector<8x128xf32>
    %122 = vector.shape_cast %119 : vector<8x128xf32> to vector<1x1x8x128xf32>
    tpu.vector_store %arg9[%c0_58, %c4, %c0_59, %c0_60], %122 {strides = array<i32>} : memref<1x8x8x128xf32, #tpu.memory_space<vmem>>, vector<1x1x8x128xf32>,
    %123 = vector.extract_strided_slice %51 {offsets = [10, 0, 0], sizes = [1, 8, 128], strides = [1, 1, 1]} : vector<18x8x128xf32> to vector<1x8x128xf32>
    %124 = vector.shape_cast %123 : vector<1x8x128xf32> to vector<8x128xf32>
    %125 = vector.extract_strided_slice %51 {offsets = [11, 0, 0], sizes = [1, 8, 128], strides = [1, 1, 1]} : vector<18x8x128xf32> to vector<1x8x128xf32>
    %126 = vector.shape_cast %125 : vector<1x8x128xf32> to vector<8x128xf32>
    %127 = arith.maximumf %124, %126 : vector<8x128xf32>
    %128 = vector.extract_strided_slice %51 {offsets = [12, 0, 0], sizes = [1, 8, 128], strides = [1, 1, 1]} : vector<18x8x128xf32> to vector<1x8x128xf32>
    %129 = vector.shape_cast %128 : vector<1x8x128xf32> to vector<8x128xf32>
    %130 = arith.maximumf %127, %129 : vector<8x128xf32>
    %131 = vector.extract_strided_slice %57 {offsets = [40, 0], sizes = [8, 128], strides = [1, 1]} : vector<64x128xf32> to vector<8x128xf32>
    %132 = arith.addf %130, %131 : vector<8x128xf32>
    %c0_61 = arith.constant 0 : index
    %c5 = arith.constant 5 : index
    %c0_62 = arith.constant 0 : index
    %c0_63 = arith.constant 0 : index
    %133 = vector.load %arg9[%c0_61, %c5, %c0_62, %c0_63] : memref<1x8x8x128xf32, #tpu.memory_space<vmem>>, vector<1x1x8x128xf32>
    %134 = vector.shape_cast %133 : vector<1x1x8x128xf32> to vector<8x128xf32>
    %135 = vector.shape_cast %132 : vector<8x128xf32> to vector<1x1x8x128xf32>
    tpu.vector_store %arg9[%c0_61, %c5, %c0_62, %c0_63], %135 {strides = array<i32>} : memref<1x8x8x128xf32, #tpu.memory_space<vmem>>, vector<1x1x8x128xf32>,
    %136 = vector.extract_strided_slice %51 {offsets = [12, 0, 0], sizes = [1, 8, 128], strides = [1, 1, 1]} : vector<18x8x128xf32> to vector<1x8x128xf32>
    %137 = vector.shape_cast %136 : vector<1x8x128xf32> to vector<8x128xf32>
    %138 = vector.extract_strided_slice %51 {offsets = [13, 0, 0], sizes = [1, 8, 128], strides = [1, 1, 1]} : vector<18x8x128xf32> to vector<1x8x128xf32>
    %139 = vector.shape_cast %138 : vector<1x8x128xf32> to vector<8x128xf32>
    %140 = arith.maximumf %137, %139 : vector<8x128xf32>
    %141 = vector.extract_strided_slice %51 {offsets = [14, 0, 0], sizes = [1, 8, 128], strides = [1, 1, 1]} : vector<18x8x128xf32> to vector<1x8x128xf32>
    %142 = vector.shape_cast %141 : vector<1x8x128xf32> to vector<8x128xf32>
    %143 = arith.maximumf %140, %142 : vector<8x128xf32>
    %144 = vector.extract_strided_slice %57 {offsets = [48, 0], sizes = [8, 128], strides = [1, 1]} : vector<64x128xf32> to vector<8x128xf32>
    %145 = arith.addf %143, %144 : vector<8x128xf32>
    %c0_64 = arith.constant 0 : index
    %c6 = arith.constant 6 : index
    %c0_65 = arith.constant 0 : index
    %c0_66 = arith.constant 0 : index
    %146 = vector.load %arg9[%c0_64, %c6, %c0_65, %c0_66] : memref<1x8x8x128xf32, #tpu.memory_space<vmem>>, vector<1x1x8x128xf32>
    %147 = vector.shape_cast %146 : vector<1x1x8x128xf32> to vector<8x128xf32>
    %148 = vector.shape_cast %145 : vector<8x128xf32> to vector<1x1x8x128xf32>
    tpu.vector_store %arg9[%c0_64, %c6, %c0_65, %c0_66], %148 {strides = array<i32>} : memref<1x8x8x128xf32, #tpu.memory_space<vmem>>, vector<1x1x8x128xf32>,
    %149 = vector.extract_strided_slice %51 {offsets = [14, 0, 0], sizes = [1, 8, 128], strides = [1, 1, 1]} : vector<18x8x128xf32> to vector<1x8x128xf32>
    %150 = vector.shape_cast %149 : vector<1x8x128xf32> to vector<8x128xf32>
    %151 = vector.extract_strided_slice %51 {offsets = [15, 0, 0], sizes = [1, 8, 128], strides = [1, 1, 1]} : vector<18x8x128xf32> to vector<1x8x128xf32>
    %152 = vector.shape_cast %151 : vector<1x8x128xf32> to vector<8x128xf32>
    %153 = arith.maximumf %150, %152 : vector<8x128xf32>
    %154 = vector.extract_strided_slice %51 {offsets = [16, 0, 0], sizes = [1, 8, 128], strides = [1, 1, 1]} : vector<18x8x128xf32> to vector<1x8x128xf32>
    %155 = vector.shape_cast %154 : vector<1x8x128xf32> to vector<8x128xf32>
    %156 = arith.maximumf %153, %155 : vector<8x128xf32>
    %157 = vector.extract_strided_slice %57 {offsets = [56, 0], sizes = [8, 128], strides = [1, 1]} : vector<64x128xf32> to vector<8x128xf32>
    %158 = arith.addf %156, %157 : vector<8x128xf32>
    %c0_67 = arith.constant 0 : index
    %c7 = arith.constant 7 : index
    %c0_68 = arith.constant 0 : index
    %c0_69 = arith.constant 0 : index
    %159 = vector.load %arg9[%c0_67, %c7, %c0_68, %c0_69] : memref<1x8x8x128xf32, #tpu.memory_space<vmem>>, vector<1x1x8x128xf32>
    %160 = vector.shape_cast %159 : vector<1x1x8x128xf32> to vector<8x128xf32>
    %161 = vector.shape_cast %158 : vector<8x128xf32> to vector<1x1x8x128xf32>
    tpu.vector_store %arg9[%c0_67, %c7, %c0_68, %c0_69], %161 {strides = array<i32>} : memref<1x8x8x128xf32, #tpu.memory_space<vmem>>, vector<1x1x8x128xf32>,
    return
  }
  func.func @transform_0(%arg0: i32) -> (i32, i32, i32, i32) {
    %c0_i32 = arith.constant 0 : i32
    %c0_i32_0 = arith.constant 0 : i32
    %c0_i32_1 = arith.constant 0 : i32
    %c0_i32_2 = arith.constant 0 : i32
    return %arg0, %c0_i32, %c0_i32_0, %c0_i32_1 : i32, i32, i32, i32
  }
  func.func @transform_1(%arg0: i32) -> (i32, i32) {
    %c0_i32 = arith.constant 0 : i32
    %c0_i32_0 = arith.constant 0 : i32
    %c0_i32_1 = arith.constant 0 : i32
    return %c0_i32, %c0_i32_0 : i32, i32
  }
  func.func @transform_2(%arg0: i32) -> (i32, i32) {
    %c0_i32 = arith.constant 0 : i32
    %c0_i32_0 = arith.constant 0 : i32
    %c0_i32_1 = arith.constant 0 : i32
    return %c0_i32, %c0_i32_0 : i32, i32
  }
  func.func @transform_3(%arg0: i32) -> (i32, i32) {
    %c0_i32 = arith.constant 0 : i32
    %c0_i32_0 = arith.constant 0 : i32
    %c0_i32_1 = arith.constant 0 : i32
    return %c0_i32, %c0_i32_0 : i32, i32
  }
  func.func @transform_4(%arg0: i32) -> (i32, i32, i32) {
    %c0_i32 = arith.constant 0 : i32
    %c0_i32_0 = arith.constant 0 : i32
    %c0_i32_1 = arith.constant 0 : i32
    return %arg0, %c0_i32, %c0_i32_0 : i32, i32, i32
  }
  func.func @transform_5(%arg0: i32) -> (i32, i32) {
    %c0_i32 = arith.constant 0 : i32
    %c0_i32_0 = arith.constant 0 : i32
    %c0_i32_1 = arith.constant 0 : i32
    return %c0_i32, %c0_i32_0 : i32, i32
  }
  func.func @transform_6(%arg0: i32) -> (i32, i32) {
    %c0_i32 = arith.constant 0 : i32
    %c0_i32_0 = arith.constant 0 : i32
    %c0_i32_1 = arith.constant 0 : i32
    return %c0_i32, %c0_i32_0 : i32, i32
  }
  func.func @transform_7(%arg0: i32) -> (i32, i32) {
    %c0_i32 = arith.constant 0 : i32
    %c0_i32_0 = arith.constant 0 : i32
    %c0_i32_1 = arith.constant 0 : i32
    return %c0_i32, %c0_i32_0 : i32, i32
  }
  func.func @transform_8(%arg0: i32) -> (i32, i32, i32, i32) {
    %c0_i32 = arith.constant 0 : i32
    %c0_i32_0 = arith.constant 0 : i32
    %c0_i32_1 = arith.constant 0 : i32
    %c0_i32_2 = arith.constant 0 : i32
    return %arg0, %c0_i32, %c0_i32_0, %c0_i32_1 : i32, i32, i32, i32
  }
}

module attributes {stable_mosaic.version = 11 : i64} {
  func.func @kernel(%arg0: i32, %arg1: memref<1x18x18x4xbf16, #tpu.memory_space<vmem>>, %arg2: memref<9x4x128xbf16, #tpu.memory_space<vmem>>, %arg3: memref<1x128xf32, #tpu.memory_space<vmem>>, %arg4: memref<1x64x4xbf16, #tpu.memory_space<vmem>>, %arg5: memref<4x128xbf16, #tpu.memory_space<vmem>>, %arg6: memref<1x128xf32, #tpu.memory_space<vmem>>, %arg7: memref<1x16x16x128xf32, #tpu.memory_space<vmem>>, %arg8: memref<1x2x128xf32, #tpu.memory_space<vmem>>, %arg9: memref<1x64x128xf32, #tpu.memory_space<vmem>>, %arg10: memref<1x2x128xf32, #tpu.memory_space<vmem>>) attributes {dimension_semantics = [#tpu.dimension_semantics<parallel>], iteration_bounds = array<i64: 2>, scalar_prefetch = 0 : i64, scratch_operands = 0 : i64, tpu.core_type = #tpu.core_type<tc>, window_params = [{transform_indices = @transform_0, window_bounds = array<i64: 1, 18, 18, 4>}, {pipeline_mode = #tpu.pipeline_mode<synchronous>, transform_indices = @transform_1, window_bounds = array<i64: 9, 4, 128>}, {pipeline_mode = #tpu.pipeline_mode<synchronous>, transform_indices = @transform_2, window_bounds = array<i64: 1, 128>}, {transform_indices = @transform_3, window_bounds = array<i64: 1, 64, 4>}, {pipeline_mode = #tpu.pipeline_mode<synchronous>, transform_indices = @transform_4, window_bounds = array<i64: 4, 128>}, {pipeline_mode = #tpu.pipeline_mode<synchronous>, transform_indices = @transform_5, window_bounds = array<i64: 1, 128>}, {transform_indices = @transform_6, window_bounds = array<i64: 1, 16, 16, 128>}, {transform_indices = @transform_7, window_bounds = array<i64: 1, 2, 128>}, {transform_indices = @transform_8, window_bounds = array<i64: 1, 64, 128>}, {transform_indices = @transform_9, window_bounds = array<i64: 1, 2, 128>}]} {
    %cst = arith.constant 0.000000e+00 : f32
    %0 = vector.broadcast %cst : f32 to vector<256x128xf32>
    %c0 = arith.constant 0 : index
    %c0_0 = arith.constant 0 : index
    %c0_1 = arith.constant 0 : index
    %c0_2 = arith.constant 0 : index
    %1 = vector.load %arg1[%c0, %c0_0, %c0_1, %c0_2] : memref<1x18x18x4xbf16, #tpu.memory_space<vmem>>, vector<1x16x16x4xbf16>
    %2 = vector.shape_cast %1 : vector<1x16x16x4xbf16> to vector<16x16x4xbf16>
    %3 = vector.shape_cast %2 : vector<16x16x4xbf16> to vector<256x4xbf16>
    %c0_3 = arith.constant 0 : index
    %c0_4 = arith.constant 0 : index
    %c0_5 = arith.constant 0 : index
    %4 = vector.load %arg2[%c0_3, %c0_4, %c0_5] : memref<9x4x128xbf16, #tpu.memory_space<vmem>>, vector<1x4x128xbf16>
    %5 = vector.shape_cast %4 : vector<1x4x128xbf16> to vector<4x128xbf16>
    %cst_6 = arith.constant dense<0.000000e+00> : vector<256x128xf32>
    %6 = tpu.matmul %3, %5, %cst_6 {dimension_numbers = #tpu.dot_dimension_numbers<[1], [0], [0], [1], [0, 0, 1, 1], [], []>} : vector<256x4xbf16>, vector<4x128xbf16>, vector<256x128xf32> -> vector<256x128xf32>
    %7 = arith.addf %0, %6 : vector<256x128xf32>
    %c0_7 = arith.constant 0 : index
    %c0_8 = arith.constant 0 : index
    %c1 = arith.constant 1 : index
    %c0_9 = arith.constant 0 : index
    %8 = vector.load %arg1[%c0_7, %c0_8, %c1, %c0_9] : memref<1x18x18x4xbf16, #tpu.memory_space<vmem>>, vector<1x16x16x4xbf16>
    %9 = vector.shape_cast %8 : vector<1x16x16x4xbf16> to vector<16x16x4xbf16>
    %10 = vector.shape_cast %9 : vector<16x16x4xbf16> to vector<256x4xbf16>
    %c1_10 = arith.constant 1 : index
    %c0_11 = arith.constant 0 : index
    %c0_12 = arith.constant 0 : index
    %11 = vector.load %arg2[%c1_10, %c0_11, %c0_12] : memref<9x4x128xbf16, #tpu.memory_space<vmem>>, vector<1x4x128xbf16>
    %12 = vector.shape_cast %11 : vector<1x4x128xbf16> to vector<4x128xbf16>
    %cst_13 = arith.constant dense<0.000000e+00> : vector<256x128xf32>
    %13 = tpu.matmul %10, %12, %cst_13 {dimension_numbers = #tpu.dot_dimension_numbers<[1], [0], [0], [1], [0, 0, 1, 1], [], []>} : vector<256x4xbf16>, vector<4x128xbf16>, vector<256x128xf32> -> vector<256x128xf32>
    %14 = arith.addf %7, %13 : vector<256x128xf32>
    %c0_14 = arith.constant 0 : index
    %c0_15 = arith.constant 0 : index
    %c2 = arith.constant 2 : index
    %c0_16 = arith.constant 0 : index
    %15 = vector.load %arg1[%c0_14, %c0_15, %c2, %c0_16] : memref<1x18x18x4xbf16, #tpu.memory_space<vmem>>, vector<1x16x16x4xbf16>
    %16 = vector.shape_cast %15 : vector<1x16x16x4xbf16> to vector<16x16x4xbf16>
    %17 = vector.shape_cast %16 : vector<16x16x4xbf16> to vector<256x4xbf16>
    %c2_17 = arith.constant 2 : index
    %c0_18 = arith.constant 0 : index
    %c0_19 = arith.constant 0 : index
    %18 = vector.load %arg2[%c2_17, %c0_18, %c0_19] : memref<9x4x128xbf16, #tpu.memory_space<vmem>>, vector<1x4x128xbf16>
    %19 = vector.shape_cast %18 : vector<1x4x128xbf16> to vector<4x128xbf16>
    %cst_20 = arith.constant dense<0.000000e+00> : vector<256x128xf32>
    %20 = tpu.matmul %17, %19, %cst_20 {dimension_numbers = #tpu.dot_dimension_numbers<[1], [0], [0], [1], [0, 0, 1, 1], [], []>} : vector<256x4xbf16>, vector<4x128xbf16>, vector<256x128xf32> -> vector<256x128xf32>
    %21 = arith.addf %14, %20 : vector<256x128xf32>
    %c0_21 = arith.constant 0 : index
    %c1_22 = arith.constant 1 : index
    %c0_23 = arith.constant 0 : index
    %c0_24 = arith.constant 0 : index
    %22 = vector.load %arg1[%c0_21, %c1_22, %c0_23, %c0_24] : memref<1x18x18x4xbf16, #tpu.memory_space<vmem>>, vector<1x16x16x4xbf16>
    %23 = vector.shape_cast %22 : vector<1x16x16x4xbf16> to vector<16x16x4xbf16>
    %24 = vector.shape_cast %23 : vector<16x16x4xbf16> to vector<256x4xbf16>
    %c3 = arith.constant 3 : index
    %c0_25 = arith.constant 0 : index
    %c0_26 = arith.constant 0 : index
    %25 = vector.load %arg2[%c3, %c0_25, %c0_26] : memref<9x4x128xbf16, #tpu.memory_space<vmem>>, vector<1x4x128xbf16>
    %26 = vector.shape_cast %25 : vector<1x4x128xbf16> to vector<4x128xbf16>
    %cst_27 = arith.constant dense<0.000000e+00> : vector<256x128xf32>
    %27 = tpu.matmul %24, %26, %cst_27 {dimension_numbers = #tpu.dot_dimension_numbers<[1], [0], [0], [1], [0, 0, 1, 1], [], []>} : vector<256x4xbf16>, vector<4x128xbf16>, vector<256x128xf32> -> vector<256x128xf32>
    %28 = arith.addf %21, %27 : vector<256x128xf32>
    %c0_28 = arith.constant 0 : index
    %c1_29 = arith.constant 1 : index
    %c1_30 = arith.constant 1 : index
    %c0_31 = arith.constant 0 : index
    %29 = vector.load %arg1[%c0_28, %c1_29, %c1_30, %c0_31] : memref<1x18x18x4xbf16, #tpu.memory_space<vmem>>, vector<1x16x16x4xbf16>
    %30 = vector.shape_cast %29 : vector<1x16x16x4xbf16> to vector<16x16x4xbf16>
    %31 = vector.shape_cast %30 : vector<16x16x4xbf16> to vector<256x4xbf16>
    %c4 = arith.constant 4 : index
    %c0_32 = arith.constant 0 : index
    %c0_33 = arith.constant 0 : index
    %32 = vector.load %arg2[%c4, %c0_32, %c0_33] : memref<9x4x128xbf16, #tpu.memory_space<vmem>>, vector<1x4x128xbf16>
    %33 = vector.shape_cast %32 : vector<1x4x128xbf16> to vector<4x128xbf16>
    %cst_34 = arith.constant dense<0.000000e+00> : vector<256x128xf32>
    %34 = tpu.matmul %31, %33, %cst_34 {dimension_numbers = #tpu.dot_dimension_numbers<[1], [0], [0], [1], [0, 0, 1, 1], [], []>} : vector<256x4xbf16>, vector<4x128xbf16>, vector<256x128xf32> -> vector<256x128xf32>
    %35 = arith.addf %28, %34 : vector<256x128xf32>
    %c0_35 = arith.constant 0 : index
    %c1_36 = arith.constant 1 : index
    %c2_37 = arith.constant 2 : index
    %c0_38 = arith.constant 0 : index
    %36 = vector.load %arg1[%c0_35, %c1_36, %c2_37, %c0_38] : memref<1x18x18x4xbf16, #tpu.memory_space<vmem>>, vector<1x16x16x4xbf16>
    %37 = vector.shape_cast %36 : vector<1x16x16x4xbf16> to vector<16x16x4xbf16>
    %38 = vector.shape_cast %37 : vector<16x16x4xbf16> to vector<256x4xbf16>
    %c5 = arith.constant 5 : index
    %c0_39 = arith.constant 0 : index
    %c0_40 = arith.constant 0 : index
    %39 = vector.load %arg2[%c5, %c0_39, %c0_40] : memref<9x4x128xbf16, #tpu.memory_space<vmem>>, vector<1x4x128xbf16>
    %40 = vector.shape_cast %39 : vector<1x4x128xbf16> to vector<4x128xbf16>
    %cst_41 = arith.constant dense<0.000000e+00> : vector<256x128xf32>
    %41 = tpu.matmul %38, %40, %cst_41 {dimension_numbers = #tpu.dot_dimension_numbers<[1], [0], [0], [1], [0, 0, 1, 1], [], []>} : vector<256x4xbf16>, vector<4x128xbf16>, vector<256x128xf32> -> vector<256x128xf32>
    %42 = arith.addf %35, %41 : vector<256x128xf32>
    %c0_42 = arith.constant 0 : index
    %c2_43 = arith.constant 2 : index
    %c0_44 = arith.constant 0 : index
    %c0_45 = arith.constant 0 : index
    %43 = vector.load %arg1[%c0_42, %c2_43, %c0_44, %c0_45] : memref<1x18x18x4xbf16, #tpu.memory_space<vmem>>, vector<1x16x16x4xbf16>
    %44 = vector.shape_cast %43 : vector<1x16x16x4xbf16> to vector<16x16x4xbf16>
    %45 = vector.shape_cast %44 : vector<16x16x4xbf16> to vector<256x4xbf16>
    %c6 = arith.constant 6 : index
    %c0_46 = arith.constant 0 : index
    %c0_47 = arith.constant 0 : index
    %46 = vector.load %arg2[%c6, %c0_46, %c0_47] : memref<9x4x128xbf16, #tpu.memory_space<vmem>>, vector<1x4x128xbf16>
    %47 = vector.shape_cast %46 : vector<1x4x128xbf16> to vector<4x128xbf16>
    %cst_48 = arith.constant dense<0.000000e+00> : vector<256x128xf32>
    %48 = tpu.matmul %45, %47, %cst_48 {dimension_numbers = #tpu.dot_dimension_numbers<[1], [0], [0], [1], [0, 0, 1, 1], [], []>} : vector<256x4xbf16>, vector<4x128xbf16>, vector<256x128xf32> -> vector<256x128xf32>
    %49 = arith.addf %42, %48 : vector<256x128xf32>
    %c0_49 = arith.constant 0 : index
    %c2_50 = arith.constant 2 : index
    %c1_51 = arith.constant 1 : index
    %c0_52 = arith.constant 0 : index
    %50 = vector.load %arg1[%c0_49, %c2_50, %c1_51, %c0_52] : memref<1x18x18x4xbf16, #tpu.memory_space<vmem>>, vector<1x16x16x4xbf16>
    %51 = vector.shape_cast %50 : vector<1x16x16x4xbf16> to vector<16x16x4xbf16>
    %52 = vector.shape_cast %51 : vector<16x16x4xbf16> to vector<256x4xbf16>
    %c7 = arith.constant 7 : index
    %c0_53 = arith.constant 0 : index
    %c0_54 = arith.constant 0 : index
    %53 = vector.load %arg2[%c7, %c0_53, %c0_54] : memref<9x4x128xbf16, #tpu.memory_space<vmem>>, vector<1x4x128xbf16>
    %54 = vector.shape_cast %53 : vector<1x4x128xbf16> to vector<4x128xbf16>
    %cst_55 = arith.constant dense<0.000000e+00> : vector<256x128xf32>
    %55 = tpu.matmul %52, %54, %cst_55 {dimension_numbers = #tpu.dot_dimension_numbers<[1], [0], [0], [1], [0, 0, 1, 1], [], []>} : vector<256x4xbf16>, vector<4x128xbf16>, vector<256x128xf32> -> vector<256x128xf32>
    %56 = arith.addf %49, %55 : vector<256x128xf32>
    %c0_56 = arith.constant 0 : index
    %c2_57 = arith.constant 2 : index
    %c2_58 = arith.constant 2 : index
    %c0_59 = arith.constant 0 : index
    %57 = vector.load %arg1[%c0_56, %c2_57, %c2_58, %c0_59] : memref<1x18x18x4xbf16, #tpu.memory_space<vmem>>, vector<1x16x16x4xbf16>
    %58 = vector.shape_cast %57 : vector<1x16x16x4xbf16> to vector<16x16x4xbf16>
    %59 = vector.shape_cast %58 : vector<16x16x4xbf16> to vector<256x4xbf16>
    %c8 = arith.constant 8 : index
    %c0_60 = arith.constant 0 : index
    %c0_61 = arith.constant 0 : index
    %60 = vector.load %arg2[%c8, %c0_60, %c0_61] : memref<9x4x128xbf16, #tpu.memory_space<vmem>>, vector<1x4x128xbf16>
    %61 = vector.shape_cast %60 : vector<1x4x128xbf16> to vector<4x128xbf16>
    %cst_62 = arith.constant dense<0.000000e+00> : vector<256x128xf32>
    %62 = tpu.matmul %59, %61, %cst_62 {dimension_numbers = #tpu.dot_dimension_numbers<[1], [0], [0], [1], [0, 0, 1, 1], [], []>} : vector<256x4xbf16>, vector<4x128xbf16>, vector<256x128xf32> -> vector<256x128xf32>
    %63 = arith.addf %56, %62 : vector<256x128xf32>
    %c0_63 = arith.constant 0 : index
    %c0_64 = arith.constant 0 : index
    %64 = vector.load %arg3[%c0_63, %c0_64] : memref<1x128xf32, #tpu.memory_space<vmem>>, vector<1x128xf32>
    %65 = vector.broadcast %64 : vector<1x128xf32> to vector<256x128xf32>
    %66 = arith.addf %63, %65 : vector<256x128xf32>
    %67 = vector.shape_cast %66 : vector<256x128xf32> to vector<1x16x16x128xf32>
    %c0_65 = arith.constant 0 : index
    %c0_66 = arith.constant 0 : index
    %c0_67 = arith.constant 0 : index
    %c0_68 = arith.constant 0 : index
    %68 = vector.load %arg7[%c0_65, %c0_66, %c0_67, %c0_68] : memref<1x16x16x128xf32, #tpu.memory_space<vmem>>, vector<1x16x16x128xf32>
    tpu.vector_store %arg7[%c0_65, %c0_66, %c0_67, %c0_68], %67 {strides = array<i32>} : memref<1x16x16x128xf32, #tpu.memory_space<vmem>>, vector<1x16x16x128xf32>,
    %cst_69 = arith.constant dense<0.000000e+00> : vector<128xf32>
    %69 = vector.multi_reduction <add>, %66, %cst_69 [0] : vector<256x128xf32> to vector<128xf32>
    %70 = vector.shape_cast %69 : vector<128xf32> to vector<1x128xf32>
    %71 = arith.mulf %66, %66 : vector<256x128xf32>
    %cst_70 = arith.constant dense<0.000000e+00> : vector<128xf32>
    %72 = vector.multi_reduction <add>, %71, %cst_70 [0] : vector<256x128xf32> to vector<128xf32>
    %73 = vector.shape_cast %72 : vector<128xf32> to vector<1x128xf32>
    %74 = tpu.concatenate %70, %73 in 0 : vector<1x128xf32>, vector<1x128xf32> -> vector<2x128xf32>
    %75 = vector.shape_cast %74 : vector<2x128xf32> to vector<1x2x128xf32>
    %c0_71 = arith.constant 0 : index
    %c0_72 = arith.constant 0 : index
    %c0_73 = arith.constant 0 : index
    %76 = vector.load %arg8[%c0_71, %c0_72, %c0_73] : memref<1x2x128xf32, #tpu.memory_space<vmem>>, vector<1x2x128xf32>
    tpu.vector_store %arg8[%c0_71, %c0_72, %c0_73], %75 {strides = array<i32>} : memref<1x2x128xf32, #tpu.memory_space<vmem>>, vector<1x2x128xf32>,
    %c0_74 = arith.constant 0 : index
    %c0_75 = arith.constant 0 : index
    %c0_76 = arith.constant 0 : index
    %77 = vector.load %arg4[%c0_74, %c0_75, %c0_76] : memref<1x64x4xbf16, #tpu.memory_space<vmem>>, vector<1x64x4xbf16>
    %78 = vector.shape_cast %77 : vector<1x64x4xbf16> to vector<64x4xbf16>
    %c0_77 = arith.constant 0 : index
    %c0_78 = arith.constant 0 : index
    %79 = vector.load %arg5[%c0_77, %c0_78] : memref<4x128xbf16, #tpu.memory_space<vmem>>, vector<4x128xbf16>
    %cst_79 = arith.constant dense<0.000000e+00> : vector<64x128xf32>
    %80 = tpu.matmul %78, %79, %cst_79 {dimension_numbers = #tpu.dot_dimension_numbers<[1], [0], [0], [1], [0, 0, 1, 1], [], []>} : vector<64x4xbf16>, vector<4x128xbf16>, vector<64x128xf32> -> vector<64x128xf32>
    %c0_80 = arith.constant 0 : index
    %c0_81 = arith.constant 0 : index
    %81 = vector.load %arg6[%c0_80, %c0_81] : memref<1x128xf32, #tpu.memory_space<vmem>>, vector<1x128xf32>
    %82 = vector.broadcast %81 : vector<1x128xf32> to vector<64x128xf32>
    %83 = arith.addf %80, %82 : vector<64x128xf32>
    %84 = vector.shape_cast %83 : vector<64x128xf32> to vector<1x64x128xf32>
    %c0_82 = arith.constant 0 : index
    %c0_83 = arith.constant 0 : index
    %c0_84 = arith.constant 0 : index
    %85 = vector.load %arg9[%c0_82, %c0_83, %c0_84] : memref<1x64x128xf32, #tpu.memory_space<vmem>>, vector<1x64x128xf32>
    tpu.vector_store %arg9[%c0_82, %c0_83, %c0_84], %84 {strides = array<i32>} : memref<1x64x128xf32, #tpu.memory_space<vmem>>, vector<1x64x128xf32>,
    %cst_85 = arith.constant dense<0.000000e+00> : vector<128xf32>
    %86 = vector.multi_reduction <add>, %83, %cst_85 [0] : vector<64x128xf32> to vector<128xf32>
    %87 = vector.shape_cast %86 : vector<128xf32> to vector<1x128xf32>
    %88 = arith.mulf %83, %83 : vector<64x128xf32>
    %cst_86 = arith.constant dense<0.000000e+00> : vector<128xf32>
    %89 = vector.multi_reduction <add>, %88, %cst_86 [0] : vector<64x128xf32> to vector<128xf32>
    %90 = vector.shape_cast %89 : vector<128xf32> to vector<1x128xf32>
    %91 = tpu.concatenate %87, %90 in 0 : vector<1x128xf32>, vector<1x128xf32> -> vector<2x128xf32>
    %92 = vector.shape_cast %91 : vector<2x128xf32> to vector<1x2x128xf32>
    %c0_87 = arith.constant 0 : index
    %c0_88 = arith.constant 0 : index
    %c0_89 = arith.constant 0 : index
    %93 = vector.load %arg10[%c0_87, %c0_88, %c0_89] : memref<1x2x128xf32, #tpu.memory_space<vmem>>, vector<1x2x128xf32>
    tpu.vector_store %arg10[%c0_87, %c0_88, %c0_89], %92 {strides = array<i32>} : memref<1x2x128xf32, #tpu.memory_space<vmem>>, vector<1x2x128xf32>,
    return
  }
  func.func @transform_0(%arg0: i32) -> (i32, i32, i32, i32) {
    %c0_i32 = arith.constant 0 : i32
    %c0_i32_0 = arith.constant 0 : i32
    %c0_i32_1 = arith.constant 0 : i32
    %c0_i32_2 = arith.constant 0 : i32
    return %arg0, %c0_i32, %c0_i32_0, %c0_i32_1 : i32, i32, i32, i32
  }
  func.func @transform_1(%arg0: i32) -> (i32, i32, i32) {
    %c0_i32 = arith.constant 0 : i32
    %c0_i32_0 = arith.constant 0 : i32
    %c0_i32_1 = arith.constant 0 : i32
    %c0_i32_2 = arith.constant 0 : i32
    return %c0_i32, %c0_i32_0, %c0_i32_1 : i32, i32, i32
  }
  func.func @transform_2(%arg0: i32) -> (i32, i32) {
    %c0_i32 = arith.constant 0 : i32
    %c0_i32_0 = arith.constant 0 : i32
    %c0_i32_1 = arith.constant 0 : i32
    return %c0_i32, %c0_i32_0 : i32, i32
  }
  func.func @transform_3(%arg0: i32) -> (i32, i32, i32) {
    %c0_i32 = arith.constant 0 : i32
    %c0_i32_0 = arith.constant 0 : i32
    %c0_i32_1 = arith.constant 0 : i32
    return %arg0, %c0_i32, %c0_i32_0 : i32, i32, i32
  }
  func.func @transform_4(%arg0: i32) -> (i32, i32) {
    %c0_i32 = arith.constant 0 : i32
    %c0_i32_0 = arith.constant 0 : i32
    %c0_i32_1 = arith.constant 0 : i32
    return %c0_i32, %c0_i32_0 : i32, i32
  }
  func.func @transform_5(%arg0: i32) -> (i32, i32) {
    %c0_i32 = arith.constant 0 : i32
    %c0_i32_0 = arith.constant 0 : i32
    %c0_i32_1 = arith.constant 0 : i32
    return %c0_i32, %c0_i32_0 : i32, i32
  }
  func.func @transform_6(%arg0: i32) -> (i32, i32, i32, i32) {
    %c0_i32 = arith.constant 0 : i32
    %c0_i32_0 = arith.constant 0 : i32
    %c0_i32_1 = arith.constant 0 : i32
    %c0_i32_2 = arith.constant 0 : i32
    return %arg0, %c0_i32, %c0_i32_0, %c0_i32_1 : i32, i32, i32, i32
  }
  func.func @transform_7(%arg0: i32) -> (i32, i32, i32) {
    %c0_i32 = arith.constant 0 : i32
    %c0_i32_0 = arith.constant 0 : i32
    %c0_i32_1 = arith.constant 0 : i32
    return %arg0, %c0_i32, %c0_i32_0 : i32, i32, i32
  }
  func.func @transform_8(%arg0: i32) -> (i32, i32, i32) {
    %c0_i32 = arith.constant 0 : i32
    %c0_i32_0 = arith.constant 0 : i32
    %c0_i32_1 = arith.constant 0 : i32
    return %arg0, %c0_i32, %c0_i32_0 : i32, i32, i32
  }
  func.func @transform_9(%arg0: i32) -> (i32, i32, i32) {
    %c0_i32 = arith.constant 0 : i32
    %c0_i32_0 = arith.constant 0 : i32
    %c0_i32_1 = arith.constant 0 : i32
    return %arg0, %c0_i32, %c0_i32_0 : i32, i32, i32
  }
}

</mosaic_0001>

<bundles_post_ra>
// kernel: layer_block_pallas.3
= control target key start
LH: loop header
LB: loop body
LE: loop exit
PB: predicated region body
PF: predicated region fallthrough
CT: control target
= control target key end

     0   :  { %s916_s27 = smov 0   ;;  %s1132_s0 = inlined_call_operand.vmem [shape: f32[2,16,16,128], index: 0, kind: input, shape index: {}]   ;;  %s1133_s1 = inlined_call_operand.vmem [shape: f32[2,128], index: 1, kind: input, shape index: {}]   ;;  %s1134_s2 = inlined_call_operand.vmem [shape: f32[1,128], index: 2, kind: input, shape index: {}]   ;;  %s1135_s3 = inlined_call_operand.vmem [shape: f32[1,128], index: 3, kind: input, shape index: {}]   ;;  %s1136_s4 = inlined_call_operand.vmem [shape: f32[2,64,128], index: 4, kind: input, shape index: {}]   ;;  %s1137_s5 = inlined_call_operand.vmem [shape: f32[2,128], index: 5, kind: input, shape index: {}]   ;;  %s1138_s6 = inlined_call_operand.vmem [shape: f32[1,128], index: 6, kind: input, shape index: {}]   ;;  %s1139_s7 = inlined_call_operand.vmem [shape: f32[1,128], index: 7, kind: input, shape index: {}]   ;;  %s1140_s8 = inlined_call_operand.vmem [shape: f32[2,8,8,128], index: 8, kind: output, shape index: {}]  }
   0x1 LB: > { %s826_s28 = sadd.s32 4294967295, %s868_s27   ;;  %p830_p0 = scmp.ge.s32.totalorder %s868_s27, 1  ;;  %s868_s27 = sphi %s916_s27, %s18_s27  }
   0x2   : > { %p272_p1 = scmp.lt.s32.totalorder %s868_s27, 3 }
   0x4   : > { %p273_p2 = pnand %p830_p0, %p272_p1 }
   0x5   : > { %v326_v0 = vld [vmem:[%s1133_s1] sm:$0x1] (!%p273_p2)  ;;  %v328_v1 = vld [vmem:[%s1133_s1 + $0x1] sm:$0x1] (!%p273_p2)  ;;  %v870_v2 = vmov (!%p273_p2), -inf   ;;  %p311_p3 = scmp.lt.s32.totalorder (!%p273_p2), %s826_s28, 1  ;;  %v441_v17 = vlaneseq (!%p273_p2) }
   0x6   : > { %276 = sbr.rel (%p273_p2) target bundleno = 76 (0x4c), region = 52  ;;  %354 = vst [vmem:[#allocation2] sm:$0xff] (!%p273_p2), %v870_v2  ;;  %355 = vst [vmem:[#allocation2 + $0x8] sm:$0xff] (!%p273_p2), %v870_v2  ;;  %v327_v3 = vmul.f32 (!%p273_p2), 0.001953125, %v326_v0  ;;  %v329_v4 = vmul.f32 (!%p273_p2), 0.001953125, %v328_v1 }
   0x7   : > { %356 = vst [vmem:[#allocation2 + $0x10] sm:$0x3] (!%p273_p2), %v870_v2  ;;  %357 = vst [vmem:[#allocation2 + $0x18] sm:$0xff] (!%p273_p2), %v870_v2  ;;  %v340_v5 = vld [vmem:[%s1137_s5] sm:$0x1] (!%p273_p2)  ;;  %v442_v18 = vshrl.u32 (!%p273_p2), %v441_v17, 7 }
   0x8   : > { %358 = vst [vmem:[#allocation2 + $0x20] sm:$0xff] (!%p273_p2), %v870_v2  ;;  %359 = vst [vmem:[#allocation2 + $0x28] sm:$0x3] (!%p273_p2), %v870_v2  ;;  %v342_v6 = vld [vmem:[%s1137_s5 + $0x1] sm:$0x1] (!%p273_p2)  ;;  %v330_v7 = vmul.f32 (!%p273_p2), %v327_v3, %v327_v3  ;;  %v936_v8 = vmul.f32 (!%p273_p2), 0.0078125, %v340_v5 }
   0x9   : > { %360 = vst [vmem:[#allocation2 + $0x30] sm:$0xff] (!%p273_p2), %v870_v2  ;;  %361 = vst [vmem:[#allocation2 + $0x38] sm:$0xff] (!%p273_p2), %v870_v2  ;;  %v343_v9 = vmul.f32 (!%p273_p2), 0.0078125, %v342_v6  ;;  %v333_v21 = vld [vmem:[%s1134_s2] sm:$0x1] (!%p273_p2)  ;;  %v955_v22 = vsub.s32 (!%p273_p2), 0, %v442_v18 }
   0xa   : > { %362 = vst [vmem:[#allocation2 + $0x40] sm:$0x3] (!%p273_p2), %v870_v2  ;;  %363 = vst [vmem:[#allocation2 + $0x48] sm:$0xff] (!%p273_p2), %v870_v2  ;;  %v331_v10 = vsub.f32 (!%p273_p2), %v329_v4, %v330_v7  ;;  %v344_v11 = vmul.f32 (!%p273_p2), %v936_v8, %v936_v8  ;;  %v337_v24 = vld [vmem:[%s1135_s3] sm:$0x1] (!%p273_p2) }
   0xb   : > { %364 = vst [vmem:[#allocation2 + $0x50] sm:$0xff] (!%p273_p2), %v870_v2  ;;  %365 = vst [vmem:[#allocation2 + $0x58] sm:$0x3] (!%p273_p2), %v870_v2  ;;  %v347_v25 = vld [vmem:[%s1138_s6] sm:$0x1] (!%p273_p2) }
   0xc   : > { %366 = vst [vmem:[#allocation2 + $0x60] sm:$0xff] (!%p273_p2), %v870_v2  ;;  %367 = vst [vmem:[#allocation2 + $0x68] sm:$0xff] (!%p273_p2), %v870_v2  ;;  %v332_v12 = vmax.f32 (!%p273_p2), %v331_v10, 0.0  ;;  %v345_v13 = vsub.f32 (!%p273_p2), %v343_v9, %v344_v11 }
   0xd   : > { %368 = vst [vmem:[#allocation2 + $0x70] sm:$0x3] %v870_v2  ;;  %369 = vst [vmem:[#allocation2 + $0x78] sm:$0xff] %v870_v2  ;;  %s1142_s28 = smov (!%p311_p3, %s826_s28), 1  ;;  %v549_v19 = vld [vmem:[#allocation2] ss:$2 sm:$0xff] }
   0xe   : > { %370 = vst [vmem:[#allocation2 + $0x80] sm:$0xff] %v870_v2  ;;  %371 = vst [vmem:[#allocation2 + $0x88] sm:$0x3] %v870_v2  ;;  %v334_v14 = vadd.f32 1e-05, %v332_v12  ;;  %v346_v15 = vmax.f32 %v345_v13, 0.0 }
   0xf   : > { %372 = vst [vmem:[#allocation2 + $0x90] sm:$0xff] %v870_v2  ;;  %373 = vst [vmem:[#allocation2 + $0x98] sm:$0xff] %v870_v2  ;;  %s846_s15 = sshll.u32 %s1142_s28, 8  ;;  %v583_v20 = vld [vmem:[#allocation2 + $0x1] ss:$2 sm:$0xff]  ;;  %s847_s25 = sshll.u32 %s1142_s28, 6 }
  0x10   : > { %374 = vst [vmem:[#allocation2 + $0xa0] sm:$0x3] %v870_v2  ;;  %375 = vst [vmem:[#allocation2 + $0xa8] sm:$0xff] %v870_v2  ;;  %858 = vrsqrt.f32 %v334_v14  ;;  %v348_v16 = vadd.f32 1e-05, %v346_v15  ;;  %s950_s18 = scalar_lea.vmem %s1132_s0, %s846_s15  ;;  %v616_v26 = vmax.f32 %v549_v19, %v583_v20  ;;  %s1055_s30 = scalar_lea.vmem %s1136_s4, %s847_s25 }
  0x11   : > { %376 = vst [vmem:[#allocation2 + $0xb0] sm:$0xff] %v870_v2  ;;  %377 = vst [vmem:[#allocation2 + $0xb8] sm:$0x3] %v870_v2  ;;  %v408_v28 = vld [vmem:[%s950_s18] sm:$0xff]  ;;  %v409_v29 = vld [vmem:[%s950_s18 + $0x8] sm:$0xff]  ;;  %s1105_s13 = scalar_lea.vmem %s1140_s8, %s847_s25 }
  0x12   : > { %378 = vst [vmem:[#allocation2 + $0xc0] sm:$0xff] %v870_v2  ;;  %379 = vst [vmem:[#allocation2 + $0xc8] sm:$0xff] %v870_v2  ;;  %860 = vrsqrt.f32 %v348_v16  ;;  %v634_v30 = vld [vmem:[#allocation2 + $0x2] ss:$2 sm:$0xff]  ;;  %v411_v33 = vld [vmem:[%s950_s18 + $0x18] sm:$0xff] }
  0x13   : > { %380 = vst [vmem:[#allocation2 + $0xd0] sm:$0x3] %v870_v2  ;;  %381 = vst [vmem:[#allocation2 + $0xd8] sm:$0xff] %v870_v2  ;;  %v410_v32 = vld [vmem:[%s950_s18 + $0x10] sm:$0xff]  ;;  %v412_v34 = vld [vmem:[%s950_s18 + $0x20] sm:$0xff]  ;;  %v979_v44 = vmax.f32 %v616_v26, %v634_v30 }
  0x14   : > { %382 = vst [vmem:[#allocation2 + $0xe0] sm:$0xff] %v870_v2  ;;  %383 = vst [vmem:[#allocation2 + $0xe8] sm:$0x3] %v870_v2  ;;  %v413_v37 = vld [vmem:[%s950_s18 + $0x28] sm:$0xff]  ;;  %v414_v38 = vld [vmem:[%s950_s18 + $0x30] sm:$0xff] }
  0x15   : > { %384 = vst [vmem:[#allocation2 + $0xf0] sm:$0xff] %v870_v2  ;;  %385 = vst [vmem:[#allocation2 + $0xf8] sm:$0xff] %v870_v2  ;;  %v415_v39 = vld [vmem:[%s950_s18 + $0x38] sm:$0xff]  ;;  %v416_v40 = vld [vmem:[%s950_s18 + $0x40] sm:$0xff] }
  0x16   : > { %386 = vst [vmem:[#allocation2 + $0x100] sm:$0x3] %v870_v2  ;;  %387 = vst [vmem:[#allocation2 + $0x108] sm:$0xff] %v870_v2  ;;  %v417_v41 = vld [vmem:[%s950_s18 + $0x48] sm:$0xff]  ;;  %v418_v42 = vld [vmem:[%s950_s18 + $0x50] sm:$0xff] }
  0x17   : > { %388 = vst [vmem:[#allocation2 + $0x110] sm:$0xff] %v870_v2  ;;  %389 = vst [vmem:[#allocation2 + $0x118] sm:$0x3] %v870_v2  ;;  %v419_v49 = vld [vmem:[%s950_s18 + $0x58] sm:$0xff]  ;;  %v420_v50 = vld [vmem:[%s950_s18 + $0x60] sm:$0xff] }
  0x18   : > { %390 = vst [vmem:[#allocation2 + $0x120] sm:$0xff] %v870_v2  ;;  %391 = vst [vmem:[#allocation2 + $0x128] sm:$0xff] %v870_v2  ;;  %v421_v51 = vld [vmem:[%s950_s18 + $0x68] sm:$0xff]  ;;  %v422_v4 = vld [vmem:[%s950_s18 + $0x70] sm:$0xff] }
  0x19   : > { %392 = vst [vmem:[#allocation2 + $0x130] sm:$0x3] %v870_v2  ;;  %393 = vst [vmem:[#allocation2 + $0x138] sm:$0xff] %v870_v2  ;;  %v423_v5 = vld [vmem:[%s950_s18 + $0x78] sm:$0xff]  ;;  %v424_v6 = vld [vmem:[%s950_s18 + $0x80] sm:$0xff] }
  0x1a   : > { %394 = vst [vmem:[#allocation2 + $0x140] sm:$0xff] %v870_v2  ;;  %395 = vst [vmem:[#allocation2 + $0x148] sm:$0x3] %v870_v2  ;;  %v859_v23 = vpop.eup %858  ;;  %v425_v12 = vld [vmem:[%s950_s18 + $0x88] sm:$0xff]  ;;  %v426_v13 = vld [vmem:[%s950_s18 + $0x90] sm:$0xff] }
  0x1b   : > { %396 = vst [vmem:[#allocation2 + $0x150] sm:$0xff] %v870_v2  ;;  %397 = vst [vmem:[#allocation2 + $0x158] sm:$0xff] %v870_v2  ;;  %v336_v27 = vmul.f32 %v859_v23, %v333_v21  ;;  %v427_v14 = vld [vmem:[%s950_s18 + $0x98] sm:$0xff]  ;;  %v428_v19 = vld [vmem:[%s950_s18 + $0xa0] sm:$0xff] }
  0x1c   : > { %398 = vst [vmem:[#allocation2 + $0x160] sm:$0x3] %v870_v2  ;;  %399 = vst [vmem:[#allocation2 + $0x168] sm:$0xff] %v870_v2  ;;  %v861_v31 = vpop.eup %860  ;;  %v429_v20 = vld [vmem:[%s950_s18 + $0xa8] sm:$0xff]  ;;  %v430_v30 = vld [vmem:[%s950_s18 + $0xb0] sm:$0xff] }
  0x1d   : > { %400 = vst [vmem:[#allocation2 + $0x170] sm:$0xff] %v870_v2  ;;  %401 = vst [vmem:[#allocation2 + $0x178] sm:$0x3] %v870_v2  ;;  %v338_v35 = vmul.f32 %v336_v27, %v327_v3  ;;  %v969_v36 = vrot.slane %v336_v27, %v955_v22  ;;  %v977_v43 = vmul.f32 %v861_v31, %v347_v25  ;;  %v431_v31 = vld [vmem:[%s950_s18 + $0xb8] sm:$0xff] }
  0x1e   : > { %402 = vst [vmem:[#allocation2 + $0x180] sm:$0xff] %v870_v2  ;;  %403 = vst [vmem:[#allocation2 + $0x188] sm:$0xff] %v870_v2 }
  0x1f   : > { %404 = vst [vmem:[#allocation2 + $0x190] sm:$0x3] %v870_v2  ;;  %v339_v45 = vsub.f32 %v337_v24, %v338_v35  ;;  %v446_v46 = vmul.f32 %v969_v36, %v408_v28  ;;  %v447_v47 = vmul.f32 %v969_v36, %v409_v29  ;;  %v448_v48 = vmul.f32 %v969_v36, %v410_v32  ;;  %v432_v32 = vld [vmem:[%s950_s18 + $0xc0] sm:$0xff] }
  0x20   : > { %v449_v52 = vmul.f32 %v969_v36, %v411_v33  ;;  %v450_v53 = vmul.f32 %v969_v36, %v412_v34  ;;  %v451_v54 = vmul.f32 %v969_v36, %v413_v37  ;;  %v452_v55 = vmul.f32 %v969_v36, %v414_v38  ;;  %v433_v38 = vld [vmem:[%s950_s18 + $0xc8] sm:$0xff] }
  0x21   : > { %v992_v56 = vrot.slane %v339_v45, %v955_v22  ;;  %v453_v57 = vmul.f32 %v969_v36, %v415_v39  ;;  %v454_v58 = vmul.f32 %v969_v36, %v416_v40  ;;  %v455_v59 = vmul.f32 %v969_v36, %v417_v41  ;;  %v434_v39 = vld [vmem:[%s950_s18 + $0xd0] sm:$0xff]  ;;  %v435_v40 = vld [vmem:[%s950_s18 + $0xd8] sm:$0xff] }
  0x22   : > { %v456_v60 = vmul.f32 %v969_v36, %v418_v42  ;;  %v457_v61 = vmul.f32 %v969_v36, %v419_v49  ;;  %v458_v62 = vmul.f32 %v969_v36, %v420_v50  ;;  %v459_v63 = vmul.f32 %v969_v36, %v421_v51 }
  0x23   : > { %v484_v0 = vadd.f32 %v992_v56, %v446_v46  ;;  %v485_v1 = vadd.f32 %v992_v56, %v447_v47  ;;  %v486_v2 = vadd.f32 %v992_v56, %v448_v48  ;;  %v487_v3 = vadd.f32 %v992_v56, %v449_v52  ;;  %v436_v47 = vld [vmem:[%s950_s18 + $0xe0] sm:$0xff]  ;;  %v437_v48 = vld [vmem:[%s950_s18 + $0xe8] sm:$0xff] }
  0x24   : > { %v488_v7 = vadd.f32 %v992_v56, %v450_v53  ;;  %v489_v9 = vadd.f32 %v992_v56, %v451_v54  ;;  %v490_v10 = vadd.f32 %v992_v56, %v452_v55  ;;  %v491_v11 = vadd.f32 %v992_v56, %v453_v57 }
  0x25   : > { %517 = vst [vmem:[#allocation2 + $0x19] sm:$0xff] %v484_v0  ;;  %518 = vst [vmem:[#allocation2 + $0x21] sm:$0xff] %v485_v1  ;;  %v492_v15 = vadd.f32 %v992_v56, %v454_v58  ;;  %v493_v16 = vadd.f32 %v992_v56, %v455_v59  ;;  %v494_v17 = vadd.f32 %v992_v56, %v456_v60  ;;  %v438_v58 = vld [vmem:[%s950_s18 + $0xf0] sm:$0xff]  ;;  %v439_v59 = vld [vmem:[%s950_s18 + $0xf8] sm:$0xff] }
  0x26   : > { %519 = vst [vmem:[#allocation2 + $0x31] sm:$0xff] %v486_v2  ;;  %520 = vst [vmem:[#allocation2 + $0x39] sm:$0xff] %v487_v3  ;;  %v495_v18 = vadd.f32 %v992_v56, %v457_v61  ;;  %v496_v21 = vadd.f32 %v992_v56, %v458_v62  ;;  %v497_v23 = vadd.f32 %v992_v56, %v459_v63  ;;  %v351_v0 = vld [vmem:[%s1139_s7] sm:$0x1] }
  0x27   : > { %521 = vst [vmem:[#allocation2 + $0x49] sm:$0xff] %v488_v7  ;;  %522 = vst [vmem:[#allocation2 + $0x51] sm:$0xff] %v489_v9  ;;  %v460_v24 = vmul.f32 %v969_v36, %v422_v4  ;;  %v461_v25 = vmul.f32 %v969_v36, %v423_v5  ;;  %v462_v26 = vmul.f32 %v969_v36, %v424_v6 }
  0x28   : > { %523 = vst [vmem:[#allocation2 + $0x61] sm:$0xff] %v490_v10  ;;  %524 = vst [vmem:[#allocation2 + $0x69] sm:$0xff] %v491_v11  ;;  %v463_v27 = vmul.f32 %v969_v36, %v425_v12  ;;  %v464_v28 = vmul.f32 %v969_v36, %v426_v13  ;;  %v465_v29 = vmul.f32 %v969_v36, %v427_v14  ;;  %v684_v10 = vld [vmem:[%s1055_s30] sm:$0xff]  ;;  %v685_v11 = vld [vmem:[%s1055_s30 + $0x8] sm:$0xff] }
  0x29   : > { %525 = vst [vmem:[#allocation2 + $0x79] sm:$0xff] %v492_v15  ;;  %526 = vst [vmem:[#allocation2 + $0x81] sm:$0xff] %v493_v16  ;;  %v498_v33 = vadd.f32 %v992_v56, %v460_v24  ;;  %v499_v34 = vadd.f32 %v992_v56, %v461_v25  ;;  %v466_v35 = vmul.f32 %v969_v36, %v428_v19  ;;  %v686_v19 = vld [vmem:[%s1055_s30 + $0x10] sm:$0xff] }
  0x2a   : > { %527 = vst [vmem:[#allocation2 + $0x91] sm:$0xff] %v494_v17  ;;  %528 = vst [vmem:[#allocation2 + $0x99] sm:$0xff] %v495_v18  ;;  %v467_v37 = vmul.f32 %v969_v36, %v429_v20  ;;  %v500_v41 = vadd.f32 %v992_v56, %v462_v26  ;;  %v501_v42 = vadd.f32 %v992_v56, %v463_v27 }
  0x2b   : > { %529 = vst [vmem:[#allocation2 + $0xa9] sm:$0xff] %v496_v21  ;;  %530 = vst [vmem:[#allocation2 + $0xb1] sm:$0xff] %v497_v23  ;;  %v502_v45 = vadd.f32 %v992_v56, %v464_v28  ;;  %v503_v46 = vadd.f32 %v992_v56, %v465_v29  ;;  %v504_v49 = vadd.f32 %v992_v56, %v466_v35 }
  0x2c   : > { %531 = vst [vmem:[#allocation2 + $0xc1] sm:$0xff] %v498_v33  ;;  %532 = vst [vmem:[#allocation2 + $0xc9] sm:$0xff] %v499_v34  ;;  %v505_v50 = vadd.f32 %v992_v56, %v467_v37  ;;  %v468_v51 = vmul.f32 %v969_v36, %v430_v30  ;;  %v469_v52 = vmul.f32 %v969_v36, %v431_v31  ;;  %v551_v1 = vld [vmem:[#allocation2 + $0x18] ss:$2 sm:$0xff]  ;;  %v585_v3 = vld [vmem:[#allocation2 + $0x19] ss:$2 sm:$0xff] }
  0x2d   : > { %533 = vst [vmem:[#allocation2 + $0xd9] sm:$0xff] %v500_v41  ;;  %534 = vst [vmem:[#allocation2 + $0xe1] sm:$0xff] %v501_v42  ;;  %v470_v53 = vmul.f32 %v969_v36, %v432_v32  ;;  %v471_v54 = vmul.f32 %v969_v36, %v433_v38  ;;  %v472_v55 = vmul.f32 %v969_v36, %v434_v39  ;;  %v553_v2 = vld [vmem:[#allocation2 + $0x30] ss:$2 sm:$0xff]  ;;  %v587_v9 = vld [vmem:[#allocation2 + $0x31] ss:$2 sm:$0xff] }
  0x2e   : > { %535 = vst [vmem:[#allocation2 + $0xf1] sm:$0xff] %v502_v45  ;;  %536 = vst [vmem:[#allocation2 + $0xf9] sm:$0xff] %v503_v46  ;;  %v473_v57 = vmul.f32 %v969_v36, %v435_v40  ;;  %v506_v60 = vadd.f32 %v992_v56, %v468_v51  ;;  %v507_v61 = vadd.f32 %v992_v56, %v469_v52  ;;  %v555_v16 = vld [vmem:[#allocation2 + $0x48] ss:$2 sm:$0xff]  ;;  %v589_v18 = vld [vmem:[#allocation2 + $0x49] ss:$2 sm:$0xff] }
  0x2f   : > { %537 = vst [vmem:[#allocation2 + $0x109] sm:$0xff] %v504_v49  ;;  %538 = vst [vmem:[#allocation2 + $0x111] sm:$0xff] %v505_v50  ;;  %v474_v62 = vmul.f32 %v969_v36, %v436_v47  ;;  %v475_v63 = vmul.f32 %v969_v36, %v437_v48  ;;  %v508_v4 = vadd.f32 %v992_v56, %v470_v53  ;;  %v557_v17 = vld [vmem:[#allocation2 + $0x60] ss:$2 sm:$0xff] }
  0x30   : > { %v509_v5 = vadd.f32 %v992_v56, %v471_v54  ;;  %v510_v6 = vadd.f32 %v992_v56, %v472_v55  ;;  %v511_v7 = vadd.f32 %v992_v56, %v473_v57  ;;  %539 = vst [vmem:[#allocation2 + $0x121] sm:$0xff] %v506_v60  ;;  %540 = vst [vmem:[#allocation2 + $0x129] sm:$0xff] %v507_v61  ;;  %v636_v24 = vld [vmem:[#allocation2 + $0x1a] ss:$2 sm:$0xff]  ;;  %v640_v38 = vld [vmem:[#allocation2 + $0x4a] ss:$2 sm:$0xff] }
  0x31   : > { %v512_v12 = vadd.f32 %v992_v56, %v474_v62  ;;  %v513_v13 = vadd.f32 %v992_v56, %v475_v63  ;;  %v476_v14 = vmul.f32 %v969_v36, %v438_v58  ;;  %v477_v15 = vmul.f32 %v969_v36, %v439_v59  ;;  %541 = vst [vmem:[#allocation2 + $0x139] sm:$0xff] %v508_v4  ;;  %v638_v25 = vld [vmem:[#allocation2 + $0x32] ss:$2 sm:$0xff]  ;;  %v591_v36 = vld [vmem:[#allocation2 + $0x61] ss:$2 sm:$0xff] }
  0x32   : > { %542 = vst [vmem:[#allocation2 + $0x141] sm:$0xff] %v509_v5  ;;  %543 = vst [vmem:[#allocation2 + $0x151] sm:$0xff] %v510_v6  ;;  %v352_v20 = vmul.f32 %v977_v43, %v936_v8  ;;  %v617_v21 = vmax.f32 %v551_v1, %v585_v3  ;;  %v618_v23 = vmax.f32 %v553_v2, %v587_v9  ;;  %v559_v31 = vld [vmem:[#allocation2 + $0x78] ss:$2 sm:$0xff]  ;;  %v593_v8 = vld [vmem:[#allocation2 + $0x79] ss:$2 sm:$0xff] }
  0x33   : > { %544 = vst [vmem:[#allocation2 + $0x159] sm:$0xff] %v511_v7  ;;  %v1085_v26 = vrot.slane %v977_v43, %v955_v22  ;;  %545 = vst [vmem:[#allocation2 + $0x169] sm:$0xff] %v512_v12  ;;  %v514_v27 = vadd.f32 %v992_v56, %v476_v14  ;;  %v515_v28 = vadd.f32 %v992_v56, %v477_v15  ;;  %v561_v32 = vld [vmem:[#allocation2 + $0x90] ss:$2 sm:$0xff]  ;;  %v595_v39 = vld [vmem:[#allocation2 + $0x91] ss:$2 sm:$0xff] }
  0x34   : > { %546 = vst [vmem:[#allocation2 + $0x171] sm:$0xff] %v513_v13  ;;  %v619_v29 = vmax.f32 %v555_v16, %v589_v18  ;;  %v620_v30 = vmax.f32 %v557_v17, %v591_v36  ;;  %v353_v33 = vsub.f32 %v351_v0, %v352_v20  ;;  %v668_v34 = vmax.f32 %v617_v21, %v636_v24  ;;  %v642_v43 = vld [vmem:[#allocation2 + $0x62] ss:$2 sm:$0xff]  ;;  %v597_v47 = vld [vmem:[#allocation2 + $0xa9] ss:$2 sm:$0xff]  ;;  %v687_v54 = vld [vmem:[%s1055_s30 + $0x18] sm:$0xff] }
  0x35   : > { %v669_v35 = vmax.f32 %v618_v23, %v638_v25  ;;  %v698_v37 = vmul.f32 %v1085_v26, %v684_v10  ;;  %547 = vst [vmem:[#allocation2 + $0x181] sm:$0xff] %v514_v27  ;;  %548 = vst [vmem:[#allocation2 + $0x189] sm:$0xff] %v515_v28  ;;  %v699_v56 = vmul.f32 %v1085_v26, %v685_v11  ;;  %v563_v45 = vld [vmem:[#allocation2 + $0xa8] ss:$2 sm:$0xff]  ;;  %v599_v53 = vld [vmem:[#allocation2 + $0xc1] ss:$2 sm:$0xff] }
  0x36   : > { %v670_v40 = vmax.f32 %v619_v29, %v640_v38  ;;  %v671_v41 = vmax.f32 %v620_v30, %v642_v43  ;;  %v621_v42 = vmax.f32 %v559_v31, %v593_v8  ;;  %v565_v46 = vld [vmem:[#allocation2 + $0xc0] ss:$2 sm:$0xff]  ;;  %v1092_v48 = vrot.slane %v353_v33, %v955_v22  ;;  %v601_v62 = vld [vmem:[#allocation2 + $0xd9] ss:$2 sm:$0xff]  ;;  %v569_v3 = vld [vmem:[#allocation2 + $0xf0] ss:$2 sm:$0xff] }
  0x37   : > { %v720_v49 = vmax.f32 %v979_v44, %v668_v34  ;;  %v622_v50 = vmax.f32 %v561_v32, %v595_v39  ;;  %v644_v51 = vld [vmem:[#allocation2 + $0x7a] ss:$2 sm:$0xff]  ;;  %v700_v52 = vmul.f32 %v1085_v26, %v686_v19  ;;  %v623_v59 = vmax.f32 %v563_v45, %v597_v47  ;;  %v648_v2 = vld [vmem:[#allocation2 + $0xaa] ss:$2 sm:$0xff]  ;;  %v603_v4 = vld [vmem:[#allocation2 + $0xf1] ss:$2 sm:$0xff] }
  0x38   : > { %v724_v55 = vmax.f32 %v669_v35, %v670_v40  ;;  %v646_v57 = vld [vmem:[#allocation2 + $0x92] ss:$2 sm:$0xff]  ;;  %v672_v58 = vmax.f32 %v621_v42, %v644_v51  ;;  %v624_v60 = vmax.f32 %v565_v46, %v599_v53  ;;  %v712_v22 = vadd.f32 %v1092_v48, %v698_v37  ;;  %v650_v9 = vld [vmem:[#allocation2 + $0xc2] ss:$2 sm:$0xff]  ;;  %v605_v12 = vld [vmem:[#allocation2 + $0x109] ss:$2 sm:$0xff] }
  0x39   : > { %v567_v61 = vld [vmem:[#allocation2 + $0xd8] ss:$2 sm:$0xff]  ;;  %v721_v0 = vmax.f32 %v720_v49, %v669_v35  ;;  %v713_v44 = vadd.f32 %v1092_v48, %v699_v56  ;;  %v673_v1 = vmax.f32 %v622_v50, %v646_v57  ;;  %v714_v6 = vadd.f32 %v1092_v48, %v700_v52  ;;  %v571_v11 = vld [vmem:[#allocation2 + $0x108] ss:$2 sm:$0xff]  ;;  %v607_v18 = vld [vmem:[#allocation2 + $0x121] ss:$2 sm:$0xff] }
  0x3a   : > { %v688_v63 = vld [vmem:[%s1055_s30 + $0x20] sm:$0xff]  ;;  %v725_v5 = vmax.f32 %v724_v55, %v671_v41  ;;  %v729_v7 = vmax.f32 %v671_v41, %v672_v58  ;;  %v674_v10 = vmax.f32 %v623_v59, %v648_v2  ;;  %v675_v14 = vmax.f32 %v624_v60, %v650_v9  ;;  %v689_v19 = vld [vmem:[%s1055_s30 + $0x28] sm:$0xff]  ;;  %v690_v28 = vld [vmem:[%s1055_s30 + $0x30] sm:$0xff] }
  0x3b   : > { %v722_v13 = vadd.f32 %v721_v0, %v712_v22  ;;  %v701_v15 = vmul.f32 %v1085_v26, %v687_v54  ;;  %v625_v16 = vmax.f32 %v567_v61, %v601_v62  ;;  %v573_v17 = vld [vmem:[#allocation2 + $0x120] ss:$2 sm:$0xff]  ;;  %v626_v24 = vmax.f32 %v569_v3, %v603_v4  ;;  %v577_v8 = vld [vmem:[#allocation2 + $0x150] ss:$2 sm:$0xff]  ;;  %v609_v33 = vld [vmem:[#allocation2 + $0x139] ss:$2 sm:$0xff] }
  0x3c   : > { %v726_v20 = vadd.f32 %v725_v5, %v713_v44  ;;  %v730_v21 = vmax.f32 %v729_v7, %v673_v1  ;;  %v734_v23 = vmax.f32 %v673_v1, %v674_v10  ;;  %v652_v25 = vld [vmem:[#allocation2 + $0xda] ss:$2 sm:$0xff]  ;;  %v702_v31 = vmul.f32 %v1085_v26, %v688_v63  ;;  %v611_v34 = vld [vmem:[#allocation2 + $0x151] ss:$2 sm:$0xff]  ;;  %v656_v39 = vld [vmem:[#allocation2 + $0x10a] ss:$2 sm:$0xff] }
  0x3d   : > { %v654_v36 = vld [vmem:[#allocation2 + $0xf2] ss:$2 sm:$0xff]  ;;  %723 = vst [vmem:[%s1105_s13] sm:$0xff] %v722_v13  ;;  %v715_v29 = vadd.f32 %v1092_v48, %v701_v15  ;;  %v676_v30 = vmax.f32 %v625_v16, %v652_v25  ;;  %v627_v32 = vmax.f32 %v571_v11, %v605_v12  ;;  %v628_v43 = vmax.f32 %v573_v17, %v607_v18  ;;  %v658_v40 = vld [vmem:[#allocation2 + $0x122] ss:$2 sm:$0xff]  ;;  %v613_v49 = vld [vmem:[#allocation2 + $0x169] ss:$2 sm:$0xff] }
  0x3e   : > { %v575_v27 = vld [vmem:[#allocation2 + $0x138] ss:$2 sm:$0xff]  ;;  %837 = vst [vmem:[%s1105_s13 + $0x8] sm:$0xff] %v726_v20  ;;  %v731_v35 = vadd.f32 %v730_v21, %v714_v6  ;;  %v735_v37 = vmax.f32 %v734_v23, %v675_v14  ;;  %v677_v38 = vmax.f32 %v626_v24, %v654_v36  ;;  %v579_v41 = vld [vmem:[#allocation2 + $0x168] ss:$2 sm:$0xff]  ;;  %v716_v56 = vadd.f32 %v1092_v48, %v702_v31 }
  0x3f   : > { %v739_v42 = vmax.f32 %v675_v14, %v676_v30  ;;  %v678_v45 = vmax.f32 %v627_v32, %v656_v39  ;;  %v703_v46 = vmul.f32 %v1085_v26, %v689_v19  ;;  %v581_v47 = vld [vmem:[#allocation2 + $0x180] ss:$2 sm:$0xff]  ;;  %v615_v50 = vld [vmem:[#allocation2 + $0x181] ss:$2 sm:$0xff]  ;;  %v679_v52 = vmax.f32 %v628_v43, %v658_v40  ;;  %v691_v55 = vld [vmem:[%s1055_s30 + $0x38] sm:$0xff] }
  0x40   : > { %838 = vst [vmem:[%s1105_s13 + $0x10] sm:$0xff] %v731_v35  ;;  %v736_v51 = vadd.f32 %v735_v37, %v715_v29  ;;  %v629_v53 = vmax.f32 %v575_v27, %v609_v33  ;;  %v630_v54 = vmax.f32 %v577_v8, %v611_v34  ;;  %v660_v60 = vld [vmem:[#allocation2 + $0x13a] ss:$2 sm:$0xff]  ;;  %v704_v62 = vmul.f32 %v1085_v26, %v690_v28  ;;  %v664_v3 = vld [vmem:[#allocation2 + $0x16a] ss:$2 sm:$0xff] }
  0x41   : > { %v740_v57 = vmax.f32 %v739_v42, %v677_v38  ;;  %v717_v58 = vadd.f32 %v1092_v48, %v703_v46  ;;  %v744_v59 = vmax.f32 %v677_v38, %v678_v45  ;;  %v662_v61 = vld [vmem:[#allocation2 + $0x152] ss:$2 sm:$0xff]  ;;  %v631_v0 = vmax.f32 %v579_v41, %v613_v49  ;;  %v666_v4 = vld [vmem:[#allocation2 + $0x182] ss:$2 sm:$0xff] }
  0x42   : > { %839 = vst [vmem:[%s1105_s13 + $0x18] sm:$0xff] %v736_v51  ;;  %v680_v63 = vmax.f32 %v629_v53, %v660_v60  ;;  %v681_v22 = vmax.f32 %v630_v54, %v662_v61  ;;  %v632_v44 = vmax.f32 %v581_v47, %v615_v50  ;;  %v705_v5 = vmul.f32 %v1085_v26, %v691_v55 }
  0x43   : > { %v741_v1 = vadd.f32 %v740_v57, %v716_v56  ;;  %v745_v2 = vmax.f32 %v744_v59, %v679_v52  ;;  %v718_v6 = vadd.f32 %v1092_v48, %v704_v62  ;;  %v682_v9 = vmax.f32 %v631_v0, %v664_v3 }
  0x44   : > { %v749_v7 = vmax.f32 %v679_v52, %v680_v63  ;;  %v683_v12 = vmax.f32 %v632_v44, %v666_v4  ;;  %v719_v13 = vadd.f32 %v1092_v48, %v705_v5 }
  0x45   : > { %840 = vst [vmem:[%s1105_s13 + $0x20] sm:$0xff] %v741_v1  ;;  %v746_v10 = vadd.f32 %v745_v2, %v717_v58  ;;  %v754_v14 = vmax.f32 %v681_v22, %v682_v9 }
  0x46   : > { %v750_v11 = vmax.f32 %v749_v7, %v681_v22 }
  0x47   : > { %841 = vst [vmem:[%s1105_s13 + $0x28] sm:$0xff] %v746_v10  ;;  %v755_v16 = vmax.f32 %v754_v14, %v683_v12 }
  0x48   : > { %v751_v15 = vadd.f32 %v750_v11, %v718_v6 }
  0x49   : > { %v756_v17 = vadd.f32 %v755_v16, %v719_v13 }
  0x4a   : > { %842 = vst [vmem:[%s1105_s13 + $0x30] sm:$0xff] %v751_v15 }
  0x4b   : > { %843 = vst [vmem:[%s1105_s13 + $0x38] sm:$0xff] %v756_v17 }
  0x4c PF: > { %s18_s27 = sadd.s32 1, %s868_s27  }
  0x4d   : > { %p15_p4 = scmp.ge.s32.totalorder %s18_s27, 4  }
  0x4f   :  { %17 = sbr.rel (!%p15_p4) target bundleno = 1 (0x1), region = 143 }

// kernel: layer_block_pallas.2
= control target key start
LH: loop header
LB: loop body
LE: loop exit
PB: predicated region body
PF: predicated region fallthrough
CT: control target
= control target key end

     0   :  { %s6916_s30 = smov 0   ;;  %s8908_s0 = inlined_call_operand.vmem [shape: bf16[2,18,18,4], index: 0, kind: input, shape index: {}]   ;;  %s8909_s1 = inlined_call_operand.vmem [shape: bf16[9,4,128], index: 1, kind: input, shape index: {}]   ;;  %s8910_s2 = inlined_call_operand.vmem [shape: f32[1,128], index: 2, kind: input, shape index: {}]   ;;  %s8911_s3 = inlined_call_operand.vmem [shape: bf16[2,64,4], index: 3, kind: input, shape index: {}]   ;;  %s8912_s4 = inlined_call_operand.vmem [shape: bf16[4,128], index: 4, kind: input, shape index: {}]   ;;  %s8913_s5 = inlined_call_operand.vmem [shape: f32[1,128], index: 5, kind: input, shape index: {}]   ;;  %s8914_s6 = inlined_call_operand.vmem [shape: f32[2,16,16,128], index: 6, kind: output, shape index: {0}]   ;;  %s8915_s7 = inlined_call_operand.vmem [shape: f32[2,2,128], index: 7, kind: output, shape index: {1}]   ;;  %s8916_s8 = inlined_call_operand.vmem [shape: f32[2,64,128], index: 8, kind: output, shape index: {2}]   ;;  %s8917_s9 = inlined_call_operand.vmem [shape: f32[2,2,128], index: 9, kind: output, shape index: {3}]  }
   0x1 LB: > { %s5448_s10 = sadd.s32 4294967295, %s6864_s30   ;;  %p5452_p0 = scmp.ge.s32.totalorder %s6864_s30, 1  ;;  %s6864_s30 = sphi %s6916_s30, %s20_s30  }
   0x2   : > { %p304_p1 = scmp.lt.s32.totalorder %s6864_s30, 3 }
   0x4   : > { %p305_p2 = pnand %p5452_p0, %p304_p1 }
   0x6   : > { %308 = sbr.rel (%p305_p2) target bundleno = 621 (0x26d), region = 44 }
   0xd   : > { %vm922_vm0 = vcmask 1041408   ;;  %v5689_v0 = vld [vmem:[%s8909_s1 + $0x8] sm:$0x3]  ;;  %v5462_v1 = vld [vmem:[%s8909_s1 + $0x2] sm:$0x3]  ;;  %p358_p3 = scmp.lt.s32.totalorder %s5448_s10, 1 }
   0xe   : > { %6749 = vmatprep.subr.msk.bf16.mxu0 %vm922_vm0, %v5689_v0  ;;  %6745 = vmatprep.subr.msk.bf16.mxu1 %vm922_vm0, %v5462_v1  ;;  %v6933_v2 = vsel %vm922_vm0, %v5689_v0, 0  ;;  %v924_v3 = vsel %vm922_vm0, %v5462_v1, 0  ;;  %v5754_v4 = vld [vmem:[%s8909_s1 + $0xa] sm:$0x3]  ;;  %v419_v5 = vld [vmem:[%s8909_s1] sm:$0x3] }
   0xf   : > { %8940 = vst [vmem:[#allocation2_spill] sm:$0xff] %v6933_v2  ;;  %6308 = vmatpush3.bf16.msra.mxu0 %v6933_v2  ;;  %6172 = vmatpush3.bf16.msra.mxu1 %v924_v3  ;;  %s9015_s10 = smov (!%p358_p3, %s5448_s10), 1  ;;  %vm436_vm1 = vsmask.f32 3328  ;;  %vm437_vm2 = vsmask.f32 7440 }
  0x10   : > { %6751 = vmatprep.subr.msk.bf16.mxu0 %vm922_vm0, %v5754_v4  ;;  %6746 = vmatprep.subr.msk.bf16.mxu1 %vm922_vm0, %v419_v5  ;;  %s6756_s19 = smul.u32 216, %s9015_s10  ;;  %vm873_vm3 = vcmask 31744   ;;  %v6964_v17 = vsel %vm922_vm0, %v5754_v4, 0  ;;  %v6970_v26 = vld [vmem:[%s8909_s1 + $0xc] sm:$0x3]  ;;  %vm6977_vm4 = vmor %vm436_vm1, %vm437_vm2  ;;  %v6983_v37 = vsel %vm922_vm0, %v419_v5, 0 }
  0x11   : > { %v6987_v41 = vsel %vm922_vm0, %v6970_v26, 0  ;;  %vm1427_vm5 = vcmask 1042432   ;;  %vm1428_vm6 = vcmask 1046532   ;;  %s6010_s16 = sshll.u32 %s9015_s10, 5  ;;  %s6012_s28 = sshll.u32 %s9015_s10, 6  ;;  %vm5123_vm8 = vcmask 1040384  }
  0x12   : > { %s6951_s22 = scalar_lea.vmem %s8908_s0, %s6756_s19  ;;  %vm7264_vm7 = vmor %vm1427_vm5, %vm1428_vm6  ;;  %s7994_s19 = scalar_lea.vmem %s8911_s3, %s6010_s16 }
  0x13   : > { %v387_v6 = vld [vmem:[%s6951_s22] sm:$0xf]  ;;  %v388_v7 = vld [vmem:[%s6951_s22 + $0x4] sm:$0xf]  ;;  %v420_v8 = vld [vmem:[%s6951_s22 + $0x8] sm:$0x1]  ;;  %s8857_s14 = scalar_lea.vmem %s8916_s8, %s6012_s28 }
  0x14   : > { %v440_v9 = vshrl.u32 %v387_v6, 16  ;;  %v443_v10 = vshll.u32 %v387_v6, 16  ;;  %v449_v11 = vshll.u32 %v388_v7, 16  ;;  %v453_v12 = vshrl.u32 %v388_v7, 16  ;;  %v5641_v13 = vld [vmem:[%s6951_s22 + $0xc] sm:$0xf] }
  0x15   : > { %v459_v14 = vshll.u32 %v420_v8, 16  ;;  %v6958_v15 = vld [vmem:[%s6951_s22 + $0x10] sm:$0xf]  ;;  %v6961_v16 = vld [vmem:[%s6951_s22 + $0x14] sm:$0x1]  ;;  %v2244_v23 = vshrl.u32 %v5641_v13, 16 }
  0x16   : > { %v442_v18 = vrot.slane %v440_v9, 4  ;;  %v445_v19 = vrot.slane %v443_v10, 5  ;;  %v451_v20 = vrot.slane %v449_v11, 5  ;;  %v455_v21 = vrot.slane %v453_v12, 4  ;;  %v389_v31 = vld [vmem:[%s6951_s22 + $0xc] sm:$0xf] }
  0x17   : > { %v461_v22 = vrot.slane %v459_v14, 5  ;;  %v2247_v24 = vshll.u32 %v5641_v13, 16  ;;  %v2253_v25 = vshll.u32 %v6958_v15, 16  ;;  %v2257_v29 = vshrl.u32 %v6958_v15, 16  ;;  %v390_v36 = vld [vmem:[%s6951_s22 + $0x10] sm:$0xf] }
  0x18   : > { %v446_v27 = vor.u32 %v445_v19, %v442_v18  ;;  %v456_v28 = vor.u32 %v455_v21, %v451_v20  ;;  %v2263_v30 = vshll.u32 %v6961_v16, 16  ;;  %v2246_v33 = vrot.slane %v2244_v23, 4  ;;  %v421_v44 = vld [vmem:[%s6951_s22 + $0x14] sm:$0x1]  ;;  %v5644_v55 = vld [vmem:[%s6951_s22 + $0x18] sm:$0xf] }
  0x19   : > { %v2249_v34 = vrot.slane %v2247_v24, 5  ;;  %v2255_v35 = vrot.slane %v2253_v25, 5  ;;  %v2259_v40 = vrot.slane %v2257_v29, 4  ;;  %v464_v45 = vshrl.u32 %v389_v31, 16  ;;  %v6996_v60 = vld [vmem:[%s6951_s22 + $0x1c] sm:$0xf] }
  0x1a   : > { %v447_v38 = vrot.slane %v446_v27, 4  ;;  %v457_v39 = vrot.slane %v456_v28, 4  ;;  %v2265_v43 = vrot.slane %v2263_v30, 5  ;;  %v467_v46 = vshll.u32 %v389_v31, 16  ;;  %v7004_v1 = vld [vmem:[%s6951_s22 + $0x20] sm:$0x1] }
  0x1b   : > { %v2250_v42 = vor.u32 %v2249_v34, %v2246_v33  ;;  %v2260_v49 = vor.u32 %v2259_v40, %v2255_v35  ;;  %v473_v50 = vshll.u32 %v390_v36, 16  ;;  %v466_v53 = vrot.slane %v464_v45, 4  ;;  %v391_v18 = vld [vmem:[%s6951_s22 + $0x18] sm:$0xf]  ;;  %v392_v23 = vld [vmem:[%s6951_s22 + $0x1c] sm:$0xf] }
  0x1c   : > { %v452_v47 = vsel %vm6977_vm4, %v447_v38, %v451_v20  ;;  %v462_v48 = vsel %vm6977_vm4, %v457_v39, %v461_v22  ;;  %v469_v54 = vrot.slane %v467_v46, 5  ;;  %v477_v58 = vshrl.u32 %v390_v36, 16  ;;  %v422_v31 = vld [vmem:[%s6951_s22 + $0x20] sm:$0x1]  ;;  %v5647_v40 = vld [vmem:[%s6951_s22 + $0x24] sm:$0xf] }
  0x1d   : > { %v5463_v51 = vcombine.low %v452_v47, %v462_v48  ;;  %v2251_v52 = vrot.slane %v2250_v42, 4  ;;  %v2261_v56 = vrot.slane %v2260_v49, 4  ;;  %v475_v57 = vrot.slane %v473_v50, 5  ;;  %v7027_v46 = vld [vmem:[%s6951_s22 + $0x28] sm:$0xf]  ;;  %v6816_v32 = vld [vmem:[%s7994_s19 + $0x18] sm:$0xff]  }
  0x1e   : > { %v483_v59 = vshll.u32 %v421_v44, 16  ;;  %v2987_v62 = vrot.slane %v6958_v15, 5  ;;  %v2990_v63 = vrot.slane %v6961_v16, 5  ;;  %v470_v0 = vor.u32 %v469_v54, %v466_v53  ;;  %v7033_v53 = vld [vmem:[%s6951_s22 + $0x2c] sm:$0x1]  ;;  %s5458_s15 = sshll.u32 %s9015_s10, 1 }
  0x1f   : > { %6173 = vmatprep.mubr.msk.bf16.mxu1 %vm873_vm3, %v5463_v51  ;;  %v2256_v61 = vsel %vm6977_vm4, %v2251_v52, %v2255_v35  ;;  %v2266_v3 = vsel %vm6977_vm4, %v2261_v56, %v2265_v43  ;;  %v479_v4 = vrot.slane %v477_v58, 4  ;;  %v2268_v6 = vshrl.u32 %v5644_v55, 16  ;;  %s385_s18 = scalar_lea.vmem %s8917_s9, %s5458_s15  ;;  %s376_s21 = scalar_lea.vmem %s8915_s7, %s5458_s15 }
  0x20   : > { %v485_v5 = vrot.slane %v483_v59, 5  ;;  %v5690_v7 = vcombine.low %v2256_v61, %v2266_v3  ;;  %v471_v8 = vrot.slane %v470_v0, 4  ;;  %v2271_v9 = vshll.u32 %v5644_v55, 16  ;;  %v393_v61 = vld [vmem:[%s6951_s22 + $0x24] sm:$0xf] }
  0x21   : > { %v2277_v10 = vshll.u32 %v6996_v60, 16  ;;  %v480_v11 = vor.u32 %v479_v4, %v475_v57  ;;  %v2270_v12 = vrot.slane %v2268_v6, 4  ;;  %v2281_v13 = vshrl.u32 %v6996_v60, 16  ;;  %v394_v6 = vld [vmem:[%s6951_s22 + $0x28] sm:$0xf] }
  0x22   : > { %v2287_v14 = vshll.u32 %v7004_v1, 16  ;;  %6309 = vmatprep.mubr.msk.bf16.mxu0 %vm873_vm3, %v5690_v7  ;;  %v476_v19 = vsel %vm6977_vm4, %v471_v8, %v475_v57  ;;  %v2273_v20 = vrot.slane %v2271_v9, 5  ;;  %v2994_v22 = vrot.slane %v6996_v60, 5 }
  0x23   : > { %v2279_v21 = vrot.slane %v2277_v10, 5  ;;  %v481_v24 = vrot.slane %v480_v11, 4  ;;  %v2283_v25 = vrot.slane %v2281_v13, 4  ;;  %v2997_v28 = vrot.slane %v7004_v1, 5 }
  0x24   : > { %v2289_v27 = vrot.slane %v2287_v14, 5  ;;  %v2274_v29 = vor.u32 %v2273_v20, %v2270_v12  ;;  %v7020_v30 = vrot.slane %v2994_v22, 4  ;;  %v488_v33 = vshrl.u32 %v391_v18, 16  ;;  %v423_v12 = vld [vmem:[%s6951_s22 + $0x2c] sm:$0x1] }
  0x25   : > { %v491_v34 = vshll.u32 %v391_v18, 16  ;;  %v486_v35 = vsel %vm6977_vm4, %v481_v24, %v485_v5  ;;  %v2284_v36 = vor.u32 %v2283_v25, %v2279_v21  ;;  %v497_v38 = vshll.u32 %v392_v23, 16 }
  0x26   : > { %v501_v39 = vshrl.u32 %v392_v23, 16  ;;  %v5464_v42 = vcombine.low %v476_v19, %v486_v35  ;;  %v2275_v43 = vrot.slane %v2274_v29, 4  ;;  %v490_v44 = vrot.slane %v488_v33, 4  ;;  %v5650_v23 = vld [vmem:[%s6951_s22 + $0x30] sm:$0xf] }
  0x27   : > { %v493_v45 = vrot.slane %v491_v34, 5  ;;  %v2285_v47 = vrot.slane %v2284_v36, 4  ;;  %v499_v48 = vrot.slane %v497_v38, 5  ;;  %v507_v50 = vshll.u32 %v422_v31, 16  ;;  %v7052_v31 = vld [vmem:[%s6951_s22 + $0x34] sm:$0xf] }
  0x28   : > { %v503_v49 = vrot.slane %v501_v39, 4  ;;  %6174 = vmatmul.mubr.msk.bf16.vlgmr.msra.gmra.mrb[0].mxu1 %vm873_vm3, %v5464_v42  ;;  %v2280_v51 = vsel %vm6977_vm4, %v2275_v43, %v2279_v21  ;;  %v2292_v54 = vshrl.u32 %v5647_v40, 16  ;;  %v2295_v55 = vshll.u32 %v5647_v40, 16  ;;  %v7060_v39 = vld [vmem:[%s6951_s22 + $0x38] sm:$0x1] }
  0x29   : > { %v494_v52 = vor.u32 %v493_v45, %v490_v44  ;;  %v2290_v56 = vsel %vm6977_vm4, %v2285_v47, %v2289_v27  ;;  %6206 = vmatpush3.bf16.msra.mxu1 %v6983_v37  ;;  %v509_v58 = vrot.slane %v507_v50, 5  ;;  %v2301_v59 = vshll.u32 %v7027_v46, 16 }
  0x2a   : > { %v504_v57 = vor.u32 %v503_v49, %v499_v48  ;;  %v5691_v0 = vcombine.low %v2280_v51, %v2290_v56  ;;  %v2294_v4 = vrot.slane %v2292_v54, 4  ;;  %v2297_v5 = vrot.slane %v2295_v55, 5  ;;  %v395_v51 = vld [vmem:[%s6951_s22 + $0x30] sm:$0xf] }
  0x2b   : > { %v495_v3 = vrot.slane %v494_v52, 4  ;;  %v2303_v8 = vrot.slane %v2301_v59, 5  ;;  %v2305_v9 = vshrl.u32 %v7027_v46, 16  ;;  %v2311_v10 = vshll.u32 %v7033_v53, 16 }
  0x2c   : > { %v505_v7 = vrot.slane %v504_v57, 4  ;;  %6310 = vmatmul.mubr.msk.bf16.vlgmr.msra.gmra.mrb[0].mxu0 %vm873_vm3, %v5691_v0  ;;  %v2298_v11 = vor.u32 %v2297_v5, %v2294_v4  ;;  %v512_v13 = vshrl.u32 %v393_v61, 16  ;;  %v515_v14 = vshll.u32 %v393_v61, 16  ;;  %v396_v57 = vld [vmem:[%s6951_s22 + $0x34] sm:$0xf] }
  0x2d   : > { %v500_v37 = vsel %vm6977_vm4, %v495_v3, %v499_v48  ;;  %6342 = vmatpush3.bf16.msra.mxu0 %v6964_v17  ;;  %v2307_v19 = vrot.slane %v2305_v9, 4  ;;  %v2313_v20 = vrot.slane %v2311_v10, 5  ;;  %v521_v21 = vshll.u32 %v394_v6, 16  ;;  %v424_v3 = vld [vmem:[%s6951_s22 + $0x38] sm:$0x1] }
  0x2e   : > { %v510_v18 = vsel %vm6977_vm4, %v505_v7, %v509_v58  ;;  %v2299_v25 = vrot.slane %v2298_v11, 4  ;;  %v514_v27 = vrot.slane %v512_v13, 4  ;;  %v517_v29 = vrot.slane %v515_v14, 5  ;;  %6752 = vmatprep.subr.msk.bf16.mxu0 %vm922_vm0, %v6970_v26  ;;  %v5653_v11 = vld [vmem:[%s6951_s22 + $0x3c] sm:$0xf] }
  0x2f   : > { %v5465_v24 = vcombine.low %v500_v37, %v510_v18  ;;  %v2308_v33 = vor.u32 %v2307_v19, %v2303_v8  ;;  %v523_v34 = vrot.slane %v521_v21, 5  ;;  %v525_v17 = vshrl.u32 %v394_v6, 16  ;;  %v7077_v19 = vld [vmem:[%s6951_s22 + $0x40] sm:$0xf] }
  0x30   : > { %v531_v35 = vshll.u32 %v423_v12, 16  ;;  %v2304_v36 = vsel %vm6977_vm4, %v2299_v25, %v2303_v8  ;;  %v518_v38 = vor.u32 %v517_v29, %v514_v27  ;;  %v2316_v40 = vshrl.u32 %v5650_v23, 16 }
  0x31   : > { %6177 = vmatprep.mubr.msk.bf16.mxu1 %vm873_vm3, %v5465_v24  ;;  %v2319_v42 = vshll.u32 %v5650_v23, 16  ;;  %v2309_v43 = vrot.slane %v2308_v33, 4  ;;  %v527_v44 = vrot.slane %v525_v17, 4  ;;  %v2325_v26 = vshll.u32 %v7052_v31, 16  ;;  %v7082_v33 = vld [vmem:[%s6951_s22 + $0x44] sm:$0x1] }
  0x32   : > { %v533_v45 = vrot.slane %v531_v35, 5  ;;  %v519_v47 = vrot.slane %v518_v38, 4  ;;  %v2318_v48 = vrot.slane %v2316_v40, 4  ;;  %v2329_v50 = vshrl.u32 %v7052_v31, 16  ;;  %v397_v40 = vld [vmem:[%s6951_s22 + $0x3c] sm:$0xf] }
  0x33   : > { %v2321_v49 = vrot.slane %v2319_v42, 5  ;;  %v2314_v52 = vsel %vm6977_vm4, %v2309_v43, %v2313_v20  ;;  %v528_v54 = vor.u32 %v527_v44, %v523_v34  ;;  %v2327_v55 = vrot.slane %v2325_v26, 5  ;;  %v398_v26 = vld [vmem:[%s6951_s22 + $0x40] sm:$0xf] }
  0x34   : > { %v2335_v56 = vshll.u32 %v7060_v39, 16  ;;  %v5692_v58 = vcombine.low %v2304_v36, %v2314_v52  ;;  %v524_v59 = vsel %vm6977_vm4, %v519_v47, %v523_v34  ;;  %v2331_v0 = vrot.slane %v2329_v50, 4 }
  0x35   : > { %v2322_v61 = vor.u32 %v2321_v49, %v2318_v48  ;;  %v529_v4 = vrot.slane %v528_v54, 4  ;;  %v536_v6 = vshrl.u32 %v395_v51, 16  ;;  %v539_v7 = vshll.u32 %v395_v51, 16 }
  0x36   : > { %v2337_v5 = vrot.slane %v2335_v56, 5  ;;  %6313 = vmatprep.mubr.msk.bf16.mxu0 %vm873_vm3, %v5692_v58  ;;  %v2332_v9 = vor.u32 %v2331_v0, %v2327_v55  ;;  %v545_v10 = vshll.u32 %v396_v57, 16  ;;  %v549_v37 = vshrl.u32 %v396_v57, 16  ;;  %v5656_v0 = vld [vmem:[%s6951_s22 + $0x48] sm:$0xf] }
  0x37   : > { %v2323_v8 = vrot.slane %v2322_v61, 4  ;;  %v534_v12 = vsel %vm6977_vm4, %v529_v4, %v533_v45  ;;  %v538_v13 = vrot.slane %v536_v6, 4  ;;  %v541_v14 = vrot.slane %v539_v7, 5  ;;  %v7100_v7 = vld [vmem:[%s6951_s22 + $0x4c] sm:$0xf] }
  0x38   : > { %v555_v18 = vshll.u32 %v424_v3, 16  ;;  %v5466_v20 = vcombine.low %v524_v59, %v534_v12  ;;  %v2333_v23 = vrot.slane %v2332_v9, 4  ;;  %v547_v24 = vrot.slane %v545_v10, 5  ;;  %v425_v59 = vld [vmem:[%s6951_s22 + $0x44] sm:$0x1] }
  0x39   : > { %v2328_v21 = vsel %vm6977_vm4, %v2323_v8, %v2327_v55  ;;  %v542_v25 = vor.u32 %v541_v14, %v538_v13  ;;  %v551_v27 = vrot.slane %v549_v37, 4  ;;  %v2340_v34 = vshrl.u32 %v5653_v11, 16 }
  0x3a   : > { %v557_v29 = vrot.slane %v555_v18, 5  ;;  %6178 = vmatmul.mubr.msk.bf16.gmra.mrb[4].mxu1 %vm873_vm3, %v5466_v20  ;;  %v2338_v17 = vsel %vm6977_vm4, %v2333_v23, %v2337_v5  ;;  %v2343_v35 = vshll.u32 %v5653_v11, 16  ;;  %v2349_v36 = vshll.u32 %v7077_v19, 16 }
  0x3b   : > { %v2353_v38 = vshrl.u32 %v7077_v19, 16  ;;  %v5693_v42 = vcombine.low %v2328_v21, %v2338_v17  ;;  %v543_v43 = vrot.slane %v542_v25, 4  ;;  %v552_v44 = vor.u32 %v551_v27, %v547_v24  ;;  %v7108_v21 = vld [vmem:[%s6951_s22 + $0x50] sm:$0x1]  ;;  %v399_v25 = vld [vmem:[%s6951_s22 + $0x48] sm:$0xf] }
  0x3c   : > { %v2342_v45 = vrot.slane %v2340_v34, 4  ;;  %v2345_v47 = vrot.slane %v2343_v35, 5  ;;  %v2351_v48 = vrot.slane %v2349_v36, 5  ;;  %v2359_v50 = vshll.u32 %v7082_v33, 16  ;;  %v7113_v35 = vld [vmem:[%s6951_s22 + $0x4c] sm:$0xf] }
  0x3d   : > { %v2355_v49 = vrot.slane %v2353_v38, 4  ;;  %6314 = vmatmul.mubr.msk.bf16.gmra.mrb[4].mxu0 %vm873_vm3, %v5693_v42  ;;  %v548_v51 = vsel %vm6977_vm4, %v543_v43, %v547_v24  ;;  %v553_v52 = vrot.slane %v552_v44, 4  ;;  %v560_v54 = vshrl.u32 %v397_v40, 16 }
  0x3e   : > { %v563_v55 = vshll.u32 %v397_v40, 16  ;;  %v2346_v56 = vor.u32 %v2345_v47, %v2342_v45  ;;  %v2361_v58 = vrot.slane %v2359_v50, 5  ;;  %v569_v61 = vshll.u32 %v398_v26, 16 }
  0x3f   : > { %v2356_v57 = vor.u32 %v2355_v49, %v2351_v48  ;;  %v558_v3 = vsel %vm6977_vm4, %v553_v52, %v557_v29  ;;  %v562_v4 = vrot.slane %v560_v54, 4  ;;  %v573_v6 = vshrl.u32 %v398_v26, 16  ;;  %v426_v26 = vld [vmem:[%s6951_s22 + $0x50] sm:$0x1]  ;;  %v5659_v52 = vld [vmem:[%s6951_s22 + $0x54] sm:$0xf] }
  0x40   : > { %v565_v5 = vrot.slane %v563_v55, 5  ;;  %v5467_v8 = vcombine.low %v548_v51, %v558_v3  ;;  %v2347_v9 = vrot.slane %v2346_v56, 4  ;;  %v571_v37 = vrot.slane %v569_v61, 5  ;;  %v7127_v3 = vld [vmem:[%s6951_s22 + $0x58] sm:$0xf] }
  0x41   : > { %v2357_v10 = vrot.slane %v2356_v57, 4  ;;  %v575_v12 = vrot.slane %v573_v6, 4  ;;  %v579_v13 = vshll.u32 %v425_v59, 16  ;;  %v2364_v14 = vshrl.u32 %v5656_v0, 16 }
  0x42   : > { %v566_v11 = vor.u32 %v565_v5, %v562_v4  ;;  %6181 = vmatprep.mubr.msk.bf16.mxu1 %vm873_vm3, %v5467_v8  ;;  %v2352_v18 = vsel %vm6977_vm4, %v2347_v9, %v2351_v48  ;;  %v2367_v23 = vshll.u32 %v5656_v0, 16  ;;  %v2373_v24 = vshll.u32 %v7100_v7, 16 }
  0x43   : > { %v2362_v20 = vsel %vm6977_vm4, %v2357_v10, %v2361_v58  ;;  %v576_v34 = vor.u32 %v575_v12, %v571_v37  ;;  %v581_v17 = vrot.slane %v579_v13, 5  ;;  %v2366_v36 = vrot.slane %v2364_v14, 4 }
  0x44   : > { %v5694_v27 = vcombine.low %v2352_v18, %v2362_v20  ;;  %v567_v29 = vrot.slane %v566_v11, 4  ;;  %v2369_v38 = vrot.slane %v2367_v23, 5  ;;  %v2375_v40 = vrot.slane %v2373_v24, 5  ;;  %v7133_v11 = vld [vmem:[%s6951_s22 + $0x5c] sm:$0x1] }
  0x45   : > { %v2377_v42 = vshrl.u32 %v7100_v7, 16  ;;  %v577_v44 = vrot.slane %v576_v34, 4  ;;  %v2383_v45 = vshll.u32 %v7108_v21, 16  ;;  %v584_v47 = vshrl.u32 %v399_v25, 16  ;;  %v7137_v23 = vld [vmem:[%s6951_s22 + $0x54] sm:$0xf] }
  0x46   : > { %6317 = vmatprep.mubr.msk.bf16.mxu0 %vm873_vm3, %v5694_v27  ;;  %v572_v43 = vsel %vm6977_vm4, %v567_v29, %v571_v37  ;;  %v2370_v48 = vor.u32 %v2369_v38, %v2366_v36  ;;  %v587_v50 = vshll.u32 %v399_v25, 16  ;;  %v593_v51 = vshll.u32 %v7113_v35, 16  ;;  %v7143_v34 = vld [vmem:[%s6951_s22 + $0x58] sm:$0xf] }
  0x47   : > { %v2379_v49 = vrot.slane %v2377_v42, 4  ;;  %v582_v54 = vsel %vm6977_vm4, %v577_v44, %v581_v17  ;;  %v2385_v55 = vrot.slane %v2383_v45, 5  ;;  %v586_v56 = vrot.slane %v584_v47, 4  ;;  %v427_v45 = vld [vmem:[%s6951_s22 + $0x5c] sm:$0x1] }
  0x48   : > { %v597_v57 = vshrl.u32 %v7113_v35, 16  ;;  %v5468_v58 = vcombine.low %v572_v43, %v582_v54  ;;  %v2371_v59 = vrot.slane %v2370_v48, 4  ;;  %v589_v0 = vrot.slane %v587_v50, 5 }
  0x49   : > { %v2380_v61 = vor.u32 %v2379_v49, %v2375_v40  ;;  %v595_v4 = vrot.slane %v593_v51, 5  ;;  %v603_v6 = vshll.u32 %v426_v26, 16  ;;  %v2388_v8 = vshrl.u32 %v5659_v52, 16  ;;  %v5662_v51 = vld [vmem:[%s6951_s22 + $0x60] sm:$0xf] }
  0x4a   : > { %v599_v5 = vrot.slane %v597_v57, 4  ;;  %6182 = vmatmul.mubr.msk.bf16.gmra.mrb[8].mxu1 %vm873_vm3, %v5468_v58  ;;  %v2376_v9 = vsel %vm6977_vm4, %v2371_v59, %v2375_v40  ;;  %v590_v37 = vor.u32 %v589_v0, %v586_v56  ;;  %v2391_v12 = vshll.u32 %v5659_v52, 16  ;;  %v7157_v57 = vld [vmem:[%s6951_s22 + $0x64] sm:$0xf] }
  0x4b   : > { %v2381_v10 = vrot.slane %v2380_v61, 4  ;;  %v605_v14 = vrot.slane %v603_v6, 5  ;;  %v2390_v18 = vrot.slane %v2388_v8, 4  ;;  %v2397_v20 = vshll.u32 %v7127_v3, 16 }
  0x4c   : > { %v600_v13 = vor.u32 %v599_v5, %v595_v4  ;;  %v591_v25 = vrot.slane %v590_v37, 4  ;;  %v2393_v27 = vrot.slane %v2391_v12, 5  ;;  %v2401_v29 = vshrl.u32 %v7127_v3, 16 }
  0x4d   : > { %v2386_v24 = vsel %vm6977_vm4, %v2381_v10, %v2385_v55  ;;  %v2399_v38 = vrot.slane %v2397_v20, 5  ;;  %v2407_v40 = vshll.u32 %v7133_v11, 16  ;;  %v608_v26 = vshrl.u32 %v7137_v23, 16  ;;  %v7169_v10 = vld [vmem:[%s8909_s1 + $0x4] sm:$0x3] }
  0x4e   : > { %v5695_v17 = vcombine.low %v2376_v9, %v2386_v24  ;;  %v601_v36 = vrot.slane %v600_v13, 4  ;;  %v596_v42 = vsel %vm6977_vm4, %v591_v25, %v595_v4  ;;  %v2394_v43 = vor.u32 %v2393_v27, %v2390_v18  ;;  %v7161_v4 = vld [vmem:[%s6951_s22 + $0x68] sm:$0x1]  ;;  %v7173_v18 = vld [vmem:[%s6951_s22 + $0x60] sm:$0xf]  ;;  %6747 = vmatprep.subr.msk.bf16.mxu1 %vm922_vm0, %v7169_v10 }
  0x4f   : > { %v2403_v44 = vrot.slane %v2401_v29, 4  ;;  %v2409_v48 = vrot.slane %v2407_v40, 5  ;;  %v611_v49 = vshll.u32 %v7137_v23, 16  ;;  %v617_v50 = vshll.u32 %v7143_v34, 16  ;;  %v7181_v29 = vld [vmem:[%s6951_s22 + $0x64] sm:$0xf] }
  0x50   : > { %6318 = vmatmul.mubr.msk.bf16.gmra.mrb[8].mxu0 %vm873_vm3, %v5695_v17  ;;  %v606_v47 = vsel %vm6977_vm4, %v601_v36, %v605_v14  ;;  %v2395_v54 = vrot.slane %v2394_v43, 4  ;;  %v610_v56 = vrot.slane %v608_v26, 4  ;;  %v621_v61 = vshrl.u32 %v7143_v34, 16 }
  0x51   : > { %v5469_v52 = vcombine.low %v596_v42, %v606_v47  ;;  %v2404_v55 = vor.u32 %v2403_v44, %v2399_v38  ;;  %v613_v58 = vrot.slane %v611_v49, 5  ;;  %v619_v59 = vrot.slane %v617_v50, 5 }
  0x52   : > { %v627_v0 = vshll.u32 %v427_v45, 16  ;;  %v2400_v5 = vsel %vm6977_vm4, %v2395_v54, %v2399_v38  ;;  %v2412_v8 = vshrl.u32 %v5662_v51, 16  ;;  %v2415_v9 = vshll.u32 %v5662_v51, 16 }
  0x53   : > { %6185 = vmatprep.mubr.msk.bf16.mxu1 %vm873_vm3, %v5469_v52  ;;  %v2405_v6 = vrot.slane %v2404_v55, 4  ;;  %v614_v37 = vor.u32 %v613_v58, %v610_v56  ;;  %v623_v12 = vrot.slane %v621_v61, 4  ;;  %v2421_v14 = vshll.u32 %v7157_v57, 16  ;;  %v5665_v56 = vld [vmem:[%s6951_s22 + $0x6c] sm:$0xf] }
  0x54   : > { %v629_v13 = vrot.slane %v627_v0, 5  ;;  %v2414_v24 = vrot.slane %v2412_v8, 4  ;;  %v2417_v25 = vrot.slane %v2415_v9, 5  ;;  %v2425_v27 = vshrl.u32 %v7157_v57, 16 }
  0x55   : > { %v2410_v20 = vsel %vm6977_vm4, %v2405_v6, %v2409_v48  ;;  %v615_v36 = vrot.slane %v614_v37, 4  ;;  %v624_v38 = vor.u32 %v623_v12, %v619_v59  ;;  %v2423_v40 = vrot.slane %v2421_v14, 5  ;;  %v428_v48 = vld [vmem:[%s6951_s22 + $0x68] sm:$0x1] }
  0x56   : > { %v5696_v17 = vcombine.low %v2400_v5, %v2410_v20  ;;  %v2418_v42 = vor.u32 %v2417_v25, %v2414_v24  ;;  %v2427_v43 = vrot.slane %v2425_v27, 4  ;;  %v2431_v44 = vshll.u32 %v7161_v4, 16  ;;  %v7201_v20 = vld [vmem:[%s6951_s22 + $0x74] sm:$0x1] }
  0x57   : > { %v632_v45 = vshrl.u32 %v7173_v18, 16  ;;  %v620_v26 = vsel %vm6977_vm4, %v615_v36, %v619_v59  ;;  %v625_v47 = vrot.slane %v624_v38, 4  ;;  %v635_v49 = vshll.u32 %v7173_v18, 16  ;;  %v7196_v59 = vld [vmem:[%s6951_s22 + $0x70] sm:$0xf] }
  0x58   : > { %6321 = vmatprep.mubr.msk.bf16.mxu0 %vm873_vm3, %v5696_v17  ;;  %v641_v50 = vshll.u32 %v7181_v29, 16  ;;  %v2419_v51 = vrot.slane %v2418_v42, 4  ;;  %v2428_v52 = vor.u32 %v2427_v43, %v2423_v40  ;;  %v2433_v54 = vrot.slane %v2431_v44, 5  ;;  %v7209_v38 = vld [vmem:[%s6951_s22 + $0x6c] sm:$0xf] }
  0x59   : > { %v634_v55 = vrot.slane %v632_v45, 4  ;;  %v630_v58 = vsel %vm6977_vm4, %v625_v47, %v629_v13  ;;  %v637_v61 = vrot.slane %v635_v49, 5  ;;  %v645_v5 = vshrl.u32 %v7181_v29, 16  ;;  %v7212_v45 = vld [vmem:[%s6951_s22 + $0x70] sm:$0xf] }
  0x5a   : > { %v643_v0 = vrot.slane %v641_v50, 5  ;;  %v5470_v6 = vcombine.low %v620_v26, %v630_v58  ;;  %v2424_v8 = vsel %vm6977_vm4, %v2419_v51, %v2423_v40  ;;  %v2429_v9 = vrot.slane %v2428_v52, 4 }
  0x5b   : > { %v651_v37 = vshll.u32 %v428_v48, 16  ;;  %v638_v12 = vor.u32 %v637_v61, %v634_v55  ;;  %v647_v14 = vrot.slane %v645_v5, 4  ;;  %v2436_v24 = vshrl.u32 %v5665_v56, 16  ;;  %v429_v61 = vld [vmem:[%s6951_s22 + $0x74] sm:$0x1] }
  0x5c   : > { %v2439_v13 = vshll.u32 %v5665_v56, 16  ;;  %6186 = vmatmul.mubr.msk.bf16.gmra.mrb[12].mxu1 %vm873_vm3, %v5470_v6  ;;  %v2434_v25 = vsel %vm6977_vm4, %v2429_v9, %v2433_v54  ;;  %v2445_v17 = vshll.u32 %v7196_v59, 16  ;;  %v2449_v36 = vshrl.u32 %v7196_v59, 16  ;;  %v5668_v6 = vld [vmem:[%s6951_s22 + $0x78] sm:$0xf] }
  0x5d   : > { %v653_v27 = vrot.slane %v651_v37, 5  ;;  %v5697_v40 = vcombine.low %v2424_v8, %v2434_v25  ;;  %v639_v42 = vrot.slane %v638_v12, 4  ;;  %v648_v43 = vor.u32 %v647_v14, %v643_v0  ;;  %v7227_v12 = vld [vmem:[%s6951_s22 + $0x7c] sm:$0xf] }
  0x5e   : > { %v2438_v44 = vrot.slane %v2436_v24, 4  ;;  %v2441_v26 = vrot.slane %v2439_v13, 5  ;;  %v2447_v47 = vrot.slane %v2445_v17, 5  ;;  %v2451_v48 = vrot.slane %v2449_v36, 4  ;;  %v7230_v17 = vld [vmem:[%s6951_s22 + $0x80] sm:$0x1] }
  0x5f   : > { %v2455_v49 = vshll.u32 %v7201_v20, 16  ;;  %6322 = vmatmul.mubr.msk.bf16.gmra.mrb[12].mxu0 %vm873_vm3, %v5697_v40  ;;  %v644_v50 = vsel %vm6977_vm4, %v639_v42, %v643_v0  ;;  %v649_v51 = vrot.slane %v648_v43, 4  ;;  %v656_v52 = vshrl.u32 %v7209_v38, 16  ;;  %v7233_v36 = vld [vmem:[%s6951_s22 + $0x78] sm:$0xf] }
  0x60   : > { %v659_v54 = vshll.u32 %v7209_v38, 16  ;;  %v2442_v55 = vor.u32 %v2441_v26, %v2438_v44  ;;  %v2452_v56 = vor.u32 %v2451_v48, %v2447_v47  ;;  %v665_v5 = vshll.u32 %v7212_v45, 16 }
  0x61   : > { %v2457_v58 = vrot.slane %v2455_v49, 5  ;;  %v654_v0 = vsel %vm6977_vm4, %v649_v51, %v653_v27  ;;  %v658_v8 = vrot.slane %v656_v52, 4  ;;  %v669_v37 = vshrl.u32 %v7212_v45, 16 }
  0x62   : > { %v661_v9 = vrot.slane %v659_v54, 5  ;;  %v5471_v14 = vcombine.low %v644_v50, %v654_v0  ;;  %v2443_v24 = vrot.slane %v2442_v55, 4  ;;  %v2453_v13 = vrot.slane %v2452_v56, 4  ;;  %v7242_v50 = vld [vmem:[%s6951_s22 + $0x7c] sm:$0xf] }
  0x63   : > { %v667_v25 = vrot.slane %v665_v5, 5  ;;  %v671_v42 = vrot.slane %v669_v37, 4  ;;  %v675_v43 = vshll.u32 %v429_v61, 16  ;;  %v2460_v27 = vshrl.u32 %v5668_v6, 16 }
  0x64   : > { %v662_v40 = vor.u32 %v661_v9, %v658_v8  ;;  %6189 = vmatprep.mubr.msk.bf16.mxu1 %vm873_vm3, %v5471_v14  ;;  %v2448_v44 = vsel %vm6977_vm4, %v2443_v24, %v2447_v47  ;;  %v2458_v26 = vsel %vm6977_vm4, %v2453_v13, %v2457_v58  ;;  %v2463_v48 = vshll.u32 %v5668_v6, 16  ;;  %v7246_v8 = vld [vmem:[%s6951_s22 + $0x80] sm:$0x1]  ;;  %v5722_v47 = vld [vmem:[%s6951_s22 + $0xc] sm:$0xe] }
  0x65   : > { %v2469_v49 = vshll.u32 %v7227_v12, 16  ;;  %v5698_v51 = vcombine.low %v2448_v44, %v2458_v26  ;;  %v672_v54 = vor.u32 %v671_v42, %v667_v25  ;;  %v677_v55 = vrot.slane %v675_v43, 5  ;;  %v7257_v42 = vld [vmem:[%s6951_s22 + $0x84] sm:$0xf] }
  0x66   : > { %v663_v52 = vrot.slane %v662_v40, 4  ;;  %v2462_v56 = vrot.slane %v2460_v27, 4  ;;  %v2465_v61 = vrot.slane %v2463_v48, 5  ;;  %v2473_v0 = vshrl.u32 %v7227_v12, 16 }
  0x67   : > { %v2471_v5 = vrot.slane %v2469_v49, 5  ;;  %6325 = vmatprep.mubr.msk.bf16.mxu0 %vm873_vm3, %v5698_v51  ;;  %v673_v6 = vrot.slane %v672_v54, 4  ;;  %v2479_v9 = vshll.u32 %v7230_v17, 16  ;;  %v680_v37 = vshrl.u32 %v7233_v36, 16 }
  0x68   : > { %v668_v58 = vsel %vm6977_vm4, %v663_v52, %v667_v25  ;;  %v2466_v14 = vor.u32 %v2465_v61, %v2462_v56  ;;  %v2475_v24 = vrot.slane %v2473_v0, 4  ;;  %v683_v13 = vshll.u32 %v7233_v36, 16  ;;  %v7270_v0 = vld [vmem:[%s6951_s22 + $0x88] sm:$0xf] }
  0x69   : > { %v689_v40 = vshll.u32 %v7242_v50, 16  ;;  %v678_v43 = vsel %vm6977_vm4, %v673_v6, %v677_v55  ;;  %v2481_v27 = vrot.slane %v2479_v9, 5  ;;  %v682_v44 = vrot.slane %v680_v37, 4 }
  0x6a   : > { %v693_v25 = vshrl.u32 %v7242_v50, 16  ;;  %v5472_v26 = vcombine.low %v668_v58, %v678_v43  ;;  %v2467_v48 = vrot.slane %v2466_v14, 4  ;;  %v2476_v49 = vor.u32 %v2475_v24, %v2471_v5  ;;  %v7278_v14 = vld [vmem:[%s6951_s22 + $0x8c] sm:$0x1]  ;;  %v5723_v24 = vld [vmem:[%s6951_s22 + $0x18] sm:$0xe] }
  0x6b   : > { %v685_v51 = vrot.slane %v683_v13, 5  ;;  %v691_v54 = vrot.slane %v689_v40, 5  ;;  %v699_v55 = vshll.u32 %v7246_v8, 16  ;;  %v5738_v61 = vrot.slane %v5722_v47, 9 }
  0x6c   : > { %v695_v56 = vrot.slane %v693_v25, 4  ;;  %6190 = vmatmul.mubr.msk.bf16.gmra.mrb[16].mxu1 %vm873_vm3, %v5472_v26  ;;  %v2472_v58 = vsel %vm6977_vm4, %v2467_v48, %v2471_v5  ;;  %v2477_v6 = vrot.slane %v2476_v49, 4  ;;  %v2989_v37 = vrot.slane %v2987_v62, 4  ;;  %v7294_v48 = vld [vmem:[%s6951_s22 + $0x90] sm:$0xf] }
  0x6d   : > { %v686_v9 = vor.u32 %v685_v51, %v682_v44  ;;  %v701_v40 = vrot.slane %v699_v55, 5  ;;  %v2988_v47 = vsel %vm7264_vm7, %v5738_v61, %v2987_v62  ;;  %v704_v43 = vshrl.u32 %v7257_v42, 16 }
  0x6e   : > { %v696_v13 = vor.u32 %v695_v56, %v691_v54  ;;  %v2482_v5 = vsel %vm6977_vm4, %v2477_v6, %v2481_v27  ;;  %v2991_v25 = vsel %vm7264_vm7, %v2989_v37, %v2990_v63  ;;  %v707_v26 = vshll.u32 %v7257_v42, 16  ;;  %v7297_v56 = vld [vmem:[%s6951_s22 + $0x94] sm:$0xf]  ;;  %v7304_v63 = vld [vmem:[%s6951_s22 + $0x98] sm:$0x1] }
  0x6f   : > { %v687_v44 = vrot.slane %v686_v9, 4  ;;  %v5699_v15 = vcombine.low %v2472_v58, %v2482_v5  ;;  %v5755_v51 = vcombine.low %v2988_v47, %v2991_v25  ;;  %v706_v62 = vrot.slane %v704_v43, 4  ;;  %v5724_v5 = vld [vmem:[%s6951_s22 + $0x24] sm:$0xe] }
  0x70   : > { %v697_v49 = vrot.slane %v696_v13, 4  ;;  %v709_v55 = vrot.slane %v707_v26, 5  ;;  %v713_v16 = vshll.u32 %v7270_v0, 16  ;;  %v717_v61 = vshrl.u32 %v7270_v0, 16 }
  0x71   : > { %v692_v27 = vsel %vm6977_vm4, %v687_v44, %v691_v54  ;;  %6326 = vmatmul.mubr.msk.bf16.gmra.mrb[16].mxu0 %vm873_vm3, %v5699_v15  ;;  %v723_v6 = vshll.u32 %v7278_v14, 16  ;;  %v5739_v9 = vrot.slane %v5723_v24, 9  ;;  %v2998_v54 = vsel %vm7264_vm7, %v7020_v30, %v2997_v28  ;;  %v7326_v15 = vld [vmem:[%s6951_s22 + $0x9c] sm:$0xf] }
  0x72   : > { %v702_v58 = vsel %vm6977_vm4, %v697_v49, %v701_v40  ;;  %6343 = vmatprep.mubr.msk.bf16.mxu0 %vm873_vm3, %v5755_v51  ;;  %v710_v13 = vor.u32 %v709_v55, %v706_v62  ;;  %v715_v47 = vrot.slane %v713_v16, 5  ;;  %v719_v43 = vrot.slane %v717_v61, 4  ;;  %v7331_v62 = vld [vmem:[%s6951_s22 + $0xa0] sm:$0xf] }
  0x73   : > { %v5473_v37 = vcombine.low %v692_v27, %v702_v58  ;;  %v725_v44 = vrot.slane %v723_v6, 5  ;;  %v2995_v24 = vsel %vm7264_vm7, %v5739_v9, %v2994_v22  ;;  %v728_v1 = vshrl.u32 %v7294_v48, 16  ;;  %v7336_v58 = vld [vmem:[%s6951_s22 + $0xa4] sm:$0x1]  ;;  %v7341_v6 = vld [vmem:[%s8909_s1 + $0xe] sm:$0x3] }
  0x74   : > { %v731_v40 = vshll.u32 %v7294_v48, 16  ;;  %v711_v28 = vrot.slane %v710_v13, 4  ;;  %v720_v30 = vor.u32 %v719_v43, %v715_v47  ;;  %v5756_v25 = vcombine.low %v2995_v24, %v2998_v54 }
  0x75   : > { %6193 = vmatprep.mubr.msk.bf16.mxu1 %vm873_vm3, %v5473_v37  ;;  %v737_v26 = vshll.u32 %v7297_v56, 16  ;;  %v730_v49 = vrot.slane %v728_v1, 4  ;;  %v741_v60 = vshrl.u32 %v7297_v56, 16  ;;  %v747_v22 = vshll.u32 %v7304_v63, 16 }
  0x76   : > { %v733_v51 = vrot.slane %v731_v40, 5  ;;  %v716_v27 = vsel %vm6977_vm4, %v711_v28, %v715_v47  ;;  %v721_v55 = vrot.slane %v720_v30, 4  ;;  %v5740_v61 = vrot.slane %v5724_v5, 9 }
  0x77   : > { %v739_v16 = vrot.slane %v737_v26, 5  ;;  %v743_v54 = vrot.slane %v741_v60, 4  ;;  %v749_v37 = vrot.slane %v747_v22, 5  ;;  %v3001_v13 = vrot.slane %v7027_v46, 5  ;;  %v5725_v46 = vld [vmem:[%s6951_s22 + $0x30] sm:$0xe] }
  0x78   : > { %v734_v9 = vor.u32 %v733_v51, %v730_v49  ;;  %v726_v47 = vsel %vm6977_vm4, %v721_v55, %v725_v44  ;;  %v3004_v43 = vrot.slane %v7033_v53, 5  ;;  %v752_v5 = vshrl.u32 %v7326_v15, 16  ;;  %v7356_v51 = vld [vmem:[%s6951_s22 + $0xa8] sm:$0xf]  ;;  %v7364_v55 = vld [vmem:[%s6951_s22 + $0xac] sm:$0xf] }
  0x79   : > { %v755_v24 = vshll.u32 %v7326_v15, 16  ;;  %v5474_v1 = vcombine.low %v716_v27, %v726_v47  ;;  %6344 = vmatmul.mubr.msk.bf16.vlgmr.msra.gmra.mrb[0].mxu0 %vm873_vm3, %v5756_v25  ;;  %v744_v28 = vor.u32 %v743_v54, %v739_v16  ;;  %v3002_v30 = vsel %vm7264_vm7, %v5740_v61, %v3001_v13 }
  0x7a   : > { %v735_v40 = vrot.slane %v734_v9, 4  ;;  %6376 = vmatpush3.bf16.msra.mxu0 %v6987_v41  ;;  %v3003_v26 = vrot.slane %v3001_v13, 4  ;;  %v754_v44 = vrot.slane %v752_v5, 4  ;;  %v761_v53 = vshll.u32 %v7331_v62, 16 }
  0x7b   : > { %v757_v49 = vrot.slane %v755_v24, 5  ;;  %6194 = vmatmul.mubr.msk.bf16.gmra.mrb[20].mxu1 %vm873_vm3, %v5474_v1  ;;  %v745_v60 = vrot.slane %v744_v28, 4  ;;  %v765_v22 = vshrl.u32 %v7331_v62, 16  ;;  %v771_v27 = vshll.u32 %v7336_v58, 16  ;;  %6753 = vmatprep.subr.msk.bf16.mxu0 %vm922_vm0, %v7341_v6  ;;  %v7373_v24 = vld [vmem:[%s6951_s22 + $0xb0] sm:$0x1] }
  0x7c   : > { %v740_v25 = vsel %vm6977_vm4, %v735_v40, %v739_v16  ;;  %v3005_v41 = vsel %vm7264_vm7, %v3003_v26, %v3004_v43  ;;  %v763_v9 = vrot.slane %v761_v53, 5  ;;  %v5741_v54 = vrot.slane %v5725_v46, 9  ;;  %8945 = vst [vmem:[#allocation3_spill] sm:$0xff] %v7373_v24 }
  0x7d   : > { %v758_v61 = vor.u32 %v757_v49, %v754_v44  ;;  %v750_v16 = vsel %vm6977_vm4, %v745_v60, %v749_v37  ;;  %v5757_v13 = vcombine.low %v3002_v30, %v3005_v41  ;;  %v767_v47 = vrot.slane %v765_v22, 4  ;;  %v5726_v30 = vld [vmem:[%s6951_s22 + $0x3c] sm:$0xe] }
  0x7e   : > { %v773_v5 = vrot.slane %v771_v27, 5  ;;  %v5475_v1 = vcombine.low %v740_v25, %v750_v16  ;;  %v3008_v28 = vrot.slane %v7052_v31, 5  ;;  %v3011_v2 = vrot.slane %v7060_v39, 5 }
  0x7f   : > { %v759_v40 = vrot.slane %v758_v61, 4  ;;  %6347 = vmatprep.mubr.msk.bf16.mxu0 %vm873_vm3, %v5757_v13  ;;  %v768_v43 = vor.u32 %v767_v47, %v763_v9  ;;  %v776_v26 = vshrl.u32 %v7356_v51, 16  ;;  %v779_v46 = vshll.u32 %v7356_v51, 16 }
  0x80   : > { %v785_v37 = vshll.u32 %v7364_v55, 16  ;;  %6197 = vmatprep.mubr.msk.bf16.mxu1 %vm873_vm3, %v5475_v1  ;;  %v3009_v31 = vsel %vm7264_vm7, %v5741_v54, %v3008_v28  ;;  %v3010_v39 = vrot.slane %v3008_v28, 4  ;;  %v789_v49 = vshrl.u32 %v7364_v55, 16 }
  0x81   : > { %v764_v44 = vsel %vm6977_vm4, %v759_v40, %v763_v9  ;;  %v769_v53 = vrot.slane %v768_v43, 4  ;;  %v778_v25 = vrot.slane %v776_v26, 4  ;;  %v781_v60 = vrot.slane %v779_v46, 5  ;;  %v7392_v9 = vld [vmem:[%s6951_s22 + $0xb4] sm:$0xf] }
  0x82   : > { %v787_v22 = vrot.slane %v785_v37, 5  ;;  %v3012_v27 = vsel %vm7264_vm7, %v3010_v39, %v3011_v2  ;;  %v791_v41 = vrot.slane %v789_v49, 4  ;;  %v795_v61 = vshll.u32 %v7373_v24, 16  ;;  %v7398_v40 = vld [vmem:[%s6951_s22 + $0xb8] sm:$0xf] }
  0x83   : > { %v5742_v16 = vrot.slane %v5726_v30, 9  ;;  %v774_v54 = vsel %vm6977_vm4, %v769_v53, %v773_v5  ;;  %v5758_v13 = vcombine.low %v3009_v31, %v3012_v27  ;;  %v782_v47 = vor.u32 %v781_v60, %v778_v25  ;;  %v7402_v46 = vld [vmem:[%s6951_s22 + $0xbc] sm:$0x1]  ;;  %v5727_v49 = vld [vmem:[%s6951_s22 + $0x48] sm:$0xe] }
  0x84   : > { %v3015_v1 = vrot.slane %v7077_v19, 5  ;;  %v5476_v28 = vcombine.low %v764_v44, %v774_v54  ;;  %v792_v43 = vor.u32 %v791_v41, %v787_v22  ;;  %v797_v26 = vrot.slane %v795_v61, 5  ;;  %8946 = vst [vmem:[#allocation4_spill] sm:$0xff] %v7402_v46  ;;  %v5728_v41 = vld [vmem:[%s6951_s22 + $0x54] sm:$0xe] }
  0x85   : > { %v3018_v2 = vrot.slane %v7082_v33, 5  ;;  %6348 = vmatmul.mubr.msk.bf16.gmra.mrb[4].mxu0 %vm873_vm3, %v5758_v13  ;;  %v783_v37 = vrot.slane %v782_v47, 4  ;;  %v800_v19 = vshrl.u32 %v7392_v9, 16  ;;  %v803_v44 = vshll.u32 %v7392_v9, 16 }
  0x86   : > { %v3016_v5 = vsel %vm7264_vm7, %v5742_v16, %v3015_v1  ;;  %v3017_v30 = vrot.slane %v3015_v1, 4  ;;  %6198 = vmatmul.mubr.msk.bf16.gmra.mrb[24].mxu1 %vm873_vm3, %v5476_v28  ;;  %v793_v31 = vrot.slane %v792_v43, 4  ;;  %v809_v39 = vshll.u32 %v7398_v40, 16 }
  0x87   : > { %v813_v33 = vshrl.u32 %v7398_v40, 16  ;;  %v788_v53 = vsel %vm6977_vm4, %v783_v37, %v787_v22  ;;  %v802_v60 = vrot.slane %v800_v19, 4  ;;  %v819_v27 = vshll.u32 %v7402_v46, 16 }
  0x88   : > { %v3019_v25 = vsel %vm7264_vm7, %v3017_v30, %v3018_v2  ;;  %v798_v61 = vsel %vm6977_vm4, %v793_v31, %v797_v26  ;;  %v805_v54 = vrot.slane %v803_v44, 5  ;;  %v811_v13 = vrot.slane %v809_v39, 5  ;;  %v5729_v31 = vld [vmem:[%s6951_s22 + $0x60] sm:$0xe] }
  0x89   : > { %v5759_v16 = vcombine.low %v3016_v5, %v3019_v25  ;;  %v5477_v47 = vcombine.low %v788_v53, %v798_v61  ;;  %v815_v1 = vrot.slane %v813_v33, 4  ;;  %v5743_v28 = vrot.slane %v5727_v49, 9 }
  0x8a   : > { %v806_v22 = vor.u32 %v805_v54, %v802_v60  ;;  %v3022_v43 = vrot.slane %v7100_v7, 5  ;;  %v3025_v2 = vrot.slane %v7108_v21, 5  ;;  %v5744_v37 = vrot.slane %v5728_v41, 9  ;;  %v7443_v54 = vld [vmem:[%s6951_s22 + $0x4] sm:$0xf] }
  0x8b   : > { %6351 = vmatprep.mubr.msk.bf16.mxu0 %vm873_vm3, %v5759_v16  ;;  %6201 = vmatprep.mubr.msk.bf16.mxu1 %vm873_vm3, %v5477_v47  ;;  %v816_v30 = vor.u32 %v815_v1, %v811_v13  ;;  %v821_v26 = vrot.slane %v819_v27, 5  ;;  %v3029_v5 = vrot.slane %v7127_v3, 5  ;;  %v3032_v19 = vrot.slane %v7133_v11, 5  ;;  %v5730_v27 = vld [vmem:[%s6951_s22 + $0x6c] sm:$0xe] }
  0x8c   : > { %v807_v44 = vrot.slane %v806_v22, 4  ;;  %v3023_v39 = vsel %vm7264_vm7, %v5743_v28, %v3022_v43  ;;  %v3024_v7 = vrot.slane %v3022_v43, 4  ;;  %v3036_v53 = vrot.slane %v7157_v57, 5  ;;  %v6817_v16 = vld [vmem:[%s6951_s22] sm:$0xf] }
  0x8d   : > { %v817_v33 = vrot.slane %v816_v30, 4  ;;  %v3030_v21 = vsel %vm7264_vm7, %v5744_v37, %v3029_v5  ;;  %v3031_v49 = vrot.slane %v3029_v5, 4  ;;  %v5745_v25 = vrot.slane %v5729_v31, 9  ;;  %v5731_v5 = vld [vmem:[%s6951_s22 + $0x78] sm:$0xe] }
  0x8e   : > { %v812_v3 = vsel %vm6977_vm4, %v807_v44, %v811_v13  ;;  %v3026_v11 = vsel %vm7264_vm7, %v3024_v7, %v3025_v2  ;;  %v3039_v60 = vrot.slane %v7161_v4, 5  ;;  %v5495_v47 = vcombine.low %v6817_v16, %v7443_v54  ;;  %v5672_v4 = vld [vmem:[%s6951_s22 + $0x88] sm:$0xf]  ;;  %v5732_v31 = vld [vmem:[%s6951_s22 + $0x84] sm:$0xe] }
  0x8f   : > { %v822_v41 = vsel %vm6977_vm4, %v817_v33, %v821_v26  ;;  %v5760_v61 = vcombine.low %v3023_v39, %v3026_v11  ;;  %v3033_v57 = vsel %vm7264_vm7, %v3031_v49, %v3032_v19  ;;  %v3038_v28 = vrot.slane %v3036_v53, 4  ;;  %v5673_v19 = vld [vmem:[%s6951_s22 + $0x8c] sm:$0x1]  ;;  %v7467_v7 = vld [vmem:[%s6951_s22 + $0x10] sm:$0xf] }
  0x90   : > { %v5478_v13 = vcombine.low %v812_v3, %v822_v41  ;;  %v5761_v1 = vcombine.low %v3030_v21, %v3033_v57  ;;  %v5746_v22 = vrot.slane %v5730_v27, 9  ;;  %v3043_v43 = vrot.slane %v7196_v59, 5  ;;  %v6819_v39 = vld [vmem:[%s6951_s22 + $0xc] sm:$0xf] }
  0x91   : > { %6352 = vmatmul.mubr.msk.bf16.gmra.mrb[8].mxu0 %vm873_vm3, %v5760_v61  ;;  %v3046_v2 = vrot.slane %v7201_v20, 5  ;;  %v3037_v37 = vsel %vm7264_vm7, %v5745_v25, %v3036_v53  ;;  %v3040_v30 = vsel %vm7264_vm7, %v3038_v28, %v3039_v60  ;;  %v3050_v26 = vrot.slane %v7227_v12, 5  ;;  %v6821_v25 = vld [vmem:[%s6951_s22 + $0x18] sm:$0xf]  ;;  %v7475_v60 = vld [vmem:[%s6951_s22 + $0x1c] sm:$0xf] }
  0x92   : > { %6202 = vmatmul.mubr.msk.bf16.gmra.mrb[28].mxu1 %vm873_vm3, %v5478_v13  ;;  %6355 = vmatprep.mubr.msk.bf16.mxu0 %vm873_vm3, %v5761_v1  ;;  %v3044_v59 = vsel %vm7264_vm7, %v5746_v22, %v3043_v43  ;;  %v3045_v20 = vrot.slane %v3043_v43, 4  ;;  %v3057_v44 = vrot.slane %v5672_v4, 5  ;;  %v5496_v33 = vcombine.low %v6819_v39, %v7467_v7  ;;  %v5678_v13 = vld [vmem:[%s6951_s22 + $0xa0] sm:$0xf]  ;;  %v7497_v28 = vld [vmem:[%s6951_s22 + $0x98] sm:$0x1] }
  0x93   : > { %6207 = vmatprep.mubr.msk.bf16.mxu1 %vm873_vm3, %v5495_v47  ;;  %v5762_v12 = vcombine.low %v3037_v37, %v3040_v30  ;;  %v5747_v53 = vrot.slane %v5731_v5, 9  ;;  %v3052_v3 = vrot.slane %v3050_v26, 4  ;;  %v3053_v11 = vrot.slane %v7230_v17, 5  ;;  %v7479_v47 = vld [vmem:[%s6951_s22 + $0x94] sm:$0xf] }
  0x94   : > { %v3047_v21 = vsel %vm7264_vm7, %v3045_v20, %v3046_v2  ;;  %v5497_v27 = vcombine.low %v6821_v25, %v7475_v60  ;;  %v5748_v41 = vrot.slane %v5732_v31, 9  ;;  %v3059_v61 = vrot.slane %v3057_v44, 4  ;;  %v7488_v17 = vld [vmem:[%s8909_s1 + $0x6] sm:$0x3]  ;;  %v5733_v2 = vld [vmem:[%s6951_s22 + $0x90] sm:$0xe] }
  0x95   : > { %v5763_v49 = vcombine.low %v3044_v59, %v3047_v21  ;;  %v3060_v16 = vrot.slane %v5673_v19, 5  ;;  %v1641_v57 = vsel %vm922_vm0, %v7169_v10, 0  ;;  %v3051_v1 = vsel %vm7264_vm7, %v5747_v53, %v3050_v26  ;;  %v5679_v37 = vld [vmem:[%s6951_s22 + $0xa4] sm:$0x1]  ;;  %v5734_v26 = vld [vmem:[%s6951_s22 + $0x9c] sm:$0xe] }
  0x96   : > { %v3054_v10 = vsel %vm7264_vm7, %v3052_v3, %v3053_v11  ;;  %v3064_v4 = vrot.slane %v7479_v47, 5  ;;  %v3058_v22 = vsel %vm7264_vm7, %v5748_v41, %v3057_v44  ;;  %v3071_v30 = vrot.slane %v5678_v13, 5  ;;  %v6823_v59 = vld [vmem:[%s6951_s22 + $0x24] sm:$0xf]  ;;  %v7512_v20 = vld [vmem:[%s6951_s22 + $0x28] sm:$0xf] }
  0x97   : > { %v3061_v43 = vsel %vm7264_vm7, %v3059_v61, %v3060_v16  ;;  %v5498_v5 = vcombine.low %v6823_v59, %v7512_v20  ;;  %v5764_v19 = vcombine.low %v3051_v1, %v3054_v10  ;;  %v5681_v31 = vld [vmem:[%s6951_s22 + $0xac] sm:$0xf]  ;;  %v5749_v39 = vrot.slane %v5733_v2, 9  ;;  %v6825_v21 = vld [vmem:[%s6951_s22 + $0x30] sm:$0xf] }
  0x98   : > { %v5765_v44 = vcombine.low %v3058_v22, %v3061_v43  ;;  %v5750_v3 = vrot.slane %v5734_v26, 9  ;;  %v3073_v11 = vrot.slane %v3071_v30, 4  ;;  %v3074_v25 = vrot.slane %v5679_v37, 5  ;;  %v5682_v1 = vld [vmem:[%s6951_s22 + $0xb0] sm:$0x1] }
  0x99   : > { %6356 = vmatmul.mubr.msk.bf16.gmra.mrb[12].mxu0 %vm873_vm3, %v5762_v12  ;;  %v3067_v12 = vrot.slane %v7497_v28, 5  ;;  %v3065_v41 = vsel %vm7264_vm7, %v5749_v39, %v3064_v4  ;;  %v3078_v16 = vrot.slane %v5681_v31, 5  ;;  %v5735_v10 = vld [vmem:[%s6951_s22 + $0xa8] sm:$0xe]  ;;  %v5685_v43 = vld [vmem:[%s6951_s22 + $0xbc] sm:$0x1] }
  0x9a   : > { %6208 = vmatmul.mubr.msk.bf16.vlgmr.msra.gmra.mrb[0].mxu1 %vm873_vm3, %v5496_v33  ;;  %6359 = vmatprep.mubr.msk.bf16.mxu0 %vm873_vm3, %v5763_v49  ;;  %v3066_v33 = vrot.slane %v3064_v4, 4  ;;  %v7519_v49 = vld [vmem:[%s6951_s22 + $0x34] sm:$0xf]  ;;  %v3075_v13 = vsel %vm7264_vm7, %v3073_v11, %v3074_v25  ;;  %v6827_v4 = vld [vmem:[%s6951_s22 + $0x3c] sm:$0xf] }
  0x9b   : > { %6240 = vmatpush3.bf16.msra.mxu1 %v1641_v57  ;;  %6211 = vmatprep.mubr.msk.bf16.mxu1 %vm873_vm3, %v5497_v27  ;;  %v5499_v53 = vcombine.low %v6825_v21, %v7519_v49  ;;  %v5684_v27 = vld [vmem:[%s6951_s22 + $0xb8] sm:$0xf]  ;;  %v3072_v57 = vsel %vm7264_vm7, %v5750_v3, %v3071_v30  ;;  %v5736_v2 = vld [vmem:[%s6951_s22 + $0xb4] sm:$0xe]  ;;  %v7541_v37 = vld [vmem:[%s6951_s22 + $0x40] sm:$0xf] }
  0x9c   : > { %6748 = vmatprep.subr.msk.bf16.mxu1 %vm922_vm0, %v7488_v17  ;;  %v3068_v61 = vsel %vm7264_vm7, %v3066_v33, %v3067_v12  ;;  %v3085_v22 = vrot.slane %v5684_v27, 5  ;;  %v5500_v26 = vcombine.low %v6827_v4, %v7541_v37  ;;  %v3080_v31 = vrot.slane %v3078_v16, 4  ;;  %v5687_v30 = vld [vmem:[%s6951_s22 + $0xc4] sm:$0xf]  ;;  %v6829_v39 = vld [vmem:[%s6951_s22 + $0x48] sm:$0xf] }
  0x9d   : > { %v5766_v59 = vcombine.low %v3065_v41, %v3068_v61  ;;  %v5501_v33 = vcombine.low %v6829_v39, %v7113_v35  ;;  %v5752_v12 = vrot.slane %v5736_v2, 9  ;;  %v3092_v25 = vrot.slane %v5687_v30, 5  ;;  %v5688_v41 = vld [vmem:[%s6951_s22 + $0xc8] sm:$0x1]  ;;  %v5737_v61 = vld [vmem:[%s6951_s22 + $0xc0] sm:$0xe] }
  0x9e   : > { %v3087_v21 = vrot.slane %v3085_v22, 4  ;;  %v2517_v2 = vshll.u32 %v7479_v47, 16  ;;  %v2521_v4 = vshrl.u32 %v7479_v47, 16  ;;  %v5505_v47 = vcombine.low %v7233_v36, %v7242_v50 }
  0x9f   : > { %v3086_v35 = vsel %vm7264_vm7, %v5752_v12, %v3085_v22  ;;  %v5503_v22 = vcombine.low %v7173_v18, %v7181_v29  ;;  %v1439_v18 = vrot.slane %v7467_v7, 5  ;;  %v6776_v29 = vld [vmem:[%s6951_s22 + $0x18] sm:$0xff]   ;;  %v1432_v39 = vrot.slane %v7443_v54, 5 }
  0xa0   : > { %v7584_v30 = vrot.slane %v2521_v4, 4  ;;  %v1446_v7 = vrot.slane %v7475_v60, 5  ;;  %v1453_v54 = vrot.slane %v7512_v20, 5  ;;  %v6780_v4 = vld [vmem:[%s6951_s22 + $0x30] sm:$0xff]   ;;  %v1388_v60 = vld [vmem:[%s6951_s22 + $0x6c] sm:$0xe] }
  0xa1   : > { %6360 = vmatmul.mubr.msk.bf16.gmra.mrb[16].mxu0 %vm873_vm3, %v5764_v19  ;;  %v5751_v19 = vrot.slane %v5735_v10, 9  ;;  %v3094_v10 = vrot.slane %v3092_v25, 4  ;;  %v1441_v36 = vrot.slane %v1439_v18, 4 }
  0xa2   : > { %6212 = vmatmul.mubr.msk.bf16.gmra.mrb[4].mxu1 %vm873_vm3, %v5498_v5  ;;  %6363 = vmatprep.mubr.msk.bf16.mxu0 %vm873_vm3, %v5765_v44  ;;  %v5767_v5 = vcombine.low %v3072_v57, %v3075_v13  ;;  %v3081_v44 = vrot.slane %v5682_v1, 5  ;;  %v5502_v57 = vcombine.low %v7137_v23, %v7143_v34  ;;  %v5753_v1 = vrot.slane %v5737_v61, 9  ;;  %8948 = vst [vmem:[#allocation6_spill] sm:$0xff] %v7584_v30 }
  0xa3   : > { %6215 = vmatprep.mubr.msk.bf16.mxu1 %vm873_vm3, %v5499_v53  ;;  %v3088_v53 = vrot.slane %v5685_v43, 5  ;;  %v3079_v3 = vsel %vm7264_vm7, %v5751_v19, %v3078_v16  ;;  %v3095_v43 = vrot.slane %v5688_v41, 5  ;;  %v5504_v19 = vcombine.low %v7209_v38, %v7212_v45  ;;  %v6831_v38 = vld [vmem:[%s6951_s22 + $0x14] sm:$0x1] }
  0xa4   : > { %v3082_v11 = vsel %vm7264_vm7, %v3080_v31, %v3081_v44  ;;  %v3093_v23 = vsel %vm7264_vm7, %v5753_v1, %v3092_v25  ;;  %v1381_v31 = vld [vmem:[%s6951_s22 + $0x18] sm:$0xe]  ;;  %v7582_v44 = vrot.slane %v2517_v2, 5  ;;  %v1442_v45 = vrot.slane %v6831_v38, 5  ;;  %v6778_v1 = vld [vmem:[%s6951_s22 + $0x24] sm:$0xff]  }
  0xa5   : > { %v3089_v27 = vsel %vm7264_vm7, %v3087_v21, %v3088_v53  ;;  %v5768_v13 = vcombine.low %v3079_v3, %v3082_v11  ;;  %v3096_v34 = vsel %vm7264_vm7, %v3094_v10, %v3095_v43  ;;  %v5506_v11 = vcombine.low %v7257_v42, %v7270_v0  ;;  %v7654_v38 = vld [vmem:[%s8909_s1 + $0x10] sm:$0x3]  ;;  %v6841_v3 = vld [vmem:[%s6951_s22 + $0x68] sm:$0x1] }
  0xa6   : > { %v5769_v16 = vcombine.low %v3086_v35, %v3089_v27  ;;  %8947 = vst [vmem:[#allocation5_spill] sm:$0xff] %v7582_v44  ;;  %v1434_v25 = vrot.slane %v1432_v39, 4  ;;  %v5529_v35 = vrot.slane %v1381_v31, 9  ;;  %v1382_v27 = vld [vmem:[%s6951_s22 + $0x24] sm:$0xe]  ;;  %v4281_v41 = vsel %vm922_vm0, %v7341_v6, 0 }
  0xa7   : > { %v1448_v61 = vrot.slane %v1446_v7, 4  ;;  %v5507_v10 = vcombine.low %v7294_v48, %v7297_v56  ;;  %v5508_v42 = vcombine.low %v7326_v15, %v7331_v62  ;;  %v5530_v48 = vrot.slane %v1382_v27, 9  ;;  %v6834_v31 = vld [vmem:[%s6951_s22 + $0x38] sm:$0x1]  ;;  %v1386_v27 = vld [vmem:[%s6951_s22 + $0x54] sm:$0xe] }
  0xa9   : > { %6364 = vmatmul.mubr.msk.bf16.gmra.mrb[20].mxu0 %vm873_vm3, %v5766_v59  ;;  %v5770_v59 = vcombine.low %v3093_v23, %v3096_v34  ;;  %v1455_v23 = vrot.slane %v1453_v54, 4  ;;  %v6833_v34 = vld [vmem:[%s6951_s22 + $0x2c] sm:$0x1] }
  0xaa   : > { %6216 = vmatmul.mubr.msk.bf16.gmra.mrb[8].mxu1 %vm873_vm3, %v5500_v26  ;;  %6367 = vmatprep.mubr.msk.bf16.mxu0 %vm873_vm3, %v5767_v5  ;;  %v1379_v26 = vld [vmem:[%s6951_s22] sm:$0xe]  ;;  %v1380_v5 = vld [vmem:[%s6951_s22 + $0xc] sm:$0xe]  ;;  %v1456_v2 = vrot.slane %v6833_v34, 5 }
  0xab   : > { %6219 = vmatprep.mubr.msk.bf16.mxu1 %vm873_vm3, %v5501_v33  ;;  %v6830_v33 = vld [vmem:[%s6951_s22 + $0x8] sm:$0x1]  ;;  %v5527_v21 = vrot.slane %v1379_v26, 9  ;;  %v5528_v53 = vrot.slane %v1380_v5, 9 }
  0xac   : > { %v1435_v12 = vrot.slane %v6830_v33, 5  ;;  %v6835_v33 = vld [vmem:[%s6951_s22 + $0x4c] sm:$0xf] }
  0xad   : > { %v7615_v43 = vsel %vm7264_vm7, %v5527_v21, %v1432_v39  ;;  %v7619_v6 = vsel %vm7264_vm7, %v5528_v53, %v1439_v18  ;;  %v7634_v18 = vsel %vm7264_vm7, %v5529_v35, %v1446_v7  ;;  %v1385_v39 = vld [vmem:[%s6951_s22 + $0x48] sm:$0xe]  ;;  %v5509_v7 = vcombine.low %v7356_v51, %v7364_v55 }
  0xae   : > { %v7669_v35 = vsel %vm7264_vm7, %v1455_v23, %v1456_v2  ;;  %v6782_v23 = vld [vmem:[%s6951_s22 + $0x3c] sm:$0xff]   ;;  %v5534_v2 = vrot.slane %v1386_v27, 9 }
  0xaf   : > { %v6839_v27 = vld [vmem:[%s6951_s22 + $0x5c] sm:$0x1] }
  0xb1   : > { %6368 = vmatmul.mubr.msk.bf16.gmra.mrb[24].mxu0 %vm873_vm3, %v5768_v13  ;;  %v1383_v13 = vld [vmem:[%s6951_s22 + $0x30] sm:$0xe] }
  0xb2   : > { %6220 = vmatmul.mubr.msk.bf16.gmra.mrb[12].mxu1 %vm873_vm3, %v5502_v57  ;;  %6371 = vmatprep.mubr.msk.bf16.mxu0 %vm873_vm3, %v5769_v16  ;;  %v6832_v57 = vld [vmem:[%s6951_s22 + $0x20] sm:$0x1]  ;;  %v1460_v16 = vrot.slane %v7519_v49, 5  ;;  %v7624_v49 = vsel %vm7264_vm7, %v1441_v36, %v1442_v45  ;;  %v5531_v26 = vrot.slane %v1383_v13, 9  ;;  %v7661_v36 = vsel %vm922_vm0, %v7488_v17, 0 }
  0xb3   : > { %6223 = vmatprep.mubr.msk.bf16.mxu1 %vm873_vm3, %v5503_v22  ;;  %v1449_v20 = vrot.slane %v6832_v57, 5  ;;  %v1384_v22 = vld [vmem:[%s6951_s22 + $0x3c] sm:$0xe]  ;;  %v5533_v57 = vrot.slane %v1385_v39, 9  ;;  %v1389_v45 = vld [vmem:[%s6951_s22 + $0x78] sm:$0xe] }
  0xb4   : > { %v5532_v53 = vrot.slane %v1384_v22, 9  ;;  %v7681_v13 = vsel %vm7264_vm7, %v5531_v26, %v1460_v16  ;;  %v6837_v22 = vld [vmem:[%s6951_s22 + $0x50] sm:$0x1] }
  0xb5   : > { %v7639_v5 = vsel %vm7264_vm7, %v1448_v61, %v1449_v20  ;;  %v6836_v61 = vld [vmem:[%s6951_s22 + $0x44] sm:$0x1]  ;;  %v5853_v20 = vld [vmem:[%s6951_s22 + $0x1c] sm:$0xf] }
  0xb9   : > { %6372 = vmatmul.mubr.msk.bf16.gmra.mrb[28].mxu0 %vm873_vm3, %v5770_v59  ;;  %v1467_v59 = vrot.slane %v7541_v37, 5  ;;  %v1509_v37 = vrot.slane %v7270_v0, 5 }
  0xba   : > { %6224 = vmatmul.mubr.msk.bf16.gmra.mrb[16].mxu1 %vm873_vm3, %v5504_v19  ;;  %6377 = vmatprep.mubr.msk.bf16.mxu0 %vm873_vm3, %v6776_v29  ;;  %v7630_v29 = vsel %vm7264_vm7, %v1434_v25, %v1435_v12  ;;  %v1462_v19 = vrot.slane %v1460_v16, 4  ;;  %v1474_v12 = vrot.slane %v6835_v33, 5  ;;  %v7665_v25 = vsel %vm7264_vm7, %v5530_v48, %v1453_v54 }
  0xbb   : > { %6227 = vmatprep.mubr.msk.bf16.mxu1 %vm873_vm3, %v5505_v47  ;;  %v1463_v47 = vrot.slane %v6834_v31, 5  ;;  %v1470_v54 = vrot.slane %v6836_v61, 5  ;;  %v1477_v48 = vrot.slane %v6837_v22, 5  ;;  %v7695_v16 = vsel %vm7264_vm7, %v5532_v53, %v1467_v59  ;;  %v6784_v31 = vld [vmem:[%s6951_s22 + $0x48] sm:$0xff]   ;;  %v6840_v22 = vld [vmem:[%s6951_s22 + $0x64] sm:$0xf] }
  0xbc   : > { %v3808_v33 = vshll.u32 %v5853_v20, 16  ;;  %v3812_v61 = vshrl.u32 %v5853_v20, 16  ;;  %v7708_v53 = vsel %vm7264_vm7, %v5533_v57, %v1474_v12  ;;  %v1488_v17 = vrot.slane %v6840_v22, 5 }
  0xc1   : > { %6378 = vmatmul.mubr.msk.bf16.vlgmr.msra.gmra.mrb[0].mxu0 %vm873_vm3, %v6778_v1  ;;  %v7685_v1 = vsel %vm7264_vm7, %v1462_v19, %v1463_v47  ;;  %v1387_v19 = vld [vmem:[%s6951_s22 + $0x60] sm:$0xe] }
  0xc2   : > { %6228 = vmatmul.mubr.msk.bf16.gmra.mrb[20].mxu1 %vm873_vm3, %v5506_v11  ;;  %6410 = vmatpush3.bf16.msra.mxu0 %v4281_v41  ;;  %v5852_v11 = vld [vmem:[%s6951_s22 + $0x18] sm:$0xf]  ;;  %v1469_v41 = vrot.slane %v1467_v59, 4  ;;  %v5535_v34 = vrot.slane %v1387_v19, 9 }
  0xc3   : > { %6231 = vmatprep.mubr.msk.bf16.mxu1 %vm873_vm3, %v5507_v10  ;;  %6381 = vmatprep.mubr.msk.bf16.mxu0 %vm873_vm3, %v6780_v4  ;;  %v1476_v10 = vrot.slane %v1474_v12, 4  ;;  %v6838_v4 = vld [vmem:[%s6951_s22 + $0x58] sm:$0xf]  ;;  %v3799_v47 = vshrl.u32 %v5852_v11, 16  ;;  %v3802_v39 = vshll.u32 %v5852_v11, 16 }
  0xc4   : > { %6754 = vmatprep.subr.msk.bf16.mxu0 %vm922_vm0, %v7654_v38  ;;  %v1481_v26 = vrot.slane %v6838_v4, 5  ;;  %v7704_v59 = vsel %vm7264_vm7, %v1469_v41, %v1470_v54  ;;  %v1484_v4 = vrot.slane %v6839_v27, 5  ;;  %v5855_v11 = vld [vmem:[%s6951_s22 + $0x24] sm:$0xf]  ;;  %v1491_v41 = vrot.slane %v6841_v3, 5 }
  0xc5   : > { %v7715_v20 = vsel %vm7264_vm7, %v1476_v10, %v1477_v48  ;;  %v5856_v54 = vld [vmem:[%s6951_s22 + $0x28] sm:$0xf]  ;;  %v6842_v27 = vld [vmem:[%s6951_s22 + $0x70] sm:$0xf]  ;;  %v1502_v10 = vrot.slane %v7242_v50, 5  ;;  %v3801_v3 = vrot.slane %v3799_v47, 4 }
  0xc6   : > { %v7723_v12 = vsel %vm7264_vm7, %v5534_v2, %v1481_v26  ;;  %v1483_v57 = vrot.slane %v1481_v26, 4  ;;  %v1495_v21 = vrot.slane %v6842_v27, 5  ;;  %v3804_v48 = vrot.slane %v3802_v39, 5  ;;  %v5854_v50 = vld [vmem:[%s6951_s22 + $0x20] sm:$0x1] }
  0xc7   : > { %v3814_v2 = vrot.slane %v3812_v61, 4  ;;  %v3823_v26 = vshrl.u32 %v5855_v11, 16  ;;  %v3826_v15 = vshll.u32 %v5855_v11, 16  ;;  %v3832_v19 = vshll.u32 %v5856_v54, 16  ;;  %v6786_v61 = vld [vmem:[%s6951_s22 + $0x54] sm:$0xff]   ;;  %v6787_v11 = vld [vmem:[%s6951_s22 + $0x60] sm:$0xff]  }
  0xc8   : > { %v1490_v47 = vrot.slane %v1488_v17, 4  ;;  %v5536_v39 = vrot.slane %v1388_v60, 9  ;;  %v1497_v22 = vrot.slane %v1495_v21, 4  ;;  %v6843_v27 = vld [vmem:[%s6951_s22 + $0x74] sm:$0x1]  ;;  %v1504_v44 = vrot.slane %v1502_v10, 4 }
  0xc9   : > { %6382 = vmatmul.mubr.msk.bf16.gmra.mrb[4].mxu0 %vm873_vm3, %v6782_v23  ;;  %v7733_v23 = vrot.slane %v3808_v33, 5  ;;  %v5537_v33 = vrot.slane %v1389_v45, 9  ;;  %v1498_v51 = vrot.slane %v6843_v27, 5  ;;  %v3818_v46 = vshll.u32 %v5854_v50, 16 }
  0xca   : > { %6232 = vmatmul.mubr.msk.bf16.gmra.mrb[24].mxu1 %vm873_vm3, %v5508_v42  ;;  %6385 = vmatprep.mubr.msk.bf16.mxu0 %vm873_vm3, %v6784_v31  ;;  %v3836_v42 = vshrl.u32 %v5856_v54, 16  ;;  %v7742_v31 = vsel %vm7264_vm7, %v5535_v34, %v1488_v17  ;;  %v3805_v54 = vor.u32 %v3804_v48, %v3801_v3  ;;  %v1390_v34 = vld [vmem:[%s6951_s22 + $0x84] sm:$0xe]  ;;  %v3825_v24 = vrot.slane %v3823_v26, 4  ;;  %v7770_v48 = vld [vmem:[%s6951_s22 + $0x2c] sm:$0x1] }
  0xcb   : > { %6235 = vmatprep.mubr.msk.bf16.mxu1 %vm873_vm3, %v5509_v7  ;;  %v1505_v7 = vrot.slane %v7246_v8, 5  ;;  %v3815_v30 = vor.u32 %v3814_v2, %v7733_v23  ;;  %v3828_v17 = vrot.slane %v3826_v15, 5  ;;  %v7751_v60 = vrot.slane %v3832_v19, 5  ;;  %8949 = vst [vmem:[#allocation7_spill] sm:$0xff] %v7770_v48 }
  0xcc   : > { %v3838_v45 = vrot.slane %v3836_v42, 4  ;;  %v7755_v27 = vsel %vm7264_vm7, %v1483_v57, %v1484_v4  ;;  %v7759_v8 = vsel %vm7264_vm7, %v1490_v47, %v1491_v41  ;;  %v7763_v0 = vsel %vm7264_vm7, %v5536_v39, %v1495_v21 }
  0xcd   : > { %v7767_v3 = vsel %vm7264_vm7, %v5537_v33, %v1502_v10  ;;  %v7775_v4 = vsel %vm7264_vm7, %v1497_v22, %v1498_v51  ;;  %v5538_v57 = vrot.slane %v1390_v34, 9  ;;  %v1511_v41 = vrot.slane %v1509_v37, 4  ;;  %v6789_v33 = vld [vmem:[%s6951_s22 + $0x78] sm:$0xff]  }
  0xce   : > { %v1512_v2 = vrot.slane %v7278_v14, 5  ;;  %v8950_v21 = vcombine.low %v7392_v9, %v7398_v40  ;;  %v7785_v10 = vsel %vm7264_vm7, %v1504_v44, %v1505_v7  ;;  %v3806_v50 = vrot.slane %v3805_v54, 4  ;;  %v5858_v44 = vld [vmem:[%s6951_s22 + $0x30] sm:$0xf]  ;;  %v8962_v9 = vld [vmem:[#allocation3_spill] sm:$0xff] }
  0xcf   : > { %v3816_v26 = vrot.slane %v3815_v30, 4  ;;  %v3820_v15 = vrot.slane %v3818_v46, 5  ;;  %v8951_v14 = vcombine.low %v7615_v43, %v7630_v29  ;;  %v3829_v19 = vor.u32 %v3828_v17, %v3825_v24  ;;  %v1391_v43 = vld [vmem:[%s6951_s22 + $0x90] sm:$0xe] }
  0xd0   : > { %v3839_v42 = vor.u32 %v3838_v45, %v7751_v60  ;;  %v3842_v47 = vshll.u32 %v7770_v48, 16  ;;  %v1516_v29 = vrot.slane %v7297_v56, 5  ;;  %v6788_v24 = vld [vmem:[%s6951_s22 + $0x6c] sm:$0xff]   ;;  %v7812_v51 = vsel %vm7264_vm7, %v5538_v57, %v1509_v37  ;;  %v5861_v45 = vld [vmem:[%s6951_s22 + $0x3c] sm:$0xf] }
  0xd1   : > { %6386 = vmatmul.mubr.msk.bf16.gmra.mrb[8].mxu0 %vm873_vm3, %v6786_v61  ;;  %v7816_v7 = vsel %vm7264_vm7, %v1511_v41, %v1512_v2  ;;  %v3811_v56 = vsel %vm6977_vm4, %v3806_v50, %v7733_v23  ;;  %v3821_v54 = vsel %vm6977_vm4, %v3816_v26, %v3820_v15  ;;  %v3847_v34 = vshrl.u32 %v5858_v44, 16  ;;  %v7835_v23 = vld [vmem:[%s6951_s22 + $0x38] sm:$0x1] }
  0xd2   : > { %6236 = vmatmul.mubr.msk.bf16.gmra.mrb[28].mxu1 %vm873_vm3, %v8950_v21  ;;  %6389 = vmatprep.mubr.msk.bf16.mxu0 %vm873_vm3, %v6787_v11  ;;  %v7819_v11 = vld [vmem:[%s6951_s22 + $0x34] sm:$0xf]  ;;  %v3850_v17 = vshll.u32 %v5858_v44, 16  ;;  %v7828_v21 = vld [vmem:[%s6951_s22 + $0x40] sm:$0xf]  ;;  %v3830_v37 = vrot.slane %v3829_v19, 4 }
  0xd3   : > { %6241 = vmatprep.mubr.msk.bf16.mxu1 %vm873_vm3, %v8951_v14  ;;  %8952 = vst [vmem:[#allocation8_spill] sm:$0xff] %v7819_v11  ;;  %v3840_v57 = vrot.slane %v3839_v42, 4  ;;  %v3844_v14 = vrot.slane %v3842_v47, 5  ;;  %v5539_v41 = vrot.slane %v1391_v43, 9  ;;  %v1518_v2 = vrot.slane %v1516_v29, 4  ;;  %8953 = vst [vmem:[#allocation9_spill] sm:$0xff] %v7835_v23 }
  0xd4   : > { %v1519_v22 = vrot.slane %v7304_v63, 5  ;;  %v3856_v61 = vshll.u32 %v7819_v11, 16  ;;  %v3860_v30 = vshrl.u32 %v7819_v11, 16  ;;  %v3871_v50 = vshrl.u32 %v5861_v45, 16 }
  0xd5   : > { %v3874_v26 = vshll.u32 %v5861_v45, 16  ;;  %v3880_v15 = vshll.u32 %v7828_v21, 16  ;;  %v3884_v19 = vshrl.u32 %v7828_v21, 16  ;;  %v8954_v63 = vcombine.low %v7619_v6, %v7624_v49 }
  0xd6   : > { %v7844_v42 = vcombine.low %v3811_v56, %v3821_v54  ;;  %v3849_v44 = vrot.slane %v3847_v34, 4  ;;  %v3852_v43 = vrot.slane %v3850_v17, 5  ;;  %v8957_v6 = vcombine.low %v7634_v18, %v7639_v5  ;;  %v1392_v56 = vld [vmem:[%s6951_s22 + $0x9c] sm:$0xe]  ;;  %v5864_v54 = vld [vmem:[%s6951_s22 + $0x48] sm:$0xf] }
  0xd7   : > { %v3835_v49 = vsel %vm6977_vm4, %v3830_v37, %v7751_v60  ;;  %v7871_v18 = vsel %vm7264_vm7, %v1518_v2, %v1519_v22  ;;  %v7873_v5 = vrot.slane %v3856_v61, 5  ;;  %v3862_v34 = vrot.slane %v3860_v30, 4  ;;  %v6844_v17 = vld [vmem:[%s8909_s1 + $0x8] sm:$0x3]  ;;  %v7887_v30 = vld [vmem:[%s6951_s22 + $0x4c] sm:$0xf] }
  0xd8   : > { %v3866_v60 = vshll.u32 %v7835_v23, 16  ;;  %v3873_v37 = vrot.slane %v3871_v50, 4  ;;  %v3886_v22 = vrot.slane %v3884_v19, 4  ;;  %v3853_v61 = vor.u32 %v3852_v43, %v3849_v44 }
  0xd9   : > { %6390 = vmatmul.mubr.msk.bf16.gmra.mrb[12].mxu0 %vm873_vm3, %v6788_v24  ;;  %v8955_v24 = vshll.u32 %v7497_v28, 16  ;;  %v7864_v28 = vsel %vm7264_vm7, %v5539_v41, %v1516_v29  ;;  %v7881_v29 = vld [vmem:[%s6951_s22 + $0x44] sm:$0x1]  ;;  %v6791_v41 = vld [vmem:[%s6951_s22 + $0x90] sm:$0xff]   ;;  %v5540_v2 = vrot.slane %v1392_v56, 9  ;;  %v1526_v44 = vrot.slane %v7336_v58, 5 }
  0xda   : > { %6242 = vmatmul.mubr.msk.bf16.vlgmr.msra.gmra.mrb[0].mxu1 %vm873_vm3, %v8954_v63  ;;  %6393 = vmatprep.mubr.msk.bf16.mxu0 %vm873_vm3, %v6789_v33  ;;  %v3845_v33 = vsel %vm6977_vm4, %v3840_v57, %v3844_v14  ;;  %v3876_v57 = vrot.slane %v3874_v26, 5  ;;  %v7883_v14 = vrot.slane %v3880_v15, 5  ;;  %v3895_v63 = vshrl.u32 %v5864_v54, 16 }
  0xdb   : > { %v7850_v45 = vrot.slane %v8955_v24, 5  ;;  %6274 = vmatpush3.bf16.msra.mxu1 %v7661_v36  ;;  %6245 = vmatprep.mubr.msk.bf16.mxu1 %vm873_vm3, %v8957_v6  ;;  %v6790_v36 = vld [vmem:[%s6951_s22 + $0x84] sm:$0xff]   ;;  %v3898_v24 = vshll.u32 %v5864_v54, 16  ;;  %v7889_v6 = vcombine.low %v3835_v49, %v3845_v33  ;;  %v1523_v26 = vrot.slane %v7331_v62, 5  ;;  %v5867_v49 = vld [vmem:[%s6951_s22 + $0x54] sm:$0xf] }
  0xdc   : > { %6750 = vmatprep.subr.msk.bf16.mxu1 %vm922_vm0, %v6844_v17  ;;  %v7893_v17 = vsel %vm922_vm0, %v7654_v38, 0  ;;  %v3863_v15 = vor.u32 %v3862_v34, %v7873_v5  ;;  %v7899_v19 = vrot.slane %v3866_v60, 5  ;;  %v3890_v43 = vshll.u32 %v7881_v29, 16  ;;  %v7909_v62 = vld [vmem:[%s6951_s22 + $0x58] sm:$0xf] }
  0xdd   : > { %8956 = vst [vmem:[#allocation10_spill] sm:$0xff] %v7850_v45  ;;  %v3877_v33 = vor.u32 %v3876_v57, %v3873_v37  ;;  %v3887_v38 = vor.u32 %v3886_v22, %v7883_v14  ;;  %v3904_v56 = vshll.u32 %v7887_v30, 16  ;;  %v3908_v54 = vshrl.u32 %v7887_v30, 16  ;;  %8958 = vst [vmem:[#allocation11_spill] sm:$0xff] %v7909_v62 }
  0xde   : > { %v8959_v34 = vcombine.low %v7665_v25, %v7669_v35  ;;  %v3854_v58 = vrot.slane %v3853_v61, 4  ;;  %v3897_v60 = vrot.slane %v3895_v63, 4  ;;  %v3900_v37 = vrot.slane %v3898_v24, 5  ;;  %v1393_v25 = vld [vmem:[%s6951_s22 + $0xa8] sm:$0xe]  ;;  %v6792_v24 = vld [vmem:[%s6951_s22 + $0x9c] sm:$0xff]  }
  0xdf   : > { %v8960_v57 = vcombine.low %v7681_v13, %v7685_v1  ;;  %v1525_v22 = vrot.slane %v1523_v26, 4  ;;  %v1530_v35 = vrot.slane %v7364_v55, 5  ;;  %v3864_v61 = vrot.slane %v3863_v15, 4  ;;  %v7936_v15 = vld [vmem:[%s6951_s22 + $0x50] sm:$0x1] }
  0xe0   : > { %v3892_v50 = vrot.slane %v3890_v43, 5  ;;  %v3932_v63 = vshrl.u32 %v7909_v62, 16  ;;  %v3878_v47 = vrot.slane %v3877_v33, 4  ;;  %v3888_v13 = vrot.slane %v3887_v38, 4  ;;  %8961 = vst [vmem:[#allocation12_spill] sm:$0xff] %v7936_v15 }
  0xe1   : > { %6394 = vmatmul.mubr.msk.bf16.gmra.mrb[16].mxu0 %vm873_vm3, %v6790_v36  ;;  %v7918_v36 = vsel %vm7264_vm7, %v5540_v2, %v1523_v26  ;;  %v3928_v2 = vshll.u32 %v7909_v62, 16  ;;  %v7929_v1 = vrot.slane %v3904_v56, 5  ;;  %v3910_v26 = vrot.slane %v3908_v54, 4  ;;  %v1394_v38 = vld [vmem:[%s6951_s22 + $0xb4] sm:$0xe] }
  0xe2   : > { %6246 = vmatmul.mubr.msk.bf16.gmra.mrb[4].mxu1 %vm873_vm3, %v8959_v34  ;;  %6397 = vmatprep.mubr.msk.bf16.mxu0 %vm873_vm3, %v6791_v41  ;;  %v3919_v34 = vshrl.u32 %v5867_v49, 16  ;;  %v3922_v41 = vshll.u32 %v5867_v49, 16  ;;  %v3859_v55 = vsel %vm6977_vm4, %v3854_v58, %v7873_v5  ;;  %v5541_v49 = vrot.slane %v1393_v25, 9  ;;  %v7949_v58 = vld [vmem:[%s6951_s22 + $0x5c] sm:$0x1] }
  0xe3   : > { %6249 = vmatprep.mubr.msk.bf16.mxu1 %vm873_vm3, %v8960_v57  ;;  %v6793_v57 = vld [vmem:[%s6951_s22 + $0xa8] sm:$0xff]   ;;  %v3901_v43 = vor.u32 %v3900_v37, %v3897_v60  ;;  %v1537_v46 = vrot.slane %v7398_v40, 5  ;;  %v1532_v39 = vrot.slane %v1530_v35, 4  ;;  %v1533_v33 = vrot.slane %v8962_v9, 5  ;;  %8963 = vst [vmem:[#allocation3_spill] sm:$0xff] %v7949_v58 }
  0xe4   : > { %v3921_v23 = vrot.slane %v3919_v34, 4  ;;  %v3924_v56 = vrot.slane %v3922_v41, 5  ;;  %v3869_v54 = vsel %vm6977_vm4, %v3864_v61, %v7899_v19  ;;  %v7946_v5 = vsel %vm7264_vm7, %v1525_v22, %v1526_v44  ;;  %v5870_v22 = vld [vmem:[%s6951_s22 + $0x60] sm:$0xf]  ;;  %v7971_v61 = vld [vmem:[%s6951_s22 + $0x64] sm:$0xf] }
  0xe5   : > { %v7951_v40 = vrot.slane %v3928_v2, 5  ;;  %v3934_v60 = vrot.slane %v3932_v63, 4  ;;  %v3883_v9 = vsel %vm6977_vm4, %v3878_v47, %v7883_v14  ;;  %v3893_v19 = vsel %vm6977_vm4, %v3888_v13, %v3892_v50  ;;  %v8965_v50 = vld [vmem:[#allocation4_spill] sm:$0xff]  ;;  %v7988_v13 = vld [vmem:[%s6951_s22 + $0x68] sm:$0x1] }
  0xe6   : > { %v3911_v37 = vor.u32 %v3910_v26, %v7929_v1  ;;  %v3914_v44 = vshll.u32 %v7936_v15, 16  ;;  %v8964_v25 = vcombine.low %v7695_v16, %v7704_v59  ;;  %v7967_v34 = vrot.slane %v3901_v43, 4  ;;  %8966 = vst [vmem:[#allocation4_spill] sm:$0xff] %v7971_v61  ;;  %8968 = vst [vmem:[#allocation13_spill] sm:$0xff] %v7988_v13  ;;  %v5873_v26 = vld [vmem:[%s6951_s22 + $0x6c] sm:$0xf] }
  0xe7   : > { %v5542_v47 = vrot.slane %v1394_v38, 9  ;;  %v1539_v14 = vrot.slane %v1537_v46, 4  ;;  %v1540_v41 = vrot.slane %v8965_v50, 5  ;;  %v8967_v2 = vcombine.low %v7708_v53, %v7715_v20  ;;  %v6794_v53 = vld [vmem:[%s6951_s22 + $0xb4] sm:$0xff]   ;;  %v8091_v62 = vld [vmem:[%s6951_s22 + $0x8c] sm:$0x1] }
  0xe8   : > { %v7980_v16 = vsel %vm7264_vm7, %v5541_v49, %v1530_v35  ;;  %v7984_v59 = vsel %vm7264_vm7, %v1532_v39, %v1533_v33  ;;  %v3925_v63 = vor.u32 %v3924_v56, %v3921_v23  ;;  %v7997_v20 = vcombine.low %v3859_v55, %v3869_v54  ;;  %v8010_v56 = vld [vmem:[%s6951_s22 + $0x70] sm:$0xf]  ;;  %v5876_v55 = vld [vmem:[%s6951_s22 + $0x78] sm:$0xf]  ;;  %8977 = vst [vmem:[#allocation20_spill] sm:$0xff] %v8091_v62 }
  0xe9   : > { %6398 = vmatmul.mubr.msk.bf16.gmra.mrb[20].mxu0 %vm873_vm3, %v6792_v24  ;;  %v3938_v24 = vshll.u32 %v7949_v58, 16  ;;  %v3935_v23 = vor.u32 %v3934_v60, %v7951_v40  ;;  %v3943_v35 = vshrl.u32 %v5870_v22, 16  ;;  %v8003_v49 = vcombine.low %v3883_v9, %v3893_v19  ;;  %8969 = vst [vmem:[#allocation14_spill] sm:$0xff] %v8010_v56 }
  0xea   : > { %6250 = vmatmul.mubr.msk.bf16.gmra.mrb[8].mxu1 %vm873_vm3, %v8964_v25  ;;  %6401 = vmatprep.mubr.msk.bf16.mxu0 %vm873_vm3, %v6793_v57  ;;  %v6795_v57 = vld [vmem:[%s6951_s22 + $0xc0] sm:$0xff]   ;;  %v8005_v43 = vrot.slane %v3911_v37, 4  ;;  %v8007_v33 = vrot.slane %v3914_v44, 5  ;;  %v3946_v38 = vshll.u32 %v5870_v22, 16  ;;  %v8021_v9 = vsel %vm7264_vm7, %v5542_v47, %v1537_v46  ;;  %v8028_v37 = vld [vmem:[%s6951_s22 + $0x7c] sm:$0xf] }
  0xeb   : > { %6253 = vmatprep.mubr.msk.bf16.mxu1 %vm873_vm3, %v8967_v2  ;;  %8970 = vst [vmem:[#allocation15_spill] sm:$0xff] %v8021_v9  ;;  %v8025_v19 = vsel %vm7264_vm7, %v1539_v14, %v1540_v41  ;;  %8972 = vst [vmem:[#allocation17_spill] sm:$0xff] %v8028_v37  ;;  %v5879_v44 = vld [vmem:[%s6951_s22 + $0x84] sm:$0xf]  ;;  %v8031_v22 = vrot.slane %v3925_v63, 4  ;;  %v8033_v25 = vrot.slane %v3938_v24, 5  ;;  %v8975_v63 = vcombine.low %v7742_v31, %v7759_v8 }
  0xec   : > { %8971 = vst [vmem:[#allocation16_spill] sm:$0xff] %v8025_v19  ;;  %v3952_v50 = vshll.u32 %v7971_v61, 16  ;;  %v3956_v2 = vshrl.u32 %v7971_v61, 16  ;;  %v8037_v54 = vrot.slane %v3935_v23, 4  ;;  %v8039_v39 = vrot.slane %v3943_v35, 4 }
  0xed   : > { %v3962_v46 = vshll.u32 %v7988_v13, 16  ;;  %v3967_v47 = vshrl.u32 %v5873_v26, 16  ;;  %v8043_v14 = vld [vmem:[%s6951_s22 + $0x88] sm:$0xf]  ;;  %v3948_v24 = vrot.slane %v3946_v38, 5  ;;  %v3970_v23 = vshll.u32 %v5873_v26, 16 }
  0xee   : > { %8973 = vst [vmem:[#allocation18_spill] sm:$0xff] %v8043_v14  ;;  %v8974_v35 = vcombine.low %v7723_v12, %v7755_v27  ;;  %v3980_v60 = vshrl.u32 %v8010_v56, 16  ;;  %v3991_v11 = vshrl.u32 %v5876_v55, 16  ;;  %v3994_v41 = vshll.u32 %v5876_v55, 16  ;;  %v8086_v19 = vld [vmem:[%s6951_s22 + $0x80] sm:$0x1] }
  0xef   : > { %v4000_v12 = vshll.u32 %v8028_v37, 16  ;;  %v4004_v27 = vshrl.u32 %v8028_v37, 16  ;;  %v4015_v26 = vshrl.u32 %v5879_v44, 16  ;;  %v4018_v38 = vshll.u32 %v5879_v44, 16  ;;  %v5882_v37 = vld [vmem:[%s6951_s22 + $0x90] sm:$0xf] }
  0xf0   : > { %v4024_v48 = vshll.u32 %v8043_v14, 16  ;;  %v4028_v55 = vshrl.u32 %v8043_v14, 16  ;;  %v8074_v8 = vrot.slane %v3962_v46, 5  ;;  %v3969_v44 = vrot.slane %v3967_v47, 4  ;;  %v8083_v14 = vld [vmem:[%s6951_s22 + $0x94] sm:$0xf] }
  0xf1   : > { %6402 = vmatmul.mubr.msk.bf16.gmra.mrb[24].mxu0 %vm873_vm3, %v6794_v53  ;;  %v3976_v53 = vshll.u32 %v8010_v56, 16  ;;  %v6796_v56 = vld [vmem:[%s6951_s22 + $0xcc] sm:$0xff]   ;;  %v3993_v13 = vrot.slane %v3991_v11, 4  ;;  %v3996_v61 = vrot.slane %v3994_v41, 5  ;;  %8976 = vst [vmem:[#allocation19_spill] sm:$0xff] %v8083_v14  ;;  %v8088_v9 = vrot.slane %v4000_v12, 5 }
  0xf2   : > { %6254 = vmatmul.mubr.msk.bf16.gmra.mrb[12].mxu1 %vm873_vm3, %v8974_v35  ;;  %6405 = vmatprep.mubr.msk.bf16.mxu0 %vm873_vm3, %v6795_v57  ;;  %v8065_v57 = vrot.slane %v3952_v50, 5  ;;  %v3958_v35 = vrot.slane %v3956_v2, 4  ;;  %v3972_v50 = vrot.slane %v3970_v23, 5  ;;  %v3982_v2 = vrot.slane %v3980_v60, 4 }
  0xf3   : > { %6257 = vmatprep.mubr.msk.bf16.mxu1 %vm873_vm3, %v8975_v63  ;;  %v8077_v63 = vld [vmem:[%s6951_s22 + $0x74] sm:$0x1]  ;;  %v8080_v45 = vrot.slane %v3976_v53, 5  ;;  %v4006_v31 = vrot.slane %v4004_v27, 4  ;;  %v4017_v58 = vrot.slane %v4015_v26, 4  ;;  %v4020_v46 = vrot.slane %v4018_v38, 5 }
  0xf4   : > { %v8093_v15 = vrot.slane %v4024_v48, 5  ;;  %v4030_v47 = vrot.slane %v4028_v55, 4  ;;  %v4039_v23 = vshrl.u32 %v5882_v37, 16  ;;  %v4042_v53 = vshll.u32 %v5882_v37, 16 }
  0xf5   : > { %v3949_v11 = vor.u32 %v3948_v24, %v8039_v39  ;;  %v3959_v60 = vor.u32 %v3958_v35, %v8065_v57  ;;  %v4048_v41 = vshll.u32 %v8083_v14, 16  ;;  %v4052_v12 = vshrl.u32 %v8083_v14, 16 }
  0xf6   : > { %v8978_v27 = vcombine.low %v7763_v0, %v7775_v4  ;;  %v3973_v48 = vor.u32 %v3972_v50, %v3969_v44  ;;  %v3986_v39 = vshll.u32 %v8077_v63, 16  ;;  %v4010_v37 = vshll.u32 %v8086_v19, 16  ;;  %v5885_v50 = vld [vmem:[%s6951_s22 + $0x9c] sm:$0xf] }
  0xf7   : > { %v8979_v24 = vcombine.low %v7767_v3, %v7785_v10  ;;  %v3941_v0 = vsel %vm6977_vm4, %v8037_v54, %v8033_v25  ;;  %v3997_v4 = vor.u32 %v3996_v61, %v3993_v13  ;;  %v4034_v26 = vshll.u32 %v8091_v62, 16 }
  0xf8   : > { %v4021_v38 = vor.u32 %v4020_v46, %v4017_v58  ;;  %v4031_v35 = vor.u32 %v4030_v47, %v8093_v15  ;;  %v4041_v55 = vrot.slane %v4039_v23, 4  ;;  %v4044_v44 = vrot.slane %v4042_v53, 5 }
  0xf9   : > { %6406 = vmatmul.mubr.msk.bf16.gmra.mrb[28].mxu0 %vm873_vm3, %v6796_v56  ;;  %v3983_v56 = vor.u32 %v3982_v2, %v8080_v45  ;;  %v3950_v3 = vrot.slane %v3949_v11, 4  ;;  %v3960_v10 = vrot.slane %v3959_v60, 4  ;;  %v8122_v2 = vld [vmem:[%s6951_s22 + $0x98] sm:$0x1]  ;;  %v3974_v54 = vrot.slane %v3973_v48, 4 }
  0xfa   : > { %6258 = vmatmul.mubr.msk.bf16.gmra.mrb[16].mxu1 %vm873_vm3, %v8978_v27  ;;  %6411 = vmatprep.mubr.msk.bf16.mxu0 %vm873_vm3, %v7844_v42  ;;  %v4007_v42 = vor.u32 %v4006_v31, %v8088_v9  ;;  %v8124_v27 = vrot.slane %v4048_v41, 5  ;;  %v3988_v13 = vrot.slane %v3986_v39, 5  ;;  %v4012_v25 = vrot.slane %v4010_v37, 5  ;;  %v8127_v31 = vld [vmem:[%s6951_s22 + $0xa0] sm:$0xf]  ;;  %v8981_v39 = vld [vmem:[#allocation5_spill] sm:$0xff] }
  0xfb   : > { %6261 = vmatprep.mubr.msk.bf16.mxu1 %vm873_vm3, %v8979_v24  ;;  %v4054_v24 = vrot.slane %v4052_v12, 4  ;;  %v3984_v61 = vrot.slane %v3983_v56, 4  ;;  %v3998_v14 = vrot.slane %v3997_v4, 4  ;;  %v4063_v46 = vshrl.u32 %v5885_v50, 16  ;;  %v8980_v56 = vld [vmem:[#allocation6_spill] sm:$0xff] }
  0xfc   : > { %v4008_v58 = vrot.slane %v4007_v42, 4  ;;  %v4066_v47 = vshll.u32 %v5885_v50, 16  ;;  %v4022_v23 = vrot.slane %v4021_v38, 4  ;;  %v4032_v53 = vrot.slane %v4031_v35, 4  ;;  %v8173_v35 = vld [vmem:[%s6951_s22 + $0xa4] sm:$0x1] }
  0xfd   : > { %v4036_v62 = vrot.slane %v4034_v26, 5  ;;  %v4045_v11 = vor.u32 %v4044_v44, %v4041_v55  ;;  %v4055_v60 = vor.u32 %v4054_v24, %v8124_v27  ;;  %v4058_v41 = vshll.u32 %v8122_v2, 16  ;;  %v5936_v55 = vld [vmem:[%s6951_s22 + $0x3c] sm:$0xe] }
  0xfe   : > { %v4072_v12 = vshll.u32 %v8127_v31, 16  ;;  %v4076_v48 = vshrl.u32 %v8127_v31, 16  ;;  %v8982_v37 = vor.u32 %v8980_v56, %v8981_v39  ;;  %v8983_v42 = vcombine.low %v7812_v51, %v7816_v7  ;;  %v8990_v56 = vld [vmem:[#allocation12_spill] sm:$0xff] }
  0xff   : > { %v3965_v26 = vsel %vm6977_vm4, %v3960_v10, %v8074_v8  ;;  %v3979_v38 = vsel %vm6977_vm4, %v3974_v54, %v8080_v45  ;;  %v8984_v51 = vcombine.low %v7864_v28, %v7871_v18  ;;  %v3989_v7 = vsel %vm6977_vm4, %v3984_v61, %v3988_v13 }
 0x100   : > { %v8138_v4 = vrot.slane %v8982_v37, 4  ;;  %v4068_v8 = vrot.slane %v4066_v47, 5  ;;  %v4013_v45 = vsel %vm6977_vm4, %v4008_v58, %v4012_v25  ;;  %v4027_v28 = vsel %vm6977_vm4, %v4022_v23, %v8093_v15  ;;  %v8197_v25 = vld [vmem:[%s6951_s22 + $0xac] sm:$0xf]  ;;  %v5937_v47 = vld [vmem:[%s6951_s22 + $0x48] sm:$0xe] }
 0x101   : > { %6412 = vmatmul.mubr.msk.bf16.vlgmr.msra.gmra.mrb[0].mxu0 %vm873_vm3, %v7889_v6  ;;  %v3955_v6 = vsel %vm6977_vm4, %v3950_v3, %v8065_v57  ;;  %v4065_v57 = vrot.slane %v4063_v46, 4  ;;  %v4037_v18 = vsel %vm6977_vm4, %v4032_v53, %v4036_v62  ;;  %v4056_v44 = vrot.slane %v4055_v60, 4  ;;  %v5888_v3 = vld [vmem:[%s6951_s22 + $0xa8] sm:$0xf] }
 0x102   : > { %6262 = vmatmul.mubr.msk.bf16.gmra.mrb[20].mxu1 %vm873_vm3, %v8983_v42  ;;  %6444 = vmatpush3.bf16.msra.mxu0 %v7893_v17  ;;  %v4003_v17 = vsel %vm6977_vm4, %v3998_v14, %v8088_v9  ;;  %v4060_v9 = vrot.slane %v4058_v41, 5  ;;  %v8176_v14 = vrot.slane %v4072_v12, 5  ;;  %v4078_v50 = vrot.slane %v4076_v48, 4 }
 0x103   : > { %6265 = vmatprep.mubr.msk.bf16.mxu1 %vm873_vm3, %v8984_v51  ;;  %6415 = vmatprep.mubr.msk.bf16.mxu0 %vm873_vm3, %v7997_v20  ;;  %v4046_v20 = vrot.slane %v4045_v11, 4  ;;  %v8985_v15 = vsel %vm6977_vm4, %v8005_v43, %v8007_v33  ;;  %v8986_v62 = vsel %vm6977_vm4, %v7967_v34, %v7929_v1  ;;  %v8987_v24 = vsel %vm6977_vm4, %v8031_v22, %v7951_v40  ;;  %v8243_v51 = vld [vmem:[%s6951_s22 + $0xb0] sm:$0x1] }
 0x104   : > { %v5905_v10 = vcombine.low %v8986_v62, %v8985_v15  ;;  %v5906_v54 = vcombine.low %v8987_v24, %v3941_v0  ;;  %v5907_v61 = vcombine.low %v3955_v6, %v3965_v26  ;;  %v8194_v13 = vcombine.low %v3979_v38, %v3989_v7  ;;  %v5938_v0 = vld [vmem:[%s6951_s22 + $0x54] sm:$0xe]  ;;  %v8991_v26 = vld [vmem:[#allocation11_spill] sm:$0xff]  ;;  %v5674_v62 = vld [vmem:[%s6951_s22 + $0x90] sm:$0xf] }
 0x105   : > { %v8199_v58 = vcombine.low %v4003_v17, %v4013_v45  ;;  %v8201_v43 = vcombine.low %v4027_v28, %v4037_v18  ;;  %v4069_v33 = vor.u32 %v4068_v8, %v4065_v57  ;;  %v5952_v46 = vrot.slane %v5936_v55, 9  ;;  %v5891_v28 = vld [vmem:[%s6951_s22 + $0xb4] sm:$0xf]  ;;  %v5939_v55 = vld [vmem:[%s6951_s22 + $0x60] sm:$0xe] }
 0x106   : > { %v4051_v1 = vsel %vm6977_vm4, %v4046_v20, %v8124_v27  ;;  %v4082_v34 = vshll.u32 %v8173_v35, 16  ;;  %v4087_v40 = vshrl.u32 %v5888_v3, 16  ;;  %v4563_v22 = vrot.slane %v7828_v21, 5 }
 0x107   : > { %v4061_v23 = vsel %vm6977_vm4, %v4056_v44, %v4060_v9  ;;  %v4079_v53 = vor.u32 %v4078_v50, %v8176_v14  ;;  %v4090_v11 = vshll.u32 %v5888_v3, 16  ;;  %v4096_v60 = vshll.u32 %v8197_v25, 16  ;;  %v6797_v44 = vld [vmem:[%s6951_s22 + $0xc] sm:$0xff]  }
 0x108   : > { %v8988_v27 = vcombine.low %v7918_v36, %v7946_v5  ;;  %v8223_v21 = vsel %vm7264_vm7, %v5952_v46, %v4563_v22  ;;  %v4566_v41 = vrot.slane %v7881_v29, 5  ;;  %v5953_v12 = vrot.slane %v5937_v47, 9 }
 0x109   : > { %6416 = vmatmul.mubr.msk.bf16.gmra.mrb[4].mxu0 %vm873_vm3, %v8003_v49  ;;  %v4565_v49 = vrot.slane %v4563_v22, 4  ;;  %v8989_v48 = vcombine.low %v7980_v16, %v7984_v59  ;;  %v8230_v36 = vrot.slane %v4069_v33, 4  ;;  %v4570_v5 = vrot.slane %v7887_v30, 5  ;;  %v8992_v59 = vld [vmem:[#allocation3_spill] sm:$0xff] }
 0x10a   : > { %6266 = vmatmul.mubr.msk.bf16.gmra.mrb[24].mxu1 %vm873_vm3, %v8988_v27  ;;  %6419 = vmatprep.mubr.msk.bf16.mxu0 %vm873_vm3, %v5905_v10  ;;  %v4573_v37 = vrot.slane %v8990_v56, 5  ;;  %v5954_v42 = vrot.slane %v5938_v0, 9  ;;  %v8234_v6 = vrot.slane %v4087_v40, 4  ;;  %v4577_v16 = vrot.slane %v8991_v26, 5  ;;  %v5940_v22 = vld [vmem:[%s6951_s22 + $0x6c] sm:$0xe] }
 0x10b   : > { %6269 = vmatprep.mubr.msk.bf16.mxu1 %vm873_vm3, %v8989_v48  ;;  %v8238_v29 = vsel %vm7264_vm7, %v4565_v49, %v4566_v41  ;;  %v4580_v38 = vrot.slane %v8992_v59, 5  ;;  %v8245_v7 = vrot.slane %v4090_v11, 5  ;;  %v8251_v17 = vsel %vm7264_vm7, %v5953_v12, %v4570_v5  ;;  %v8993_v0 = vld [vmem:[#allocation15_spill] sm:$0xff]  ;;  %v8297_v11 = vld [vmem:[%s6951_s22 + $0xb8] sm:$0xf]  ;;  %v8998_v56 = vld [vmem:[#allocation10_spill] sm:$0xff] }
 0x10c   : > { %v5969_v30 = vcombine.low %v8223_v21, %v8238_v29  ;;  %v4572_v57 = vrot.slane %v4570_v5, 4  ;;  %v8253_v8 = vcombine.low %v4051_v1, %v4061_v23  ;;  %v8255_v45 = vrot.slane %v4082_v34, 5  ;;  %v8994_v23 = vld [vmem:[#allocation16_spill] sm:$0xff]  ;;  %v8997_v49 = vld [vmem:[#allocation13_spill] sm:$0xff]  ;;  %v6852_v21 = vld [vmem:[%s6951_s22 + $0xac] sm:$0xf] }
 0x10d   : > { %v8260_v18 = vsel %vm7264_vm7, %v5954_v42, %v4577_v16  ;;  %v4579_v20 = vrot.slane %v4577_v16, 4  ;;  %v8264_v9 = vrot.slane %v4079_v53, 4  ;;  %v8266_v50 = vrot.slane %v4096_v60, 5  ;;  %v8996_v60 = vld [vmem:[#allocation4_spill] sm:$0xff]  ;;  %v5894_v42 = vld [vmem:[%s6951_s22 + $0xc0] sm:$0xf] }
 0x10e   : > { %v4100_v3 = vshrl.u32 %v8197_v25, 16  ;;  %v8271_v15 = vsel %vm7264_vm7, %v4572_v57, %v4573_v37  ;;  %v4075_v10 = vsel %vm6977_vm4, %v8230_v36, %v8176_v14  ;;  %v4106_v24 = vshll.u32 %v8243_v51, 16  ;;  %v5943_v14 = vld [vmem:[%s6951_s22 + $0x90] sm:$0xe] }
 0x10f   : > { %v8283_v46 = vsel %vm7264_vm7, %v4579_v20, %v4580_v38  ;;  %v4093_v47 = vor.u32 %v8245_v7, %v8234_v6  ;;  %v4111_v1 = vshrl.u32 %v5891_v28, 16  ;;  %v5955_v40 = vrot.slane %v5939_v55, 9  ;;  %v8321_v20 = vld [vmem:[%s6951_s22 + $0xc4] sm:$0xf] }
 0x110   : > { %v8995_v53 = vcombine.low %v8993_v0, %v8994_v23  ;;  %v4584_v27 = vrot.slane %v8996_v60, 5  ;;  %v4587_v41 = vrot.slane %v8997_v49, 5  ;;  %v2508_v12 = vshrl.u32 %v5674_v62, 16  ;;  %v6799_v23 = vld [vmem:[%s6951_s22 + $0x24] sm:$0xff]  }
 0x111   : > { %6420 = vmatmul.mubr.msk.bf16.gmra.mrb[8].mxu0 %vm873_vm3, %v5906_v54  ;;  %v4114_v54 = vshll.u32 %v5891_v28, 16  ;;  %v4085_v48 = vsel %vm6977_vm4, %v8264_v9, %v8255_v45  ;;  %v8306_v5 = vrot.slane %v4100_v3, 4  ;;  %v2530_v37 = vsel %vm6977_vm4, %v8138_v4, %v8998_v56  ;;  %v6798_v3 = vld [vmem:[%s6951_s22 + $0x18] sm:$0xff]   ;;  %v5897_v56 = vld [vmem:[%s6951_s22 + $0xcc] sm:$0xf] }
 0x112   : > { %6270 = vmatmul.mubr.msk.bf16.gmra.mrb[28].mxu1 %vm873_vm3, %v8995_v53  ;;  %6423 = vmatprep.mubr.msk.bf16.mxu0 %vm873_vm3, %v5907_v61  ;;  %v2511_v61 = vshll.u32 %v5674_v62, 16  ;;  %v8315_v26 = vsel %vm7264_vm7, %v5955_v40, %v4584_v27  ;;  %v4586_v16 = vrot.slane %v4584_v27, 4  ;;  %v2510_v59 = vrot.slane %v2508_v12, 4  ;;  %v8326_v62 = vld [vmem:[%s6951_s22 + $0xbc] sm:$0x1] }
 0x113   : > { %6275 = vmatprep.mubr.msk.bf16.mxu1 %vm873_vm3, %v6797_v44  ;;  %v5956_v38 = vrot.slane %v5940_v22, 9  ;;  %v8317_v57 = vrot.slane %v4111_v1, 4  ;;  %v4120_v28 = vshll.u32 %v8297_v11, 16  ;;  %v8999_v44 = vld [vmem:[#allocation14_spill] sm:$0xff]  ;;  %v8328_v0 = vrot.slane %v4114_v54, 5 }
 0x114   : > { %v2513_v55 = vrot.slane %v2511_v61, 5  ;;  %v4591_v4 = vrot.slane %v8999_v44, 5  ;;  %v4124_v40 = vshrl.u32 %v8297_v11, 16  ;;  %v8333_v1 = vsel %vm7264_vm7, %v4586_v16, %v4587_v41  ;;  %v5941_v12 = vld [vmem:[%s6951_s22 + $0x78] sm:$0xe] }
 0x115   : > { %v4594_v22 = vrot.slane %v8077_v63, 5  ;;  %v4135_v53 = vshrl.u32 %v5894_v42, 16  ;;  %v4138_v60 = vshll.u32 %v5894_v42, 16  ;;  %v4144_v61 = vshll.u32 %v8321_v20, 16 }
 0x116   : > { %v2514_v49 = vor.u32 %v2513_v55, %v2510_v59  ;;  %v4148_v54 = vshrl.u32 %v8321_v20, 16  ;;  %v8345_v44 = vsel %vm7264_vm7, %v5956_v38, %v4591_v4  ;;  %v4593_v41 = vrot.slane %v4591_v4, 4  ;;  %v8357_v55 = vld [vmem:[%s8912_s4] sm:$0x3] }
 0x117   : > { %v4103_v63 = vor.u32 %v8306_v5, %v8266_v50  ;;  %v8351_v42 = vrot.slane %v4120_v28, 5  ;;  %v4130_v16 = vshll.u32 %v8326_v62, 16  ;;  %v5957_v38 = vrot.slane %v5941_v12, 9  ;;  %v9000_v28 = vld [vmem:[#allocation17_spill] sm:$0xff] }
 0x118   : > { %v2515_v59 = vrot.slane %v2514_v49, 4  ;;  %v8364_v5 = vsel %vm7264_vm7, %v4593_v41, %v4594_v22  ;;  %v4598_v4 = vrot.slane %v9000_v28, 5  ;;  %v9001_v49 = vld [vmem:[#allocation2_spill] sm:$0xff]  ;;  %v4137_v27 = vrot.slane %v4135_v53, 4 }
 0x119   : > { %6424 = vmatmul.mubr.msk.bf16.gmra.mrb[12].mxu0 %vm873_vm3, %v8194_v13  ;;  %v4126_v13 = vrot.slane %v4124_v40, 4  ;;  %v4140_v34 = vrot.slane %v4138_v60, 5  ;;  %v8375_v40 = vld [vmem:[%s6951_s22 + $0xc8] sm:$0x1]  ;;  %v8377_v22 = vrot.slane %v4144_v61, 5  ;;  %v4150_v12 = vrot.slane %v4148_v54, 4 }
 0x11a   : > { %6276 = vmatmul.mubr.msk.bf16.vlgmr.msra.gmra.mrb[0].mxu1 %vm873_vm3, %v6798_v3  ;;  %6427 = vmatprep.mubr.msk.bf16.mxu0 %vm873_vm3, %v8199_v58  ;;  %v2520_v58 = vsel %vm6977_vm4, %v2515_v59, %v8981_v39  ;;  %v4159_v41 = vshrl.u32 %v5897_v56, 16  ;;  %v4162_v53 = vshll.u32 %v5897_v56, 16  ;;  %v8388_v39 = vsel %vm7264_vm7, %v5957_v38, %v4598_v4  ;;  %v6800_v61 = vld [vmem:[%s6951_s22 + $0x30] sm:$0xff]   ;;  %v6801_v3 = vld [vmem:[%s6951_s22 + $0x3c] sm:$0xff]  }
 0x11b   : > { %6488 = vmatpush3.bf16.msra.mxu1 %v9001_v49  ;;  %6279 = vmatprep.mubr.msk.bf16.mxu1 %vm873_vm3, %v6799_v23  ;;  %v8379_v28 = vcombine.low %v2520_v58, %v2530_v37  ;;  %v8384_v23 = vld [vmem:[%s6951_s22 + $0xd0] sm:$0xf]  ;;  %v4600_v60 = vrot.slane %v4598_v4, 4  ;;  %v4601_v59 = vrot.slane %v8086_v19, 5  ;;  %v4094_v54 = vrot.slane %v4093_v47, 4 }
 0x11c   : > { %6755 = vmatprep.subr.msk.bf16.mxu1 %vm922_vm0, %v8357_v55  ;;  %v4108_v37 = vrot.slane %v4106_v24, 5  ;;  %v4117_v49 = vor.u32 %v8328_v0, %v8317_v57  ;;  %v4127_v56 = vor.u32 %v4126_v13, %v8351_v42  ;;  %v5942_v58 = vld [vmem:[%s6951_s22 + $0x84] sm:$0xe]  ;;  %v4104_v38 = vrot.slane %v4103_v63, 4 }
 0x11d   : > { %v4132_v33 = vrot.slane %v4130_v16, 5  ;;  %v4154_v4 = vshll.u32 %v8375_v40, 16  ;;  %v8405_v19 = vsel %vm7264_vm7, %v4600_v60, %v4601_v59  ;;  %v4141_v6 = vor.u32 %v4140_v34, %v4137_v27  ;;  %v9002_v13 = vld [vmem:[#allocation18_spill] sm:$0xff]  ;;  %v9003_v60 = vld [vmem:[#allocation20_spill] sm:$0xff] }
 0x11e   : > { %v4151_v7 = vor.u32 %v4150_v12, %v8377_v22  ;;  %v4168_v24 = vshll.u32 %v8384_v23, 16  ;;  %v5974_v47 = vcombine.low %v8388_v39, %v8405_v19  ;;  %v4161_v57 = vrot.slane %v4159_v41, 4 }
 0x11f   : > { %v4164_v0 = vrot.slane %v4162_v53, 5  ;;  %v4172_v63 = vshrl.u32 %v8384_v23, 16  ;;  %v5958_v16 = vrot.slane %v5942_v58, 9  ;;  %v4118_v34 = vrot.slane %v4117_v49, 4  ;;  %v8436_v53 = vld [vmem:[%s6951_s22 + $0xd4] sm:$0x1] }
 0x120   : > { %v4128_v27 = vrot.slane %v4127_v56, 4  ;;  %v4605_v12 = vrot.slane %v9002_v13, 5  ;;  %v4608_v59 = vrot.slane %v9003_v60, 5  ;;  %v4109_v41 = vsel %vm6977_vm4, %v4104_v38, %v4108_v37  ;;  %v6802_v37 = vld [vmem:[%s6951_s22 + $0x48] sm:$0xff]  }
 0x121   : > { %6428 = vmatmul.mubr.msk.bf16.gmra.mrb[16].mxu0 %vm873_vm3, %v8201_v43  ;;  %v5912_v43 = vcombine.low %v4075_v10, %v4085_v48  ;;  %v4152_v36 = vrot.slane %v4151_v7, 4  ;;  %v4165_v10 = vor.u32 %v4164_v0, %v4161_v57  ;;  %v8443_v48 = vrot.slane %v4168_v24, 5  ;;  %v6845_v7 = vld [vmem:[%s6951_s22 + $0x1c] sm:$0xf] }
 0x122   : > { %6280 = vmatmul.mubr.msk.bf16.gmra.mrb[4].mxu1 %vm873_vm3, %v6800_v61  ;;  %6431 = vmatprep.mubr.msk.bf16.mxu0 %vm873_vm3, %v8253_v8  ;;  %v4099_v8 = vsel %vm6977_vm4, %v4094_v54, %v8266_v50  ;;  %v4156_v61 = vrot.slane %v4154_v4, 5  ;;  %v8440_v45 = vsel %vm7264_vm7, %v5958_v16, %v4605_v12  ;;  %v4607_v9 = vrot.slane %v4605_v12, 4  ;;  %v5933_v54 = vld [vmem:[%s6951_s22 + $0x18] sm:$0xe]  ;;  %v9004_v16 = vld [vmem:[#allocation19_spill] sm:$0xff] }
 0x123   : > { %6283 = vmatprep.mubr.msk.bf16.mxu1 %vm873_vm3, %v6801_v3  ;;  %v4142_v3 = vrot.slane %v4141_v6, 4  ;;  %v4174_v50 = vrot.slane %v4172_v63, 4  ;;  %v5913_v49 = vcombine.low %v4099_v8, %v4109_v41  ;;  %v4123_v56 = vsel %vm6977_vm4, %v4118_v34, %v8351_v42  ;;  %v6803_v4 = vld [vmem:[%s6951_s22 + $0x54] sm:$0xff]   ;;  %v8465_v63 = vld [vmem:[%s6951_s22 + $0x24] sm:$0xe] }
 0x124   : > { %v4133_v58 = vsel %vm6977_vm4, %v4128_v27, %v4132_v33  ;;  %v8454_v38 = vsel %vm7264_vm7, %v4607_v9, %v4608_v59  ;;  %v4178_v6 = vshll.u32 %v8436_v53, 16  ;;  %v4542_v24 = vrot.slane %v6845_v7, 5  ;;  %v8476_v59 = vld [vmem:[%s6951_s22 + $0x28] sm:$0xf]  ;;  %v8480_v8 = vld [vmem:[%s6951_s22 + $0x30] sm:$0xe] }
 0x125   : > { %v5959_v0 = vrot.slane %v5943_v14, 9  ;;  %v4147_v42 = vsel %vm6977_vm4, %v4142_v3, %v8377_v22  ;;  %v5949_v33 = vrot.slane %v5933_v54, 9  ;;  %v4612_v34 = vrot.slane %v9004_v16, 5  ;;  %v6847_v9 = vld [vmem:[%s6951_s22 + $0x20] sm:$0x1] }
 0x126   : > { %v4157_v27 = vsel %vm6977_vm4, %v4152_v36, %v4156_v61  ;;  %v4166_v13 = vrot.slane %v4165_v10, 4  ;;  %v4175_v12 = vor.u32 %v4174_v50, %v8443_v48  ;;  %v4615_v60 = vrot.slane %v8122_v2, 5  ;;  %v5944_v10 = vld [vmem:[%s6951_s22 + $0x9c] sm:$0xe] }
 0x127   : > { %v5914_v22 = vcombine.low %v4123_v56, %v4133_v58  ;;  %v8484_v41 = vsel %vm7264_vm7, %v5959_v0, %v4612_v34  ;;  %v4614_v3 = vrot.slane %v4612_v34, 4  ;;  %v4180_v2 = vrot.slane %v4178_v6, 5  ;;  %v5945_v58 = vld [vmem:[%s6951_s22 + $0xa8] sm:$0xe] }
 0x128   : > { %v4544_v61 = vrot.slane %v4542_v24, 4  ;;  %v4545_v14 = vrot.slane %v6847_v9, 5  ;;  %v5950_v36 = vrot.slane %v8465_v63, 9  ;;  %v5915_v50 = vcombine.low %v4147_v42, %v4157_v27  ;;  %v6804_v42 = vld [vmem:[%s6951_s22 + $0x60] sm:$0xff]  }
 0x129   : > { %6432 = vmatmul.mubr.msk.bf16.gmra.mrb[20].mxu0 %vm873_vm3, %v5912_v43  ;;  %v4549_v43 = vrot.slane %v8476_v59, 5  ;;  %v8492_v54 = vsel %vm7264_vm7, %v5949_v33, %v4542_v24  ;;  %v8497_v56 = vsel %vm7264_vm7, %v4614_v3, %v4615_v60  ;;  %v4176_v6 = vrot.slane %v4175_v12, 4  ;;  %v5946_v24 = vld [vmem:[%s6951_s22 + $0xb4] sm:$0xe]  ;;  %v6805_v60 = vld [vmem:[%s6951_s22 + $0x6c] sm:$0xff]  }
 0x12a   : > { %6284 = vmatmul.mubr.msk.bf16.gmra.mrb[8].mxu1 %vm873_vm3, %v6802_v37  ;;  %6435 = vmatprep.mubr.msk.bf16.mxu0 %vm873_vm3, %v5913_v49  ;;  %v9005_v37 = vld [vmem:[#allocation7_spill] sm:$0xff]  ;;  %v5951_v7 = vrot.slane %v8480_v8, 9  ;;  %v5960_v16 = vrot.slane %v5944_v10, 9  ;;  %v4619_v34 = vrot.slane %v8127_v31, 5  ;;  %v4622_v27 = vrot.slane %v8173_v35, 5 }
 0x12b   : > { %6287 = vmatprep.mubr.msk.bf16.mxu1 %vm873_vm3, %v6803_v4  ;;  %v4552_v49 = vrot.slane %v9005_v37, 5  ;;  %v4171_v4 = vsel %vm6977_vm4, %v4166_v13, %v8443_v48  ;;  %v4551_v33 = vrot.slane %v4549_v43, 4  ;;  %v4546_v48 = vsel %vm7264_vm7, %v4544_v61, %v4545_v14  ;;  %v9006_v13 = vld [vmem:[#allocation8_spill] sm:$0xff]  ;;  %v5947_v9 = vld [vmem:[%s6951_s22 + $0xc0] sm:$0xe]  ;;  %v9007_v61 = vld [vmem:[#allocation9_spill] sm:$0xff] }
 0x12c   : > { %v4556_v12 = vrot.slane %v9006_v13, 5  ;;  %v5961_v8 = vrot.slane %v5945_v58, 9  ;;  %v4626_v3 = vrot.slane %v8197_v25, 5  ;;  %v8520_v0 = vsel %vm7264_vm7, %v5960_v16, %v4619_v34  ;;  %v6848_v37 = vld [vmem:[%s6951_s22 + $0x88] sm:$0xf] }
 0x12d   : > { %v4621_v10 = vrot.slane %v4619_v34, 4  ;;  %v4629_v31 = vrot.slane %v8243_v51, 5  ;;  %v5962_v57 = vrot.slane %v5946_v24, 9  ;;  %v4181_v35 = vsel %vm6977_vm4, %v4176_v6, %v4180_v2  ;;  %v5948_v6 = vld [vmem:[%s6951_s22 + $0xcc] sm:$0xe] }
 0x12e   : > { %v4559_v14 = vrot.slane %v9007_v61, 5  ;;  %v8529_v25 = vsel %vm7264_vm7, %v5961_v8, %v4626_v3  ;;  %v4628_v58 = vrot.slane %v4626_v3, 4  ;;  %v4636_v24 = vrot.slane %v8326_v62, 5  ;;  %v6806_v3 = vld [vmem:[%s6951_s22 + $0x78] sm:$0xff]  }
 0x12f   : > { %v8535_v51 = vsel %vm7264_vm7, %v4621_v10, %v4622_v27  ;;  %v5963_v2 = vrot.slane %v5947_v9, 9  ;;  %v5966_v16 = vcombine.low %v8492_v54, %v4546_v48  ;;  %v5916_v34 = vcombine.low %v4171_v4, %v4181_v35  ;;  %v6807_v10 = vld [vmem:[%s6951_s22 + $0x84] sm:$0xff]  }
 0x130   : > { %v4643_v13 = vrot.slane %v8375_v40, 5  ;;  %v5964_v8 = vrot.slane %v5948_v6, 9  ;;  %v4558_v9 = vrot.slane %v4556_v12, 4  ;;  %v4647_v4 = vrot.slane %v8384_v23, 5 }
 0x131   : > { %6436 = vmatmul.mubr.msk.bf16.gmra.mrb[24].mxu0 %vm873_vm3, %v5914_v22  ;;  %v4633_v22 = vrot.slane %v8297_v11, 5  ;;  %v4640_v11 = vrot.slane %v8321_v20, 5  ;;  %v4557_v59 = vsel %vm7264_vm7, %v5951_v7, %v4556_v12  ;;  %v6808_v7 = vld [vmem:[%s6951_s22 + $0x90] sm:$0xff]   ;;  %v2565_v29 = vshll.u32 %v6852_v21, 16 }
 0x132   : > { %6288 = vmatmul.mubr.msk.bf16.gmra.mrb[12].mxu1 %vm873_vm3, %v6804_v42  ;;  %6439 = vmatprep.mubr.msk.bf16.mxu0 %vm873_vm3, %v5915_v50  ;;  %v5977_v42 = vcombine.low %v8520_v0, %v8535_v51  ;;  %v8546_v50 = vsel %vm7264_vm7, %v4628_v58, %v4629_v31  ;;  %v5671_v31 = vld [vmem:[%s6951_s22 + $0x84] sm:$0xf]  ;;  %v8579_v58 = vsel %vm7264_vm7, %v5964_v8, %v4647_v4  ;;  %v4649_v23 = vrot.slane %v4647_v4, 4  ;;  %v6849_v8 = vld [vmem:[%s6951_s22 + $0xa0] sm:$0xf] }
 0x133   : > { %6291 = vmatprep.mubr.msk.bf16.mxu1 %vm873_vm3, %v6805_v60  ;;  %v5978_v62 = vcombine.low %v8529_v25, %v8546_v50  ;;  %v8553_v27 = vsel %vm7264_vm7, %v5962_v57, %v4633_v22  ;;  %v4635_v54 = vrot.slane %v4633_v22, 4  ;;  %v8557_v60 = vsel %vm7264_vm7, %v5963_v2, %v4640_v11 }
 0x134   : > { %v4642_v48 = vrot.slane %v4640_v11, 4  ;;  %v4650_v57 = vrot.slane %v8436_v53, 5  ;;  %v4550_v53 = vsel %vm7264_vm7, %v5950_v36, %v4549_v43  ;;  %v4553_v22 = vsel %vm7264_vm7, %v4551_v33, %v4552_v49 }
 0x135   : > { %v8563_v20 = vsel %vm7264_vm7, %v4635_v54, %v4636_v24  ;;  %v4560_v63 = vsel %vm7264_vm7, %v4558_v9, %v4559_v14  ;;  %v2484_v24 = vshrl.u32 %v5671_v31, 16  ;;  %v2487_v36 = vshll.u32 %v5671_v31, 16  ;;  %v6809_v14 = vld [vmem:[%s6951_s22 + $0x9c] sm:$0xff]  }
 0x136   : > { %v5979_v35 = vcombine.low %v8553_v27, %v8563_v20  ;;  %v8573_v40 = vsel %vm7264_vm7, %v4642_v48, %v4643_v13  ;;  %v8600_v43 = vsel %vm7264_vm7, %v4649_v23, %v4650_v57  ;;  %v2493_v49 = vshll.u32 %v6848_v37, 16 }
 0x137   : > { %v5980_v61 = vcombine.low %v8557_v60, %v8573_v40  ;;  %v2497_v33 = vshrl.u32 %v6848_v37, 16  ;;  %v5981_v2 = vcombine.low %v8579_v58, %v8600_v43  ;;  %v5967_v6 = vcombine.low %v4550_v53, %v4553_v22 }
 0x138   : > { %v5968_v12 = vcombine.low %v4557_v59, %v4560_v63  ;;  %v2486_v11 = vrot.slane %v2484_v24, 4  ;;  %v2489_v52 = vrot.slane %v2487_v36, 5  ;;  %v2545_v9 = vshrl.u32 %v6849_v8, 16  ;;  %v6810_v63 = vld [vmem:[%s6951_s22 + $0xa8] sm:$0xff]   ;;  %v6811_v24 = vld [vmem:[%s6951_s22 + $0xb4] sm:$0xff]  }
 0x139   : > { %6440 = vmatmul.mubr.msk.bf16.gmra.mrb[28].mxu0 %vm873_vm3, %v5916_v34  ;;  %v2495_v34 = vrot.slane %v2493_v49, 5  ;;  %v2499_v54 = vrot.slane %v2497_v33, 4  ;;  %v5680_v33 = vld [vmem:[%s6951_s22 + $0xa8] sm:$0xf] }
 0x13a   : > { %6292 = vmatmul.mubr.msk.bf16.gmra.mrb[16].mxu1 %vm873_vm3, %v6806_v3  ;;  %6445 = vmatprep.mubr.msk.bf16.mxu0 %vm873_vm3, %v5966_v16  ;;  %v5677_v16 = vld [vmem:[%s6951_s22 + $0x9c] sm:$0xf]  ;;  %v2541_v3 = vshll.u32 %v6849_v8, 16  ;;  %v2490_v4 = vor.u32 %v2489_v52, %v2486_v11  ;;  %v2547_v59 = vrot.slane %v2545_v9, 4  ;;  %v9008_v11 = vcombine.low %v8251_v17, %v8271_v15  ;;  %v6853_v9 = vld [vmem:[%s6951_s22 + $0xb8] sm:$0xf] }
 0x13b   : > { %6295 = vmatprep.mubr.msk.bf16.mxu1 %vm873_vm3, %v6807_v10  ;;  %v2532_v48 = vshrl.u32 %v5677_v16, 16  ;;  %v2535_v13 = vshll.u32 %v5677_v16, 16  ;;  %v2500_v57 = vor.u32 %v2499_v54, %v2495_v34  ;;  %v6850_v10 = vld [vmem:[%s6951_s22 + $0x8c] sm:$0x1]  ;;  %v2556_v52 = vshrl.u32 %v5680_v33, 16 }
 0x13c   : > { %v2503_v31 = vshll.u32 %v6850_v10, 16  ;;  %v8615_v22 = vrot.slane %v2541_v3, 5  ;;  %v2491_v36 = vrot.slane %v2490_v4, 4  ;;  %v2559_v54 = vshll.u32 %v5680_v33, 16  ;;  %v5686_v33 = vld [vmem:[%s6951_s22 + $0xc0] sm:$0xf] }
 0x13d   : > { %v2534_v23 = vrot.slane %v2532_v48, 4  ;;  %v2537_v53 = vrot.slane %v2535_v13, 5  ;;  %v2501_v37 = vrot.slane %v2500_v57, 4  ;;  %v2589_v17 = vshll.u32 %v6853_v9, 16 }
 0x13e   : > { %v2505_v49 = vrot.slane %v2503_v31, 5  ;;  %v2496_v48 = vsel %vm6977_vm4, %v2491_v36, %v2495_v34  ;;  %v2593_v15 = vshrl.u32 %v6853_v9, 16  ;;  %v6812_v31 = vld [vmem:[%s6951_s22 + $0xc0] sm:$0xff]  }
 0x140   : > { %v2506_v13 = vsel %vm6977_vm4, %v2501_v37, %v2505_v49  ;;  %v2591_v37 = vrot.slane %v2589_v17, 5  ;;  %v2595_v49 = vrot.slane %v2593_v15, 4 }
 0x141   : > { %6446 = vmatmul.mubr.msk.bf16.vlgmr.msra.gmra.mrb[0].mxu0 %vm873_vm3, %v5967_v6  ;;  %v2538_v6 = vor.u32 %v2537_v53, %v2534_v23  ;;  %v2558_v23 = vrot.slane %v2556_v52, 4  ;;  %v2561_v53 = vrot.slane %v2559_v54, 5  ;;  %v2604_v52 = vshrl.u32 %v5686_v33, 16 }
 0x142   : > { %6296 = vmatmul.mubr.msk.bf16.gmra.mrb[20].mxu1 %vm873_vm3, %v6808_v7  ;;  %6449 = vmatprep.mubr.msk.bf16.mxu0 %vm873_vm3, %v5968_v12  ;;  %v2548_v7 = vor.u32 %v2547_v59, %v8615_v22  ;;  %v6851_v12 = vld [vmem:[%s6951_s22 + $0xa4] sm:$0x1]  ;;  %v2567_v59 = vrot.slane %v2565_v29, 5  ;;  %v2607_v54 = vshll.u32 %v5686_v33, 16 }
 0x143   : > { %6299 = vmatprep.mubr.msk.bf16.mxu1 %vm873_vm3, %v6809_v14  ;;  %v2551_v16 = vshll.u32 %v6851_v12, 16  ;;  %v5683_v14 = vld [vmem:[%s6951_s22 + $0xb4] sm:$0xf]  ;;  %v2539_v4 = vrot.slane %v2538_v6, 4  ;;  %v9009_v12 = vcombine.low %v8260_v18, %v8283_v46  ;;  %v6854_v18 = vld [vmem:[%s6951_s22 + $0xb0] sm:$0x1] }
 0x144   : > { %v2580_v8 = vshrl.u32 %v5683_v14, 16  ;;  %v2583_v3 = vshll.u32 %v5683_v14, 16  ;;  %v2549_v57 = vrot.slane %v2548_v7, 4  ;;  %v9010_v7 = vcombine.low %v8315_v26, %v8333_v1 }
 0x145   : > { %v2553_v10 = vrot.slane %v2551_v16, 5  ;;  %v2544_v6 = vsel %vm6977_vm4, %v2539_v4, %v8615_v22  ;;  %v2562_v14 = vor.u32 %v2561_v53, %v2558_v23  ;;  %v2575_v46 = vshll.u32 %v6854_v18, 16  ;;  %v6855_v22 = vld [vmem:[%s6951_s22 + $0xc4] sm:$0xf] }
 0x146   : > { %v2582_v34 = vrot.slane %v2580_v8, 4  ;;  %v2585_v36 = vrot.slane %v2583_v3, 5  ;;  %v2617_v29 = vshrl.u32 %v6855_v22, 16  ;;  %v2606_v17 = vrot.slane %v2604_v52, 4 }
 0x147   : > { %v2554_v16 = vsel %vm6977_vm4, %v2549_v57, %v2553_v10  ;;  %v2563_v8 = vrot.slane %v2562_v14, 4  ;;  %v2577_v9 = vrot.slane %v2575_v46, 5  ;;  %v2609_v15 = vrot.slane %v2607_v54, 5  ;;  %v8752_v54 = vld [vmem:[%s8910_s2] ss:$0 sm:$0xff] }
 0x148   : > { %v5702_v1 = vcombine.low %v2544_v6, %v2554_v16  ;;  %v2619_v57 = vrot.slane %v2617_v29, 4  ;;  %v5175_v10 = vsel %vm922_vm0, %v8357_v55, 0 }
 0x149   : > { %6450 = vmatmul.mubr.msk.bf16.gmra.mrb[4].mxu0 %vm873_vm3, %v5969_v30  ;;  %v2569_v30 = vshrl.u32 %v6852_v21, 16  ;;  %v2613_v21 = vshll.u32 %v6855_v22, 16 }
 0x14a   : > { %6300 = vmatmul.mubr.msk.bf16.gmra.mrb[24].mxu1 %vm873_vm3, %v6810_v63  ;;  %6453 = vmatprep.mubr.msk.bf16.mxu0 %vm873_vm3, %v9008_v11 }
 0x14b   : > { %6303 = vmatprep.mubr.msk.bf16.mxu1 %vm873_vm3, %v6811_v24  ;;  %v2571_v63 = vrot.slane %v2569_v30, 4  ;;  %v5700_v24 = vcombine.low %v2496_v48, %v2506_v13  ;;  %v2586_v30 = vor.u32 %v2585_v36, %v2582_v34  ;;  %v2596_v48 = vor.u32 %v2595_v49, %v2591_v37  ;;  %v6856_v13 = vld [vmem:[%s6951_s22 + $0xbc] sm:$0x1]  ;;  %v6857_v34 = vld [vmem:[%s6951_s22 + $0xc8] sm:$0x1]  ;;  %s6011_s22 = sshll.u32 %s9015_s10, 8 }
 0x14c   : > { %v2599_v26 = vshll.u32 %v6856_v13, 16  ;;  %v2615_v4 = vrot.slane %v2613_v21, 5  ;;  %v2623_v36 = vshll.u32 %v6857_v34, 16  ;;  %s8757_s27 = scalar_lea.vmem %s8914_s6, %s6011_s22 }
 0x14d   : > { %v2572_v11 = vor.u32 %v2571_v63, %v2567_v59  ;;  %v2597_v23 = vrot.slane %v2596_v48, 4  ;;  %v9011_v63 = vcombine.low %v8345_v44, %v8364_v5  ;;  %v2610_v44 = vor.u32 %v2609_v15, %v2606_v17 }
 0x14e   : > { %v2601_v53 = vrot.slane %v2599_v26, 5  ;;  %v2620_v5 = vor.u32 %v2619_v57, %v2615_v4  ;;  %v2625_v33 = vrot.slane %v2623_v36, 5 }
 0x14f   : > { %v2573_v3 = vrot.slane %v2572_v11, 4 }
 0x150   : > { %v2602_v39 = vsel %vm6977_vm4, %v2597_v23, %v2601_v53  ;;  %v2621_v49 = vrot.slane %v2620_v5, 4 }
 0x151   : > { %6454 = vmatmul.mubr.msk.bf16.gmra.mrb[8].mxu0 %vm873_vm3, %v9009_v12  ;;  %v2578_v55 = vsel %vm6977_vm4, %v2573_v3, %v2577_v9  ;;  %v9012_v12 = vcombine.low %v8440_v45, %v8454_v38  ;;  %v6813_v45 = vld [vmem:[%s7994_s19] sm:$0xff]   ;;  %v6814_v38 = vld [vmem:[%s7994_s19 + $0x8] sm:$0xff]  }
 0x152   : > { %6304 = vmatmul.mubr.msk.bf16.gmra.mrb[28].mxu1 %vm873_vm3, %v6812_v31  ;;  %6457 = vmatprep.mubr.msk.bf16.mxu0 %vm873_vm3, %v9010_v7  ;;  %v2587_v31 = vrot.slane %v2586_v30, 4  ;;  %v2626_v7 = vsel %vm6977_vm4, %v2621_v49, %v2625_v33 }
 0x153   : > { %6329 = vmatprep.mubr.msk.bf16.mxu1 %vm873_vm3, %v5700_v24  ;;  %v2568_v24 = vsel %vm6977_vm4, %v2563_v8, %v2567_v59  ;;  %v2611_v59 = vrot.slane %v2610_v44, 4 }
 0x154   : > { %v5703_v19 = vcombine.low %v2568_v24, %v2578_v55 }
 0x155   : > { %v2616_v6 = vsel %vm6977_vm4, %v2611_v59, %v2615_v4 }
 0x156   : > { %v5705_v16 = vcombine.low %v2616_v6, %v2626_v7 }
 0x159   : > { %6458 = vmatmul.mubr.msk.bf16.gmra.mrb[12].mxu0 %vm873_vm3, %v9011_v63 }
 0x15a   : > { %6330 = vmatmul.mubr.msk.bf16.vlgmr.msra.gmra.mrb[20].mxu1 %vm873_vm3, %v8379_v28  ;;  %6461 = vmatprep.mubr.msk.bf16.mxu0 %vm873_vm3, %v5974_v47  ;;  %v2592_v28 = vsel %vm6977_vm4, %v2587_v31, %v2591_v37  ;;  %v9013_v37 = vcombine.low %v8484_v41, %v8497_v56  ;;  %v6815_v41 = vld [vmem:[%s7994_s19 + $0x10] sm:$0xff]  }
 0x15b   : > { %6478 = vmatpush3.bf16.msra.mxu1 %v5175_v10  ;;  %6333 = vmatprep.mubr.msk.bf16.mxu1 %vm873_vm3, %v5702_v1  ;;  %v5704_v47 = vcombine.low %v2592_v28, %v2602_v39 }
 0x161   : > { %6462 = vmatmul.mubr.msk.bf16.gmra.mrb[16].mxu0 %vm873_vm3, %v9012_v12 }
 0x162   : > { %6334 = vmatmul.mubr.msk.bf16.gmra.mrb[24].mxu1 %vm873_vm3, %v5703_v19  ;;  %6465 = vmatprep.mubr.msk.bf16.mxu0 %vm873_vm3, %v9013_v37 }
 0x163   : > { %6337 = vmatprep.mubr.msk.bf16.mxu1 %vm873_vm3, %v5704_v47 }
 0x169   : > { %6466 = vmatmul.mubr.msk.bf16.gmra.mrb[20].mxu0 %vm873_vm3, %v5977_v42 }
 0x16a   : > { %6338 = vmatmul.mubr.msk.bf16.gmra.mrb[28].mxu1 %vm873_vm3, %v5705_v16  ;;  %6469 = vmatprep.mubr.msk.bf16.mxu0 %vm873_vm3, %v5978_v62 }
 0x16b   : > { %6479 = vmatprep.mubr.msk.bf16.mxu1 %vm873_vm3, %v6813_v45 }
 0x171   : > { %6470 = vmatmul.mubr.msk.bf16.gmra.mrb[24].mxu0 %vm873_vm3, %v5979_v35 }
 0x172   : > { %6480 = vmatmul.mubr.msk.bf16.vlgmr.msra.gmra.mrb[32].mxu1 %vm873_vm3, %v6814_v38  ;;  %6473 = vmatprep.mubr.msk.bf16.mxu0 %vm873_vm3, %v5980_v61 }
 0x173   : > { %6483 = vmatprep.mubr.msk.bf16.mxu1 %vm873_vm3, %v6815_v41 }
 0x179   : > { %6474 = vmatmul.mubr.msk.bf16.gmra.mrb[28].mxu0 %vm873_vm3, %v5981_v2 }
 0x17a   : > { %6484 = vmatmul.mubr.msk.bf16.gmra.mrb[36].mxu1 %vm873_vm3, %v6816_v32 }
 0x1ed   : > { %v6277_v56 = vpop.f32.mrb[0].mxu1 }
 0x1ee   : > { %v2036_v0 = vpop.f32.mrb[1].mxu1 }
 0x1ef   : > { %v6278_v25 = vpop.f32.mrb[2].mxu1 }
 0x1f0   : > { %v2039_v51 = vpop.f32.mrb[3].mxu1 }
 0x1f5   : > { %v6281_v42 = vpop.f32.mrb[4].mxu1 }
 0x1f6   : > { %v2052_v50 = vpop.f32.mrb[5].mxu1 }
 0x1f7   : > { %v6282_v62 = vpop.f32.mrb[6].mxu1 }
 0x1f8   : > { %v2055_v27 = vpop.f32.mrb[7].mxu1 }
 0x1fd   : > { %v8724_v60 = vpop.f32.mrb[8].mxu1 }
 0x1fe   : > { %v8726_v20 = vpop.f32.mrb[9].mxu1 }
 0x1ff   : > { %v8728_v35 = vpop.f32.mrb[10].mxu1 }
 0x200   : > { %v8730_v40 = vpop.f32.mrb[11].mxu1 }
 0x205   : > { %v8732_v61 = vpop.f32.mrb[12].mxu1 }
 0x206   : > { %v8734_v58 = vpop.f32.mrb[13].mxu1 }
 0x207   : > { %v8736_v43 = vpop.f32.mrb[14].mxu1 }
 0x208   : > { %v8738_v2 = vpop.f32.mrb[15].mxu1 }
 0x20d   : > { %v8740_v14 = vpop.f32.mrb[16].mxu1 }
 0x20e   : > { %v8742_v11 = vpop.f32.mrb[17].mxu1 }
 0x20f   : > { %v8744_v18 = vpop.f32.mrb[18].mxu1 }
 0x210   : > { %v8746_v46 = vpop.f32.mrb[19].mxu1 }
 0x214   : > { %v6447_v52 = vpop.f32.mrb[0].mxu0 }
 0x215   : > { %v6489_v22 = vadd.f32 %v6447_v52, %v6277_v56  ;;  %v4787_v21 = vpop.f32.mrb[1].mxu0 }
 0x216   : > { %v6490_v29 = vadd.f32 %v4787_v21, %v2036_v0  ;;  %v6448_v30 = vpop.f32.mrb[2].mxu0 }
 0x217   : > { %v4955_v48 = vadd.f32 %v6489_v22, %v8752_v54  ;;  %v6491_v13 = vadd.f32 %v6448_v30, %v6278_v25  ;;  %v4790_v26 = vpop.f32.mrb[3].mxu0 }
 0x218   : > { %v4953_v1 = vadd.f32 %v6490_v29, %v8752_v54  ;;  %v6492_v8 = vadd.f32 %v4790_v26, %v2039_v51 }
 0x219   : > { %4987 = vst [vmem:[%s8757_s27 + $0x10] sm:$0xff] %v4955_v48  ;;  %v4956_v3 = vadd.f32 %v6491_v13, %v8752_v54  ;;  %v5056_v23 = vmul.f32 %v4955_v48, %v4955_v48 }
 0x21a   : > { %4985 = vst [vmem:[%s8757_s27] sm:$0xff] %v4953_v1  ;;  %v4954_v9 = vadd.f32 %v6492_v8, %v8752_v54  ;;  %v5054_v17 = vmul.f32 %v4953_v1, %v4953_v1 }
 0x21b   : > { %4988 = vst [vmem:[%s8757_s27 + $0x18] sm:$0xff] %v4956_v3  ;;  %v5057_v44 = vmul.f32 %v4956_v3, %v4956_v3 }
 0x21c   : > { %4986 = vst [vmem:[%s8757_s27 + $0x8] sm:$0xff] %v4954_v9  ;;  %v5017_v15 = vadd.f32 %v4954_v9, %v4953_v1  ;;  %v5055_v4 = vmul.f32 %v4954_v9, %v4954_v9  ;;  %v6451_v57 = vpop.f32.mrb[4].mxu0 }
 0x21d   : > { %v6493_v10 = vadd.f32 %v6451_v57, %v6281_v42  ;;  %v4803_v31 = vpop.f32.mrb[5].mxu0 }
 0x21e   : > { %v5018_v53 = vadd.f32 %v5017_v15, %v4955_v48  ;;  %v5086_v63 = vadd.f32 %v5055_v4, %v5054_v17  ;;  %v6494_v24 = vadd.f32 %v4803_v31, %v2052_v50  ;;  %v6452_v55 = vpop.f32.mrb[6].mxu0 }
 0x21f   : > { %v4959_v5 = vadd.f32 %v6493_v10, %v8752_v54  ;;  %v6495_v34 = vadd.f32 %v6452_v55, %v6282_v62  ;;  %v4806_v36 = vpop.f32.mrb[7].mxu0 }
 0x220   : > { %v5087_v28 = vadd.f32 %v5086_v63, %v5056_v23  ;;  %v4957_v39 = vadd.f32 %v6494_v24, %v8752_v54  ;;  %v5019_v19 = vadd.f32 %v5018_v53, %v4956_v3  ;;  %v6496_v47 = vadd.f32 %v4806_v36, %v2055_v27 }
 0x221   : > { %4991 = vst [vmem:[%s8757_s27 + $0x30] sm:$0xff] %v4959_v5  ;;  %v4960_v59 = vadd.f32 %v6495_v34, %v8752_v54  ;;  %v5060_v32 = vmul.f32 %v4959_v5, %v4959_v5 }
 0x222   : > { %4989 = vst [vmem:[%s8757_s27 + $0x20] sm:$0xff] %v4957_v39  ;;  %v5020_v49 = vadd.f32 %v5019_v19, %v4957_v39  ;;  %v5058_v33 = vmul.f32 %v4957_v39, %v4957_v39  ;;  %v5088_v12 = vadd.f32 %v5087_v28, %v5057_v44  ;;  %v4958_v37 = vadd.f32 %v6496_v47, %v8752_v54 }
 0x223   : > { %4992 = vst [vmem:[%s8757_s27 + $0x38] sm:$0xff] %v4960_v59  ;;  %v5061_v42 = vmul.f32 %v4960_v59, %v4960_v59 }
 0x224   : > { %v5089_v6 = vadd.f32 %v5088_v12, %v5058_v33  ;;  %4990 = vst [vmem:[%s8757_s27 + $0x28] sm:$0xff] %v4958_v37  ;;  %v5021_v7 = vadd.f32 %v5020_v49, %v4958_v37  ;;  %v5059_v16 = vmul.f32 %v4958_v37, %v4958_v37  ;;  %v6455_v45 = vpop.f32.mrb[8].mxu0 }
 0x225   : > { %v6497_v38 = vadd.f32 %v6455_v45, %v8724_v60  ;;  %v4819_v41 = vpop.f32.mrb[9].mxu0 }
 0x226   : > { %v5022_v56 = vadd.f32 %v5021_v7, %v4959_v5  ;;  %v5090_v0 = vadd.f32 %v5089_v6, %v5059_v16  ;;  %v6498_v25 = vadd.f32 %v4819_v41, %v8726_v20  ;;  %v6456_v51 = vpop.f32.mrb[10].mxu0 }
 0x227   : > { %v4963_v50 = vadd.f32 %v6497_v38, %v8752_v54  ;;  %v6499_v62 = vadd.f32 %v6456_v51, %v8728_v35  ;;  %v4822_v27 = vpop.f32.mrb[11].mxu0 }
 0x228   : > { %v5091_v52 = vadd.f32 %v5090_v0, %v5060_v32  ;;  %v4961_v22 = vadd.f32 %v6498_v25, %v8752_v54  ;;  %v5023_v60 = vadd.f32 %v5022_v56, %v4960_v59  ;;  %v6500_v21 = vadd.f32 %v4822_v27, %v8730_v40 }
 0x229   : > { %4995 = vst [vmem:[%s8757_s27 + $0x50] sm:$0xff] %v4963_v50  ;;  %v4964_v29 = vadd.f32 %v6499_v62, %v8752_v54  ;;  %v5064_v17 = vmul.f32 %v4963_v50, %v4963_v50 }
 0x22a   : > { %4993 = vst [vmem:[%s8757_s27 + $0x40] sm:$0xff] %v4961_v22  ;;  %v5024_v20 = vadd.f32 %v5023_v60, %v4961_v22  ;;  %v5062_v30 = vmul.f32 %v4961_v22, %v4961_v22  ;;  %v5092_v48 = vadd.f32 %v5091_v52, %v5061_v42  ;;  %v4962_v13 = vadd.f32 %v6500_v21, %v8752_v54 }
 0x22b   : > { %4996 = vst [vmem:[%s8757_s27 + $0x58] sm:$0xff] %v4964_v29  ;;  %v5065_v23 = vmul.f32 %v4964_v29, %v4964_v29 }
 0x22c   : > { %v5093_v26 = vadd.f32 %v5092_v48, %v5062_v30  ;;  %4994 = vst [vmem:[%s8757_s27 + $0x48] sm:$0xff] %v4962_v13  ;;  %v5025_v35 = vadd.f32 %v5024_v20, %v4962_v13  ;;  %v5063_v1 = vmul.f32 %v4962_v13, %v4962_v13  ;;  %v6459_v8 = vpop.f32.mrb[12].mxu0 }
 0x22d   : > { %v8787_v3 = vpop.f32.mrb[20].mxu1  ;;  %v6501_v9 = vadd.f32 %v6459_v8, %v8732_v61  ;;  %v4835_v40 = vpop.f32.mrb[13].mxu0 }
 0x22e   : > { %v5026_v15 = vadd.f32 %v5025_v35, %v4963_v50  ;;  %v5094_v4 = vadd.f32 %v5093_v26, %v5063_v1  ;;  %v8790_v57 = vpop.f32.mrb[21].mxu1  ;;  %v6502_v10 = vadd.f32 %v4835_v40, %v8734_v58  ;;  %v6460_v31 = vpop.f32.mrb[14].mxu0 }
 0x22f   : > { %v4967_v53 = vadd.f32 %v6501_v9, %v8752_v54  ;;  %v8794_v63 = vpop.f32.mrb[22].mxu1  ;;  %v6503_v24 = vadd.f32 %v6460_v31, %v8736_v43  ;;  %v4838_v61 = vpop.f32.mrb[15].mxu0 }
 0x230   : > { %v5095_v55 = vadd.f32 %v5094_v4, %v5064_v17  ;;  %v4965_v44 = vadd.f32 %v6502_v10, %v8752_v54  ;;  %v5027_v5 = vadd.f32 %v5026_v15, %v4964_v29  ;;  %v8798_v34 = vpop.f32.mrb[23].mxu1  ;;  %v6504_v36 = vadd.f32 %v4838_v61, %v8738_v2 }
 0x231   : > { %4999 = vst [vmem:[%s8757_s27 + $0x70] sm:$0xff] %v4967_v53  ;;  %v4968_v58 = vadd.f32 %v6503_v24, %v8752_v54  ;;  %v5068_v6 = vmul.f32 %v4967_v53, %v4967_v53 }
 0x232   : > { %4997 = vst [vmem:[%s8757_s27 + $0x60] sm:$0xff] %v4965_v44  ;;  %v5028_v28 = vadd.f32 %v5027_v5, %v4965_v44  ;;  %v5066_v39 = vmul.f32 %v4965_v44, %v4965_v44  ;;  %v5096_v19 = vadd.f32 %v5095_v55, %v5065_v23  ;;  %v4966_v47 = vadd.f32 %v6504_v36, %v8752_v54 }
 0x233   : > { %5000 = vst [vmem:[%s8757_s27 + $0x78] sm:$0xff] %v4968_v58  ;;  %v5069_v32 = vmul.f32 %v4968_v58, %v4968_v58 }
 0x234   : > { %v5097_v43 = vadd.f32 %v5096_v19, %v5066_v39  ;;  %4998 = vst [vmem:[%s8757_s27 + $0x68] sm:$0xff] %v4966_v47  ;;  %v5029_v59 = vadd.f32 %v5028_v28, %v4966_v47  ;;  %v5067_v49 = vmul.f32 %v4966_v47, %v4966_v47  ;;  %v6463_v33 = vpop.f32.mrb[16].mxu0 }
 0x235   : > { %v8807_v12 = vpop.f32.mrb[24].mxu1  ;;  %v6505_v37 = vadd.f32 %v6463_v33, %v8740_v14  ;;  %v4851_v2 = vpop.f32.mrb[17].mxu0 }
 0x236   : > { %v5030_v7 = vadd.f32 %v5029_v59, %v4967_v53  ;;  %v5098_v16 = vadd.f32 %v5097_v43, %v5067_v49  ;;  %v8810_v45 = vpop.f32.mrb[25].mxu1  ;;  %v6506_v38 = vadd.f32 %v4851_v2, %v8742_v11  ;;  %v6464_v41 = vpop.f32.mrb[18].mxu0 }
 0x237   : > { %v4971_v56 = vadd.f32 %v6505_v37, %v8752_v54  ;;  %v8814_v0 = vpop.f32.mrb[26].mxu1  ;;  %v6507_v25 = vadd.f32 %v6464_v41, %v8744_v18  ;;  %v4854_v14 = vpop.f32.mrb[19].mxu0 }
 0x238   : > { %v5099_v51 = vadd.f32 %v5098_v16, %v5068_v6  ;;  %v4969_v42 = vadd.f32 %v6506_v38, %v8752_v54  ;;  %v5031_v50 = vadd.f32 %v5030_v7, %v4968_v58  ;;  %v8818_v62 = vpop.f32.mrb[27].mxu1  ;;  %v6508_v27 = vadd.f32 %v4854_v14, %v8746_v46 }
 0x239   : > { %5003 = vst [vmem:[%s8757_s27 + $0x90] sm:$0xff] %v4971_v56  ;;  %v4972_v11 = vadd.f32 %v6507_v25, %v8752_v54  ;;  %v5072_v26 = vmul.f32 %v4971_v56, %v4971_v56 }
 0x23a   : > { %5001 = vst [vmem:[%s8757_s27 + $0x80] sm:$0xff] %v4969_v42  ;;  %v5032_v52 = vadd.f32 %v5031_v50, %v4969_v42  ;;  %v5070_v22 = vmul.f32 %v4969_v42, %v4969_v42  ;;  %v5100_v60 = vadd.f32 %v5099_v51, %v5069_v32  ;;  %v4970_v21 = vadd.f32 %v6508_v27, %v8752_v54 }
 0x23b   : > { %5004 = vst [vmem:[%s8757_s27 + $0x98] sm:$0xff] %v4972_v11  ;;  %v5073_v17 = vmul.f32 %v4972_v11, %v4972_v11 }
 0x23c   : > { %v5101_v18 = vadd.f32 %v5100_v60, %v5070_v22  ;;  %5002 = vst [vmem:[%s8757_s27 + $0x88] sm:$0xff] %v4970_v21  ;;  %v5033_v29 = vadd.f32 %v5032_v52, %v4970_v21  ;;  %v5071_v20 = vmul.f32 %v4970_v21, %v4970_v21  ;;  %v6467_v30 = vpop.f32.mrb[20].mxu0 }
 0x23d   : > { %v8827_v48 = vpop.f32.mrb[28].mxu1  ;;  %v6509_v13 = vadd.f32 %v6467_v30, %v8787_v3  ;;  %v4867_v46 = vpop.f32.mrb[21].mxu0 }
 0x23e   : > { %v5034_v35 = vadd.f32 %v5033_v29, %v4971_v56  ;;  %v5102_v1 = vadd.f32 %v5101_v18, %v5071_v20  ;;  %v8830_v8 = vpop.f32.mrb[29].mxu1  ;;  %v6510_v9 = vadd.f32 %v4867_v46, %v8790_v57  ;;  %v6468_v40 = vpop.f32.mrb[22].mxu0 }
 0x23f   : > { %v4975_v15 = vadd.f32 %v6509_v13, %v8752_v54  ;;  %v8834_v4 = vpop.f32.mrb[30].mxu1  ;;  %v6511_v3 = vadd.f32 %v6468_v40, %v8794_v63  ;;  %v4870_v10 = vpop.f32.mrb[23].mxu0  ;;  %v8850_v63 = vld [vmem:[%s8913_s5] ss:$0 sm:$0xff] }
 0x240   : > { %v5103_v31 = vadd.f32 %v5102_v1, %v5072_v26  ;;  %v4973_v23 = vadd.f32 %v6510_v9, %v8752_v54  ;;  %v5035_v53 = vadd.f32 %v5034_v35, %v4972_v11  ;;  %v8838_v24 = vpop.f32.mrb[31].mxu1  ;;  %v6512_v57 = vadd.f32 %v4870_v10, %v8798_v34 }
 0x241   : > { %5007 = vst [vmem:[%s8757_s27 + $0xb0] sm:$0xff] %v4975_v15  ;;  %v4976_v61 = vadd.f32 %v6511_v3, %v8752_v54  ;;  %v5076_v19 = vmul.f32 %v4975_v15, %v4975_v15 }
 0x242   : > { %5005 = vst [vmem:[%s8757_s27 + $0xa0] sm:$0xff] %v4973_v23  ;;  %v5036_v55 = vadd.f32 %v5035_v53, %v4973_v23  ;;  %v5074_v44 = vmul.f32 %v4973_v23, %v4973_v23  ;;  %v5104_v5 = vadd.f32 %v5103_v31, %v5073_v17  ;;  %v4974_v36 = vadd.f32 %v6512_v57, %v8752_v54 }
 0x243   : > { %5008 = vst [vmem:[%s8757_s27 + $0xb8] sm:$0xff] %v4976_v61  ;;  %v5077_v56 = vmul.f32 %v4976_v61, %v4976_v61 }
 0x244   : > { %v5105_v58 = vadd.f32 %v5104_v5, %v5074_v44  ;;  %5006 = vst [vmem:[%s8757_s27 + $0xa8] sm:$0xff] %v4974_v36  ;;  %v5037_v28 = vadd.f32 %v5036_v55, %v4974_v36  ;;  %v5075_v34 = vmul.f32 %v4974_v36, %v4974_v36  ;;  %v6471_v39 = vpop.f32.mrb[24].mxu0 }
 0x245   : > { %v6513_v47 = vadd.f32 %v6471_v39, %v8807_v12  ;;  %v6481_v43 = vpop.f32.mrb[32].mxu1  ;;  %v4883_v59 = vpop.f32.mrb[25].mxu0 }
 0x246   : > { %v5038_v49 = vadd.f32 %v5037_v28, %v4975_v15  ;;  %v5106_v33 = vadd.f32 %v5105_v58, %v5075_v34  ;;  %v5220_v37 = vadd.f32 %v6481_v43, %v8850_v63  ;;  %v6514_v2 = vadd.f32 %v4883_v59, %v8810_v45  ;;  %v5211_v6 = vpop.f32.mrb[33].mxu1  ;;  %v6472_v7 = vpop.f32.mrb[26].mxu0 }
 0x247   : > { %v4979_v12 = vadd.f32 %v6513_v47, %v8752_v54  ;;  %v5212_v16 = vadd.f32 %v8850_v63, %v5211_v6  ;;  %v6515_v38 = vadd.f32 %v6472_v7, %v8814_v0  ;;  %v6482_v41 = vpop.f32.mrb[34].mxu1  ;;  %v4886_v32 = vpop.f32.mrb[27].mxu0 }
 0x248   : > { %v5107_v25 = vadd.f32 %v5106_v33, %v5076_v19  ;;  %5244 = vst [vmem:[%s8857_s14 + $0x10] sm:$0xff] %v5220_v37  ;;  %v4977_v14 = vadd.f32 %v6514_v2, %v8752_v54  ;;  %v5039_v51 = vadd.f32 %v5038_v49, %v4976_v61  ;;  %v5214_v45 = vpop.f32.mrb[35].mxu1  ;;  %v5223_v50 = vadd.f32 %v6482_v41, %v8850_v63 }
 0x249   : > { %5011 = vst [vmem:[%s8757_s27 + $0xd0] sm:$0xff] %v4979_v12  ;;  %5242 = vst [vmem:[%s8857_s14] sm:$0xff] %v5212_v16  ;;  %v4980_v42 = vadd.f32 %v6515_v38, %v8752_v54  ;;  %v6516_v52 = vadd.f32 %v4886_v32, %v8818_v62  ;;  %v5263_v22 = vmul.f32 %v5212_v16, %v5212_v16 }
 0x24a   : > { %5009 = vst [vmem:[%s8757_s27 + $0xc0] sm:$0xff] %v4977_v14  ;;  %v5040_v0 = vadd.f32 %v5039_v51, %v4977_v14  ;;  %v5078_v27 = vmul.f32 %v4977_v14, %v4977_v14  ;;  %v5108_v11 = vadd.f32 %v5107_v25, %v5077_v56  ;;  %5245 = vst [vmem:[%s8857_s14 + $0x18] sm:$0xff] %v5223_v50 }
 0x24b   : > { %5012 = vst [vmem:[%s8757_s27 + $0xd8] sm:$0xff] %v4980_v42  ;;  %v5215_v60 = vadd.f32 %v8850_v63, %v5214_v45  ;;  %v5265_v21 = vmul.f32 %v5220_v37, %v5220_v37  ;;  %v4978_v29 = vadd.f32 %v6516_v52, %v8752_v54  ;;  %v5080_v30 = vmul.f32 %v4979_v12, %v4979_v12 }
 0x24c   : > { %v5109_v18 = vadd.f32 %v5108_v11, %v5078_v27  ;;  %v6475_v20 = vpop.f32.mrb[28].mxu0  ;;  %v5081_v61 = vmul.f32 %v4980_v42, %v4980_v42  ;;  %v5266_v36 = vmul.f32 %v5223_v50, %v5223_v50 }
 0x24d   : > { %5243 = vst [vmem:[%s8857_s14 + $0x8] sm:$0xff] %v5215_v60  ;;  %v5250_v13 = vadd.f32 %v5215_v60, %v5212_v16  ;;  %v5264_v46 = vmul.f32 %v5215_v60, %v5215_v60  ;;  %v6517_v26 = vadd.f32 %v6475_v20, %v8827_v48  ;;  %v6485_v35 = vpop.f32.mrb[36].mxu1  ;;  %v4899_v1 = vpop.f32.mrb[29].mxu0  ;;  %5010 = vst [vmem:[%s8757_s27 + $0xc8] sm:$0xff] %v4978_v29 }
 0x24e   : > { %v5041_v62 = vadd.f32 %v5040_v0, %v4978_v29  ;;  %v5079_v9 = vmul.f32 %v4978_v29, %v4978_v29  ;;  %v5236_v40 = vadd.f32 %v6485_v35, %v8850_v63  ;;  %v6518_v17 = vadd.f32 %v4899_v1, %v8830_v8  ;;  %v5227_v15 = vpop.f32.mrb[37].mxu1  ;;  %v6476_v3 = vpop.f32.mrb[30].mxu0 }
 0x24f   : > { %v5251_v10 = vadd.f32 %v5250_v13, %v5220_v37  ;;  %v5271_v31 = vadd.f32 %v5264_v46, %v5263_v22  ;;  %v4983_v23 = vadd.f32 %v6517_v26, %v8752_v54  ;;  %v5228_v48 = vadd.f32 %v8850_v63, %v5227_v15  ;;  %v6486_v53 = vpop.f32.mrb[38].mxu1  ;;  %v4902_v57 = vpop.f32.mrb[31].mxu0 }
 0x250   : > { %v5042_v55 = vadd.f32 %v5041_v62, %v4979_v12  ;;  %v5110_v44 = vadd.f32 %v5109_v18, %v5079_v9  ;;  %5248 = vst [vmem:[%s8857_s14 + $0x30] sm:$0xff] %v5236_v40  ;;  %v4981_v5 = vadd.f32 %v6518_v17, %v8752_v54  ;;  %v5230_v8 = vpop.f32.mrb[39].mxu1  ;;  %v6519_v43 = vadd.f32 %v6476_v3, %v8834_v4 }
 0x251   : > { %v5272_v58 = vadd.f32 %v5271_v31, %v5265_v21  ;;  %5015 = vst [vmem:[%s8757_s27 + $0xf0] sm:$0xff] %v4983_v23  ;;  %5246 = vst [vmem:[%s8857_s14 + $0x20] sm:$0xff] %v5228_v48  ;;  %v5252_v28 = vadd.f32 %v5251_v10, %v5223_v50  ;;  %v5267_v34 = vmul.f32 %v5228_v48, %v5228_v48 }
 0x252   : > { %v5111_v39 = vadd.f32 %v5110_v44, %v5080_v30  ;;  %5013 = vst [vmem:[%s8757_s27 + $0xe0] sm:$0xff] %v4981_v5  ;;  %v5043_v19 = vadd.f32 %v5042_v55, %v4980_v42  ;;  %v5082_v47 = vmul.f32 %v4981_v5, %v4981_v5  ;;  %v5239_v33 = vadd.f32 %v6486_v53, %v8850_v63 }
 0x253   : > { %v5253_v59 = vadd.f32 %v5252_v28, %v5228_v48  ;;  %v5273_v49 = vadd.f32 %v5272_v58, %v5266_v36  ;;  %v6520_v37 = vadd.f32 %v4902_v57, %v8838_v24  ;;  %v4984_v7 = vadd.f32 %v6519_v43, %v8752_v54 }
 0x254   : > { %v5044_v2 = vadd.f32 %v5043_v19, %v4981_v5  ;;  %v5112_v6 = vadd.f32 %v5111_v39, %v5081_v61  ;;  %v5231_v12 = vadd.f32 %v8850_v63, %v5230_v8  ;;  %5249 = vst [vmem:[%s8857_s14 + $0x38] sm:$0xff] %v5239_v33  ;;  %v5269_v14 = vmul.f32 %v5236_v40, %v5236_v40 }
 0x255   : > { %v5274_v16 = vadd.f32 %v5273_v49, %v5267_v34  ;;  %v4982_v38 = vadd.f32 %v6520_v37, %v8752_v54  ;;  %5016 = vst [vmem:[%s8757_s27 + $0xf8] sm:$0xff] %v4984_v7  ;;  %v5084_v45 = vmul.f32 %v4983_v23, %v4983_v23  ;;  %v5270_v0 = vmul.f32 %v5239_v33, %v5239_v33 }
 0x256   : > { %v5113_v41 = vadd.f32 %v5112_v6, %v5082_v47  ;;  %5247 = vst [vmem:[%s8857_s14 + $0x28] sm:$0xff] %v5231_v12  ;;  %v5254_v4 = vadd.f32 %v5253_v59, %v5231_v12  ;;  %v5268_v32 = vmul.f32 %v5231_v12, %v5231_v12  ;;  %v5085_v11 = vmul.f32 %v4984_v7, %v4984_v7 }
 0x257   : > { %5014 = vst [vmem:[%s8757_s27 + $0xe8] sm:$0xff] %v4982_v38  ;;  %v5045_v56 = vadd.f32 %v5044_v2, %v4982_v38  ;;  %v5083_v25 = vmul.f32 %v4982_v38, %v4982_v38 }
 0x258   : > { %v5255_v24 = vadd.f32 %v5254_v4, %v5236_v40  ;;  %v5275_v51 = vadd.f32 %v5274_v16, %v5268_v32 }
 0x259   : > { %v5046_v42 = vadd.f32 %v5045_v56, %v4983_v23  ;;  %v5114_v50 = vadd.f32 %v5113_v41, %v5083_v25 }
 0x25a   : > { %v5256_v63 = vadd.f32 %v5255_v24, %v5239_v33  ;;  %v5276_v27 = vadd.f32 %v5275_v51, %v5269_v14 }
 0x25b   : > { %v5047_v52 = vadd.f32 %v5046_v42, %v4984_v7  ;;  %v5115_v54 = vadd.f32 %v5114_v50, %v5084_v45 }
 0x25c   : > { %v5257_v22 = vrot.slane %v5256_v63, 4  ;;  %v5277_v60 = vadd.f32 %v5276_v27, %v5270_v0 }
 0x25d   : > { %v5048_v21 = vrot.slane %v5047_v52, 4  ;;  %v5116_v18 = vadd.f32 %v5115_v54, %v5085_v11 }
 0x25e   : > { %v5258_v29 = vadd.f32 %v5257_v22, %v5256_v63  ;;  %v5278_v20 = vrot.slane %v5277_v60, 4 }
 0x25f   : > { %v5049_v30 = vadd.f32 %v5048_v21, %v5047_v52  ;;  %v5117_v13 = vrot.slane %v5116_v18, 4 }
 0x260   : > { %v5259_v46 = vrot.slane %v5258_v29, 2  ;;  %v5279_v26 = vadd.f32 %v5278_v20, %v5277_v60 }
 0x261   : > { %v5050_v35 = vrot.slane %v5049_v30, 2  ;;  %v5118_v1 = vadd.f32 %v5117_v13, %v5116_v18 }
 0x262   : > { %v5260_v62 = vadd.f32 %v5259_v46, %v5258_v29  ;;  %v5280_v9 = vrot.slane %v5279_v26, 2 }
 0x263   : > { %v5051_v40 = vadd.f32 %v5050_v35, %v5049_v30  ;;  %v5119_v17 = vrot.slane %v5118_v1, 2 }
 0x264   : > { %v5261_v15 = vrot.slane %v5260_v62, 1  ;;  %v5281_v3 = vadd.f32 %v5280_v9, %v5279_v26 }
 0x265   : > { %v5052_v10 = vrot.slane %v5051_v40, 1  ;;  %v5120_v31 = vadd.f32 %v5119_v17, %v5118_v1 }
 0x266   : > { %v5282_v23 = vrot.slane %v5281_v3, 1  ;;  %v5262_v53 = vadd.f32 %v5261_v15, %v5260_v62 }
 0x267   : > { %v5121_v48 = vrot.slane %v5120_v31, 1  ;;  %v5053_v61 = vadd.f32 %v5052_v10, %v5051_v40 }
 0x268   : > { %v5283_v57 = vadd.f32 %v5282_v23, %v5281_v3 }
 0x269   : > { %v5122_v55 = vadd.f32 %v5121_v48, %v5120_v31 }
 0x26a   : > { %v5284_v44 = vsel %vm5123_vm8, %v5262_v53, %v5283_v57 }
 0x26b   : > { %v5124_v5 = vsel %vm5123_vm8, %v5053_v61, %v5122_v55  ;;  %5285 = vst [vmem:[%s385_s18] sm:$0x3] %v5284_v44 }
 0x26c   : > { %5125 = vst [vmem:[%s376_s21] sm:$0x3] %v5124_v5 }
 0x26d PF: > { %s20_s30 = sadd.s32 1, %s6864_s30  }
 0x26e   : > { %p17_p4 = scmp.ge.s32.totalorder %s20_s30, 4  }
 0x270   :  { %19 = sbr.rel (!%p17_p4) target bundleno = 1 (0x1), region = 123 }

</bundles_post_ra>
